<compile_context>
chip_gen: v5e
topology: v5e:2x2
jax: 0.10.0
libtpu: 0.0.40
codegen_flags: <defaults>
</compile_context>

<pallas_src>
import functools

import jax
import jax.numpy as jnp
import numpy as np
from jax import lax
from jax.experimental import pallas as pl
from jax.experimental.pallas import tpu as pltpu


# ---------------------------------------------------------------------------
# Fused Pallas kernel: initial poly + L x (Linear -> instance-norm -> affine ->
# ReLU -> [poly multiply]) on one row-tile of points.
# ---------------------------------------------------------------------------
def _fused_poly_inr_kernel(num_layers, in_dim,
                           x0_ref, w_ref, b_ref, at_ref, aff_ref, out_ref):
    x0 = x0_ref[...]                       # (tm, D) f32
    aff = aff_ref[...]                     # (tm, 2L) f32

    def poly(layer):
        # x0 @ A_layer.T computed on the VPU as D broadcast FMAs (K=D=2 would
        # waste ~98% of an MXU pass).
        at = at_ref[layer]                 # (D, H)
        p = x0[:, 0:1] * at[0:1, :]        # (tm,1)*(1,H) -> (tm,H)
        for d in range(1, in_dim):
            p = p + x0[:, d:d + 1] * at[d:d + 1, :]
        return p

    x = poly(0)                            # (tm, H)
    for i in range(num_layers):            # static unroll (L is small)
        # Linear (only real MXU work): x @ W_i.T + b_i
        y = lax.dot_general(
            x, w_ref[i],
            dimension_numbers=(((1,), (1,)), ((), ())),
            preferred_element_type=jnp.float32)
        y = y + b_ref[i]                   # (1, H) broadcast

        # instance_norm over the hidden dim (per point), eps=1e-5; the
        # grid-sampled scale is folded into the rsqrt factor.
        mean = jnp.mean(y, axis=-1, keepdims=True)
        var = jnp.mean(jnp.square(y - mean), axis=-1, keepdims=True)
        scale = aff[:, i:i + 1]
        shift = aff[:, num_layers + i:num_layers + i + 1]
        y = (y - mean) * (scale * lax.rsqrt(var + 1e-5)) + shift

        # ReLU; the module's LeakyReLU(0.2) afterwards is identity on >= 0 input.
        y = jnp.maximum(y, 0.0)

        if i < num_layers - 1:             # poly multiply (all but last layer)
            y = y * poly(i + 1)
        x = y

    out_ref[...] = x


# ---------------------------------------------------------------------------
# Tiling helpers
# ---------------------------------------------------------------------------
def _choose_tile(n):
    # Prefer large row tiles (per-grid-step overhead ~0.35 us), but keep at
    # least 2 grid iterations so both v7x TensorCores get work when N allows.
    for tm in (2048, 1024, 512, 256, 128):
        if n >= 2 * tm:
            return tm
    return 128


def _vmem_budget(tm, num_layers, hidden, in_dim):
    # Worst-case lane-padded f32 row slabs (x0 + affine + output), double
    # buffered, plus the resident stacked weights and some slack.
    row_slab = tm * 128 * 4
    weights = 4 * num_layers * (hidden * hidden + hidden + in_dim * hidden)
    est = 2 * (3 * row_slab + weights) + (4 << 20)
    return int(min(48 << 20, max(16 << 20, est)))   # 48 MiB cap for v7x's 64 MiB VMEM


# ---------------------------------------------------------------------------
# Plain-JAX glue: bilinear grid_sample (border padding, align_corners=True)
# TODO(synk): grid_sample stays in plain JAX (tiny 32x32 map, gather-heavy, not the hot path)
# ---------------------------------------------------------------------------
def grid_sample_border_align(img, grid):
    # img: (1, C, H, W), grid: (1, P, 1, 2) with (x, y) in [-1, 1]  ->  (1, C, P, 1)
    _, C, H, W = img.shape
    gx = grid[0, :, 0, 0]
    gy = grid[0, :, 0, 1]
    ix = jnp.clip((gx + 1.0) * 0.5 * (W - 1), 0.0, W - 1)   # border padding
    iy = jnp.clip((gy + 1.0) * 0.5 * (H - 1), 0.0, H - 1)
    ix0 = jnp.floor(ix)
    iy0 = jnp.floor(iy)
    wx1 = ix - ix0
    wy1 = iy - iy0
    wx0 = 1.0 - wx1
    wy0 = 1.0 - wy1
    ix0i = jnp.clip(ix0, 0, W - 1).astype(jnp.int32)
    ix1i = jnp.clip(ix0 + 1, 0, W - 1).astype(jnp.int32)
    iy0i = jnp.clip(iy0, 0, H - 1).astype(jnp.int32)
    iy1i = jnp.clip(iy0 + 1, 0, H - 1).astype(jnp.int32)
    im = img[0]  # (C, H, W)
    v00 = im[:, iy0i, ix0i]
    v01 = im[:, iy0i, ix1i]
    v10 = im[:, iy1i, ix0i]
    v11 = im[:, iy1i, ix1i]
    out = v00 * (wy0 * wx0) + v01 * (wy0 * wx1) + v10 * (wy1 * wx0) + v11 * (wy1 * wx1)
    return out[None, :, :, None]


# ---------------------------------------------------------------------------
# Parameter construction (deterministic, shapes from the module's __init__)
# ---------------------------------------------------------------------------
def init_params(key, input_dim, num_class, hidden_dim, num_layers, num_emb_layers):
    keys = iter(jax.random.split(key, 64))
    nk = lambda: next(keys)
    p = {}
    p['emb_w'], p['emb_b'] = [], []
    in_f = num_class
    for _ in range(num_emb_layers):
        p['emb_w'].append(0.1 * jax.random.normal(nk(), (hidden_dim, in_f), jnp.float32))
        p['emb_b'].append(0.1 * jax.random.normal(nk(), (hidden_dim,), jnp.float32))
        in_f = hidden_dim
    p['latent'] = jnp.ones((hidden_dim,), jnp.float32)
    p['A_w'] = [0.1 * jax.random.normal(nk(), (input_dim, 1), jnp.float32)
                for _ in range(num_layers)]
    p['A_b'] = [0.1 * jax.random.normal(nk(), (input_dim,), jnp.float32)
                for _ in range(num_layers)]
    p['fc_w'] = [0.1 * jax.random.normal(nk(), (hidden_dim, hidden_dim), jnp.float32)
                 for _ in range(num_layers)]
    p['fc_b'] = [0.1 * jax.random.normal(nk(), (hidden_dim,), jnp.float32)
                 for _ in range(num_layers)]
    # FCLayer_aff.affine = cat([ones(1,1,32,32), zeros(1,1,32,32)], dim=1)
    p['aff'] = [jnp.concatenate([jnp.ones((1, 1, 32, 32), jnp.float32),
                                 jnp.zeros((1, 1, 32, 32), jnp.float32)], axis=1)
                for _ in range(num_layers)]
    return p


# ---------------------------------------------------------------------------
# Forward pass (single fused Pallas call on the hot path)
# ---------------------------------------------------------------------------
def poly_inr_forward(x, c, coord, params):
    x0 = x.astype(jnp.float32)
    N, D = x0.shape
    coords_CAM = coord.reshape(1, -1, 1, 2)

    # --- tiny plain-JAX glue (class embedding + A matrices + affine sampling) ---
    W = c
    for w, b in zip(params['emb_w'], params['emb_b']):
        W = W @ w.T + b
    W = (W + params['latent']).reshape(-1, 1)                       # (H, 1)

    # A_i = Linear(1, D)(W) -> (H, D); stacked transposed -> (L, D, H)
    A_T = jnp.stack([(W @ aw.T + ab).T
                     for aw, ab in zip(params['A_w'], params['A_b'])])

    # grid-sampled per-point affine for every layer, packed as (N, 2L)
    scales, shifts = [], []
    for aff in params['aff']:
        samp = grid_sample_border_align(aff, coords_CAM).reshape(2, -1)
        scales.append(samp[0])
        shifts.append(samp[1])
    aff_all = jnp.stack(scales + shifts, axis=-1)                   # (N, 2L)

    w_all = jnp.stack(params['fc_w'])                               # (L, H, H)
    b_all = jnp.stack(params['fc_b'])[:, None, :]                   # (L, 1, H)
    L, H = w_all.shape[0], w_all.shape[1]

    # --- tiling / padding ---
    tm = _choose_tile(N)
    n_pad = pl.cdiv(N, tm) * tm
    if n_pad != N:
        x0 = jnp.pad(x0, ((0, n_pad - N), (0, 0)))
        aff_all = jnp.pad(aff_all, ((0, n_pad - N), (0, 0)))

    out = pl.pallas_call(
        functools.partial(_fused_poly_inr_kernel, L, D),
        out_shape=jax.ShapeDtypeStruct((n_pad, H), jnp.float32),
        grid_spec=pltpu.PrefetchScalarGridSpec(
            num_scalar_prefetch=0,
            grid=(n_pad // tm,),
            in_specs=[
                pl.BlockSpec((tm, D), lambda i: (i, 0)),        # x0 row tile
                pl.BlockSpec((L, H, H), lambda i: (0, 0, 0)),   # stacked FC weights
                pl.BlockSpec((L, 1, H), lambda i: (0, 0, 0)),   # stacked FC biases
                pl.BlockSpec((L, D, H), lambda i: (0, 0, 0)),   # stacked A_i^T
                pl.BlockSpec((tm, 2 * L), lambda i: (i, 0)),    # affine scale/shift slab
            ],
            out_specs=pl.BlockSpec((tm, H), lambda i: (i, 0)),
        ),
        compiler_params=pltpu.CompilerParams(
            dimension_semantics=("parallel",),
            vmem_limit_bytes=_vmem_budget(tm, L, H, D)),
    )(x0, w_all, b_all, A_T, aff_all)

    return out[:N]


# ---------------------------------------------------------------------------
# Pure-JAX reference (mirrors the PyTorch forward exactly, incl. the LeakyReLU)
# ---------------------------------------------------------------------------
def reference_forward(x, c, coord, params):
    x0 = x
    coords_CAM = coord.reshape(1, -1, 1, 2)
    W = c
    for w, b in zip(params['emb_w'], params['emb_b']):
        W = W @ w.T + b
    W = (W + params['latent']).reshape(-1, 1)
    A_list = [W @ aw.T + ab for aw, ab in zip(params['A_w'], params['A_b'])]

    def fc(i, xin):
        y = xin @ params['fc_w'][i].T + params['fc_b'][i]
        mean = y.mean(-1, keepdims=True)
        var = ((y - mean) ** 2).mean(-1, keepdims=True)
        y = (y - mean) / jnp.sqrt(var + 1e-5)
        aff = grid_sample_border_align(params['aff'][i], coords_CAM).reshape(2, -1, 1)
        y = y * aff[0] + aff[1]
        y = jnp.maximum(y, 0.0)                         # ReLU (FCLayer_aff.act)
        return jnp.where(y >= 0.0, y, 0.2 * y)          # LeakyReLU(0.2)

    L = len(params['fc_w'])
    x_cur = x0 @ A_list[0].T
    for i in range(L - 1):
        x_cur = fc(i, x_cur)
        x_cur = x_cur * (x0 @ A_list[i + 1].T)
    return fc(L - 1, x_cur)


if __name__ == "__main__":
    input_dim, num_class, hidden_dim = 2, 4, 32
    num_layers, num_emb_layers = 3, 2
    side = 16
    N = side * side  # 256 points

    key = jax.random.PRNGKey(0)
    kc, kp = jax.random.split(key, 2)

    lin = jnp.linspace(-1.0, 1.0, side, dtype=jnp.float32)
    gy, gx = jnp.meshgrid(lin, lin, indexing='ij')
    coords = jnp.stack([gx, gy], axis=-1)          # (16, 16, 2)
    x = coords.reshape(N, input_dim)               # (256, 2)
    coord = coords.reshape(1, N, 1, 2)             # grid_sample grid
    c = jax.random.normal(kc, (num_class,), jnp.float32)

    params = init_params(kp, input_dim, num_class, hidden_dim, num_layers, num_emb_layers)

    out = poly_inr_forward(x, c, coord, params)
    out = jax.block_until_ready(out)

    ref = reference_forward(x, c, coord, params)
    np.testing.assert_allclose(np.asarray(out), np.asarray(ref), rtol=2e-2, atol=2e-2)

    print("KERNEL_OK")
</pallas_src>

<mosaic_0001>
module attributes {stable_mosaic.version = 11 : i64} {
  func.func @_fused_poly_inr_kernel(%arg0: i32, %arg1: memref<128x2xf32, #tpu.memory_space<vmem>>, %arg2: memref<3x32x32xf32, #tpu.memory_space<vmem>>, %arg3: memref<3x1x32xf32, #tpu.memory_space<vmem>>, %arg4: memref<3x2x32xf32, #tpu.memory_space<vmem>>, %arg5: memref<128x6xf32, #tpu.memory_space<vmem>>, %arg6: memref<128x32xf32, #tpu.memory_space<vmem>>) attributes {dimension_semantics = [#tpu.dimension_semantics<parallel>], iteration_bounds = array<i64: 2>, scalar_prefetch = 0 : i64, scratch_operands = 0 : i64, tpu.core_type = #tpu.core_type<tc>, window_params = [{transform_indices = @transform_0, window_bounds = array<i64: 128, 2>}, {pipeline_mode = #tpu.pipeline_mode<synchronous>, transform_indices = @transform_1, window_bounds = array<i64: 3, 32, 32>}, {pipeline_mode = #tpu.pipeline_mode<synchronous>, transform_indices = @transform_2, window_bounds = array<i64: 3, 1, 32>}, {pipeline_mode = #tpu.pipeline_mode<synchronous>, transform_indices = @transform_3, window_bounds = array<i64: 3, 2, 32>}, {transform_indices = @transform_4, window_bounds = array<i64: 128, 6>}, {transform_indices = @transform_5, window_bounds = array<i64: 128, 32>}]} {
    %c0 = arith.constant 0 : index
    %c0_0 = arith.constant 0 : index
    %0 = vector.load %arg1[%c0, %c0_0] : memref<128x2xf32, #tpu.memory_space<vmem>>, vector<128x2xf32>
    %c0_1 = arith.constant 0 : index
    %c0_2 = arith.constant 0 : index
    %1 = vector.load %arg5[%c0_1, %c0_2] : memref<128x6xf32, #tpu.memory_space<vmem>>, vector<128x6xf32>
    %c0_3 = arith.constant 0 : index
    %c0_4 = arith.constant 0 : index
    %c0_5 = arith.constant 0 : index
    %2 = vector.load %arg4[%c0_3, %c0_4, %c0_5] : memref<3x2x32xf32, #tpu.memory_space<vmem>>, vector<1x2x32xf32>
    %3 = vector.shape_cast %2 : vector<1x2x32xf32> to vector<2x32xf32>
    %4 = vector.extract_strided_slice %0 {offsets = [0, 0], sizes = [128, 1], strides = [1, 1]} : vector<128x2xf32> to vector<128x1xf32>
    %5 = vector.extract_strided_slice %3 {offsets = [0, 0], sizes = [1, 32], strides = [1, 1]} : vector<2x32xf32> to vector<1x32xf32>
    %6 = vector.broadcast %4 : vector<128x1xf32> to vector<128x32xf32>
    %7 = vector.broadcast %5 : vector<1x32xf32> to vector<128x32xf32>
    %8 = arith.mulf %6, %7 : vector<128x32xf32>
    %9 = vector.extract_strided_slice %0 {offsets = [0, 1], sizes = [128, 1], strides = [1, 1]} : vector<128x2xf32> to vector<128x1xf32>
    %10 = vector.extract_strided_slice %3 {offsets = [1, 0], sizes = [1, 32], strides = [1, 1]} : vector<2x32xf32> to vector<1x32xf32>
    %11 = vector.broadcast %9 : vector<128x1xf32> to vector<128x32xf32>
    %12 = vector.broadcast %10 : vector<1x32xf32> to vector<128x32xf32>
    %13 = arith.mulf %11, %12 : vector<128x32xf32>
    %14 = arith.addf %8, %13 : vector<128x32xf32>
    %c0_6 = arith.constant 0 : index
    %c0_7 = arith.constant 0 : index
    %c0_8 = arith.constant 0 : index
    %15 = vector.load %arg2[%c0_6, %c0_7, %c0_8] : memref<3x32x32xf32, #tpu.memory_space<vmem>>, vector<1x32x32xf32>
    %16 = vector.shape_cast %15 : vector<1x32x32xf32> to vector<32x32xf32>
    %cst = arith.constant dense<0.000000e+00> : vector<128x32xf32>
    %17 = tpu.matmul %14, %16, %cst {dimension_numbers = #tpu.dot_dimension_numbers<[1], [1], [0], [0], [0, 0, 1, 0], [], []>} : vector<128x32xf32>, vector<32x32xf32>, vector<128x32xf32> -> vector<128x32xf32>
    %c0_9 = arith.constant 0 : index
    %c0_10 = arith.constant 0 : index
    %c0_11 = arith.constant 0 : index
    %18 = vector.load %arg3[%c0_9, %c0_10, %c0_11] : memref<3x1x32xf32, #tpu.memory_space<vmem>>, vector<1x1x32xf32>
    %19 = vector.shape_cast %18 : vector<1x1x32xf32> to vector<1x32xf32>
    %20 = vector.broadcast %19 : vector<1x32xf32> to vector<128x32xf32>
    %21 = arith.addf %17, %20 : vector<128x32xf32>
    %cst_12 = arith.constant dense<0.000000e+00> : vector<128xf32>
    %22 = vector.multi_reduction <add>, %21, %cst_12 [1] : vector<128x32xf32> to vector<128xf32>
    %23 = vector.shape_cast %22 : vector<128xf32> to vector<128x1xf32>
    %cst_13 = arith.constant 3.200000e+01 : f32
    %24 = vector.broadcast %cst_13 : f32 to vector<128x1xf32>
    %25 = arith.divf %23, %24 : vector<128x1xf32>
    %26 = vector.broadcast %25 : vector<128x1xf32> to vector<128x32xf32>
    %27 = arith.subf %21, %26 : vector<128x32xf32>
    %28 = arith.mulf %27, %27 : vector<128x32xf32>
    %cst_14 = arith.constant dense<0.000000e+00> : vector<128xf32>
    %29 = vector.multi_reduction <add>, %28, %cst_14 [1] : vector<128x32xf32> to vector<128xf32>
    %30 = vector.shape_cast %29 : vector<128xf32> to vector<128x1xf32>
    %cst_15 = arith.constant 3.200000e+01 : f32
    %31 = vector.broadcast %cst_15 : f32 to vector<128x1xf32>
    %32 = arith.divf %30, %31 : vector<128x1xf32>
    %33 = vector.extract_strided_slice %1 {offsets = [0, 0], sizes = [128, 1], strides = [1, 1]} : vector<128x6xf32> to vector<128x1xf32>
    %34 = vector.extract_strided_slice %1 {offsets = [0, 3], sizes = [128, 1], strides = [1, 1]} : vector<128x6xf32> to vector<128x1xf32>
    %35 = vector.broadcast %25 : vector<128x1xf32> to vector<128x32xf32>
    %36 = arith.subf %21, %35 : vector<128x32xf32>
    %cst_16 = arith.constant 9.99999974E-6 : f32
    %37 = vector.broadcast %cst_16 : f32 to vector<128x1xf32>
    %38 = arith.addf %32, %37 : vector<128x1xf32>
    %39 = math.rsqrt %38 : vector<128x1xf32>
    %40 = arith.mulf %33, %39 : vector<128x1xf32>
    %41 = vector.broadcast %40 : vector<128x1xf32> to vector<128x32xf32>
    %42 = arith.mulf %36, %41 : vector<128x32xf32>
    %43 = vector.broadcast %34 : vector<128x1xf32> to vector<128x32xf32>
    %44 = arith.addf %42, %43 : vector<128x32xf32>
    %cst_17 = arith.constant 0.000000e+00 : f32
    %45 = vector.broadcast %cst_17 : f32 to vector<128x32xf32>
    %46 = arith.maximumf %44, %45 : vector<128x32xf32>
    %c1 = arith.constant 1 : index
    %c0_18 = arith.constant 0 : index
    %c0_19 = arith.constant 0 : index
    %47 = vector.load %arg4[%c1, %c0_18, %c0_19] : memref<3x2x32xf32, #tpu.memory_space<vmem>>, vector<1x2x32xf32>
    %48 = vector.shape_cast %47 : vector<1x2x32xf32> to vector<2x32xf32>
    %49 = vector.extract_strided_slice %0 {offsets = [0, 0], sizes = [128, 1], strides = [1, 1]} : vector<128x2xf32> to vector<128x1xf32>
    %50 = vector.extract_strided_slice %48 {offsets = [0, 0], sizes = [1, 32], strides = [1, 1]} : vector<2x32xf32> to vector<1x32xf32>
    %51 = vector.broadcast %49 : vector<128x1xf32> to vector<128x32xf32>
    %52 = vector.broadcast %50 : vector<1x32xf32> to vector<128x32xf32>
    %53 = arith.mulf %51, %52 : vector<128x32xf32>
    %54 = vector.extract_strided_slice %0 {offsets = [0, 1], sizes = [128, 1], strides = [1, 1]} : vector<128x2xf32> to vector<128x1xf32>
    %55 = vector.extract_strided_slice %48 {offsets = [1, 0], sizes = [1, 32], strides = [1, 1]} : vector<2x32xf32> to vector<1x32xf32>
    %56 = vector.broadcast %54 : vector<128x1xf32> to vector<128x32xf32>
    %57 = vector.broadcast %55 : vector<1x32xf32> to vector<128x32xf32>
    %58 = arith.mulf %56, %57 : vector<128x32xf32>
    %59 = arith.addf %53, %58 : vector<128x32xf32>
    %60 = arith.mulf %46, %59 : vector<128x32xf32>
    %c1_20 = arith.constant 1 : index
    %c0_21 = arith.constant 0 : index
    %c0_22 = arith.constant 0 : index
    %61 = vector.load %arg2[%c1_20, %c0_21, %c0_22] : memref<3x32x32xf32, #tpu.memory_space<vmem>>, vector<1x32x32xf32>
    %62 = vector.shape_cast %61 : vector<1x32x32xf32> to vector<32x32xf32>
    %cst_23 = arith.constant dense<0.000000e+00> : vector<128x32xf32>
    %63 = tpu.matmul %60, %62, %cst_23 {dimension_numbers = #tpu.dot_dimension_numbers<[1], [1], [0], [0], [0, 0, 1, 0], [], []>} : vector<128x32xf32>, vector<32x32xf32>, vector<128x32xf32> -> vector<128x32xf32>
    %c1_24 = arith.constant 1 : index
    %c0_25 = arith.constant 0 : index
    %c0_26 = arith.constant 0 : index
    %64 = vector.load %arg3[%c1_24, %c0_25, %c0_26] : memref<3x1x32xf32, #tpu.memory_space<vmem>>, vector<1x1x32xf32>
    %65 = vector.shape_cast %64 : vector<1x1x32xf32> to vector<1x32xf32>
    %66 = vector.broadcast %65 : vector<1x32xf32> to vector<128x32xf32>
    %67 = arith.addf %63, %66 : vector<128x32xf32>
    %cst_27 = arith.constant dense<0.000000e+00> : vector<128xf32>
    %68 = vector.multi_reduction <add>, %67, %cst_27 [1] : vector<128x32xf32> to vector<128xf32>
    %69 = vector.shape_cast %68 : vector<128xf32> to vector<128x1xf32>
    %cst_28 = arith.constant 3.200000e+01 : f32
    %70 = vector.broadcast %cst_28 : f32 to vector<128x1xf32>
    %71 = arith.divf %69, %70 : vector<128x1xf32>
    %72 = vector.broadcast %71 : vector<128x1xf32> to vector<128x32xf32>
    %73 = arith.subf %67, %72 : vector<128x32xf32>
    %74 = arith.mulf %73, %73 : vector<128x32xf32>
    %cst_29 = arith.constant dense<0.000000e+00> : vector<128xf32>
    %75 = vector.multi_reduction <add>, %74, %cst_29 [1] : vector<128x32xf32> to vector<128xf32>
    %76 = vector.shape_cast %75 : vector<128xf32> to vector<128x1xf32>
    %cst_30 = arith.constant 3.200000e+01 : f32
    %77 = vector.broadcast %cst_30 : f32 to vector<128x1xf32>
    %78 = arith.divf %76, %77 : vector<128x1xf32>
    %79 = vector.extract_strided_slice %1 {offsets = [0, 1], sizes = [128, 1], strides = [1, 1]} : vector<128x6xf32> to vector<128x1xf32>
    %80 = vector.extract_strided_slice %1 {offsets = [0, 4], sizes = [128, 1], strides = [1, 1]} : vector<128x6xf32> to vector<128x1xf32>
    %81 = vector.broadcast %71 : vector<128x1xf32> to vector<128x32xf32>
    %82 = arith.subf %67, %81 : vector<128x32xf32>
    %cst_31 = arith.constant 9.99999974E-6 : f32
    %83 = vector.broadcast %cst_31 : f32 to vector<128x1xf32>
    %84 = arith.addf %78, %83 : vector<128x1xf32>
    %85 = math.rsqrt %84 : vector<128x1xf32>
    %86 = arith.mulf %79, %85 : vector<128x1xf32>
    %87 = vector.broadcast %86 : vector<128x1xf32> to vector<128x32xf32>
    %88 = arith.mulf %82, %87 : vector<128x32xf32>
    %89 = vector.broadcast %80 : vector<128x1xf32> to vector<128x32xf32>
    %90 = arith.addf %88, %89 : vector<128x32xf32>
    %cst_32 = arith.constant 0.000000e+00 : f32
    %91 = vector.broadcast %cst_32 : f32 to vector<128x32xf32>
    %92 = arith.maximumf %90, %91 : vector<128x32xf32>
    %c2 = arith.constant 2 : index
    %c0_33 = arith.constant 0 : index
    %c0_34 = arith.constant 0 : index
    %93 = vector.load %arg4[%c2, %c0_33, %c0_34] : memref<3x2x32xf32, #tpu.memory_space<vmem>>, vector<1x2x32xf32>
    %94 = vector.shape_cast %93 : vector<1x2x32xf32> to vector<2x32xf32>
    %95 = vector.extract_strided_slice %0 {offsets = [0, 0], sizes = [128, 1], strides = [1, 1]} : vector<128x2xf32> to vector<128x1xf32>
    %96 = vector.extract_strided_slice %94 {offsets = [0, 0], sizes = [1, 32], strides = [1, 1]} : vector<2x32xf32> to vector<1x32xf32>
    %97 = vector.broadcast %95 : vector<128x1xf32> to vector<128x32xf32>
    %98 = vector.broadcast %96 : vector<1x32xf32> to vector<128x32xf32>
    %99 = arith.mulf %97, %98 : vector<128x32xf32>
    %100 = vector.extract_strided_slice %0 {offsets = [0, 1], sizes = [128, 1], strides = [1, 1]} : vector<128x2xf32> to vector<128x1xf32>
    %101 = vector.extract_strided_slice %94 {offsets = [1, 0], sizes = [1, 32], strides = [1, 1]} : vector<2x32xf32> to vector<1x32xf32>
    %102 = vector.broadcast %100 : vector<128x1xf32> to vector<128x32xf32>
    %103 = vector.broadcast %101 : vector<1x32xf32> to vector<128x32xf32>
    %104 = arith.mulf %102, %103 : vector<128x32xf32>
    %105 = arith.addf %99, %104 : vector<128x32xf32>
    %106 = arith.mulf %92, %105 : vector<128x32xf32>
    %c2_35 = arith.constant 2 : index
    %c0_36 = arith.constant 0 : index
    %c0_37 = arith.constant 0 : index
    %107 = vector.load %arg2[%c2_35, %c0_36, %c0_37] : memref<3x32x32xf32, #tpu.memory_space<vmem>>, vector<1x32x32xf32>
    %108 = vector.shape_cast %107 : vector<1x32x32xf32> to vector<32x32xf32>
    %cst_38 = arith.constant dense<0.000000e+00> : vector<128x32xf32>
    %109 = tpu.matmul %106, %108, %cst_38 {dimension_numbers = #tpu.dot_dimension_numbers<[1], [1], [0], [0], [0, 0, 1, 0], [], []>} : vector<128x32xf32>, vector<32x32xf32>, vector<128x32xf32> -> vector<128x32xf32>
    %c2_39 = arith.constant 2 : index
    %c0_40 = arith.constant 0 : index
    %c0_41 = arith.constant 0 : index
    %110 = vector.load %arg3[%c2_39, %c0_40, %c0_41] : memref<3x1x32xf32, #tpu.memory_space<vmem>>, vector<1x1x32xf32>
    %111 = vector.shape_cast %110 : vector<1x1x32xf32> to vector<1x32xf32>
    %112 = vector.broadcast %111 : vector<1x32xf32> to vector<128x32xf32>
    %113 = arith.addf %109, %112 : vector<128x32xf32>
    %cst_42 = arith.constant dense<0.000000e+00> : vector<128xf32>
    %114 = vector.multi_reduction <add>, %113, %cst_42 [1] : vector<128x32xf32> to vector<128xf32>
    %115 = vector.shape_cast %114 : vector<128xf32> to vector<128x1xf32>
    %cst_43 = arith.constant 3.200000e+01 : f32
    %116 = vector.broadcast %cst_43 : f32 to vector<128x1xf32>
    %117 = arith.divf %115, %116 : vector<128x1xf32>
    %118 = vector.broadcast %117 : vector<128x1xf32> to vector<128x32xf32>
    %119 = arith.subf %113, %118 : vector<128x32xf32>
    %120 = arith.mulf %119, %119 : vector<128x32xf32>
    %cst_44 = arith.constant dense<0.000000e+00> : vector<128xf32>
    %121 = vector.multi_reduction <add>, %120, %cst_44 [1] : vector<128x32xf32> to vector<128xf32>
    %122 = vector.shape_cast %121 : vector<128xf32> to vector<128x1xf32>
    %cst_45 = arith.constant 3.200000e+01 : f32
    %123 = vector.broadcast %cst_45 : f32 to vector<128x1xf32>
    %124 = arith.divf %122, %123 : vector<128x1xf32>
    %125 = vector.extract_strided_slice %1 {offsets = [0, 2], sizes = [128, 1], strides = [1, 1]} : vector<128x6xf32> to vector<128x1xf32>
    %126 = vector.extract_strided_slice %1 {offsets = [0, 5], sizes = [128, 1], strides = [1, 1]} : vector<128x6xf32> to vector<128x1xf32>
    %127 = vector.broadcast %117 : vector<128x1xf32> to vector<128x32xf32>
    %128 = arith.subf %113, %127 : vector<128x32xf32>
    %cst_46 = arith.constant 9.99999974E-6 : f32
    %129 = vector.broadcast %cst_46 : f32 to vector<128x1xf32>
    %130 = arith.addf %124, %129 : vector<128x1xf32>
    %131 = math.rsqrt %130 : vector<128x1xf32>
    %132 = arith.mulf %125, %131 : vector<128x1xf32>
    %133 = vector.broadcast %132 : vector<128x1xf32> to vector<128x32xf32>
    %134 = arith.mulf %128, %133 : vector<128x32xf32>
    %135 = vector.broadcast %126 : vector<128x1xf32> to vector<128x32xf32>
    %136 = arith.addf %134, %135 : vector<128x32xf32>
    %cst_47 = arith.constant 0.000000e+00 : f32
    %137 = vector.broadcast %cst_47 : f32 to vector<128x32xf32>
    %138 = arith.maximumf %136, %137 : vector<128x32xf32>
    %c0_48 = arith.constant 0 : index
    %c0_49 = arith.constant 0 : index
    %139 = vector.load %arg6[%c0_48, %c0_49] : memref<128x32xf32, #tpu.memory_space<vmem>>, vector<128x32xf32>
    tpu.vector_store %arg6[%c0_48, %c0_49], %138 {strides = array<i32>} : memref<128x32xf32, #tpu.memory_space<vmem>>, vector<128x32xf32>,
    return
  }
  func.func @transform_0(%arg0: i32) -> (i32, i32) {
    %c0_i32 = arith.constant 0 : i32
    %c0_i32_0 = arith.constant 0 : i32
    return %arg0, %c0_i32 : i32, i32
  }
  func.func @transform_1(%arg0: i32) -> (i32, i32, i32) {
    %c0_i32 = arith.constant 0 : i32
    %c0_i32_0 = arith.constant 0 : i32
    %c0_i32_1 = arith.constant 0 : i32
    %c0_i32_2 = arith.constant 0 : i32
    return %c0_i32, %c0_i32_0, %c0_i32_1 : i32, i32, i32
  }
  func.func @transform_2(%arg0: i32) -> (i32, i32, i32) {
    %c0_i32 = arith.constant 0 : i32
    %c0_i32_0 = arith.constant 0 : i32
    %c0_i32_1 = arith.constant 0 : i32
    %c0_i32_2 = arith.constant 0 : i32
    return %c0_i32, %c0_i32_0, %c0_i32_1 : i32, i32, i32
  }
  func.func @transform_3(%arg0: i32) -> (i32, i32, i32) {
    %c0_i32 = arith.constant 0 : i32
    %c0_i32_0 = arith.constant 0 : i32
    %c0_i32_1 = arith.constant 0 : i32
    %c0_i32_2 = arith.constant 0 : i32
    return %c0_i32, %c0_i32_0, %c0_i32_1 : i32, i32, i32
  }
  func.func @transform_4(%arg0: i32) -> (i32, i32) {
    %c0_i32 = arith.constant 0 : i32
    %c0_i32_0 = arith.constant 0 : i32
    return %arg0, %c0_i32 : i32, i32
  }
  func.func @transform_5(%arg0: i32) -> (i32, i32) {
    %c0_i32 = arith.constant 0 : i32
    %c0_i32_0 = arith.constant 0 : i32
    return %arg0, %c0_i32 : i32, i32
  }
}

</mosaic_0001>

<bundles_post_ra>
// kernel: tpu_custom_call.1
= control target key start
LH: loop header
LB: loop body
LE: loop exit
PB: predicated region body
PF: predicated region fallthrough
CT: control target
= control target key end

     0   :  { %s3107_s18 = smov 0   ;;  %s4855_s0 = inlined_call_operand.vmem [shape: f32[256,2], index: 0, kind: input, shape index: {}]   ;;  %s4856_s1 = inlined_call_operand.vmem [shape: f32[3,32,32], index: 1, kind: input, shape index: {}]   ;;  %s4857_s2 = inlined_call_operand.vmem [shape: f32[3,1,32], index: 2, kind: input, shape index: {}]   ;;  %s4858_s3 = inlined_call_operand.vmem [shape: f32[3,2,32], index: 3, kind: input, shape index: {}]   ;;  %s4859_s4 = inlined_call_operand.vmem [shape: f32[256,6], index: 4, kind: input, shape index: {}]   ;;  %s4860_s5 = inlined_call_operand.vmem [shape: f32[256,32], index: 5, kind: output, shape index: {}]  }
   0x1 LB: > { %s2756_s19 = sadd.s32 4294967295, %s3068_s18   ;;  %p2760_p0 = scmp.ge.s32.totalorder %s3068_s18, 1  ;;  %s3068_s18 = sphi %s3107_s18, %s15_s18  }
   0x2   : > { %p199_p1 = scmp.lt.s32.totalorder %s3068_s18, 3 }
   0x4   : > { %p200_p2 = pnand %p2760_p0, %p199_p1 }
   0x6   : > { %203 = sbr.rel (%p200_p2) target bundleno = 1934 (0x78e), region = 40 }
   0xb   : > { %s2761_s20 = sshll.u32 %s2756_s19, 4  ;;  %v4874_v0 = vmov 0   ;;  %v4861_v17 = vmov 1   ;;  %v480_v21 = vld [vmem:[%s4856_s1 + $0x18] sm:$0xff]  ;;  %vm485_vm0 = vcmask 261120   ;;  %v479_v25 = vld [vmem:[%s4856_s1 + $0x10] sm:$0xff] }
   0xc   : > { %2870 = vset.pattern.permute.xlu2 %v4874_v0  ;;  %2869 = vset.pattern.permute.xlu1 %v4874_v0  ;;  %p233_p3 = scmp.lt.s32.totalorder %s2761_s20, 31  ;;  %v478_v26 = vld [vmem:[%s4856_s1 + $0x8] sm:$0xff]  ;;  %v477_v30 = vld [vmem:[%s4856_s1] sm:$0xff] }
   0xd   : > { %2868 = vset.pattern.permute.xlu0 %v4874_v0  ;;  %2767 = vmatpush.xpose.msk.msra.mxu0 %vm485_vm0, %v480_v21  ;;  %v282_v40 = vld [vmem:[%s4858_s3] sm:$0x3] }
   0xe   : > { %s5009_s20 = smov (!%p233_p3, %s2761_s20), 31  ;;  %2841 = vmatpush.xpose.msk.msra.mxu3 %vm485_vm0, %v480_v21  ;;  %v3206_v41 = vperm.slane %v282_v40, 0  ;;  %v3208_v42 = vperm.slane %v282_v40, 1 }
   0xf   : > { %s3118_s21 = sshll.u32 %s5009_s20, 3 }
  0x10   : > { %s3124_s24 = scalar_lea.vmem %s4855_s0, %s3118_s21  ;;  %s3505_s14 = scalar_lea.vmem %s4859_s4, %s3118_s21 }
  0x11   : > { %v254_v1 = vld [vmem:[%s3124_s24 + $0x20] sm:$0xff]  ;;  %v252_v2 = vld [vmem:[%s3124_s24 + $0x10] sm:$0xff]  ;;  %v255_v4 = vld [vmem:[%s3124_s24 + $0x28] sm:$0xff]  ;;  %2768 = vmatpush.xpose.msk.msra.mxu0 %vm485_vm0, %v479_v25  ;;  %s4728_s20 = scalar_lea.vmem %s4860_s5, %s3118_s21 }
  0x12   : > { %v250_v3 = vld [vmem:[%s3124_s24] sm:$0xff]  ;;  %305 = vperm.xlu2 %2870, %v254_v1   ;;  %295 = vperm.xlu1 %2869, %v252_v2   ;;  %v253_v5 = vld [vmem:[%s3124_s24 + $0x18] sm:$0xff]  ;;  %v251_v6 = vld [vmem:[%s3124_s24 + $0x8] sm:$0xff] }
  0x13   : > { %285 = vperm.xlu0 %2868, %v250_v3   ;;  %v258_v7 = vld [vmem:[%s3124_s24 + $0x40] sm:$0xff]  ;;  %v257_v8 = vld [vmem:[%s3124_s24 + $0x38] sm:$0xff]  ;;  %v256_v9 = vld [vmem:[%s3124_s24 + $0x30] sm:$0xff]  ;;  %2842 = vmatpush.xpose.msk.msra.mxu3 %vm485_vm0, %v479_v25 }
  0x14   : > { %v261_v10 = vld [vmem:[%s3124_s24 + $0x58] sm:$0xff]  ;;  %v260_v11 = vld [vmem:[%s3124_s24 + $0x50] sm:$0xff]  ;;  %v259_v12 = vld [vmem:[%s3124_s24 + $0x48] sm:$0xff] }
  0x15   : > { %v264_v13 = vld [vmem:[%s3124_s24 + $0x70] sm:$0xff]  ;;  %v263_v14 = vld [vmem:[%s3124_s24 + $0x68] sm:$0xff]  ;;  %v262_v15 = vld [vmem:[%s3124_s24 + $0x60] sm:$0xff]  ;;  %2769 = vmatpush.xpose.msk.msra.mxu0 %vm485_vm0, %v478_v26 }
  0x16   : > { %v265_v16 = vld [vmem:[%s3124_s24 + $0x78] sm:$0xff] }
  0x17   : > { %2843 = vmatpush.xpose.msk.msra.mxu3 %vm485_vm0, %v478_v26 }
  0x19   : > { %2770 = vmatpush.xpose.msk.msra.mxu0 %vm485_vm0, %v477_v30 }
  0x1a   : > { %310 = vperm.xlu2 %2870, %v255_v4   ;;  %300 = vperm.xlu1 %2869, %v253_v5  }
  0x1b   : > { %290 = vperm.xlu0 %2868, %v251_v6   ;;  %2844 = vmatpush.xpose.msk.msra.mxu3 %vm485_vm0, %v477_v30 }
  0x22   : > { %325 = vperm.xlu2 %2870, %v258_v7   ;;  %320 = vperm.xlu1 %2869, %v257_v8  }
  0x23   : > { %315 = vperm.xlu0 %2868, %v256_v9  }
  0x2a   : > { %340 = vperm.xlu2 %2870, %v261_v10   ;;  %335 = vperm.xlu1 %2869, %v260_v11  }
  0x2b   : > { %330 = vperm.xlu0 %2868, %v259_v12  }
  0x32   : > { %355 = vperm.xlu2 %2870, %v264_v13   ;;  %350 = vperm.xlu1 %2869, %v263_v14  }
  0x33   : > { %345 = vperm.xlu0 %2868, %v262_v15  }
  0x3a   : > { %2872 = vset.pattern.permute.xlu2 %v4861_v17  ;;  %2871 = vset.pattern.permute.xlu1 %v4861_v17 }
  0x3b   : > { %360 = vperm.xlu0 %2868, %v265_v16   ;;  %385 = vperm.xlu2 %2872, %v251_v6  }
  0x3c   : > { %381 = vperm.xlu1 %2871, %v250_v3  }
  0x43   : > { %2873 = vset.pattern.permute.xlu0 %v4861_v17  ;;  %397 = vperm.xlu2 %2872, %v254_v1   ;;  %v266_v17 = vld [vmem:[%s3505_s14] sm:$0xff] }
  0x44   : > { %393 = vperm.xlu1 %2871, %v253_v5   ;;  %389 = vperm.xlu0 %2873, %v252_v2  }
  0x4b   : > { %405 = vperm.xlu2 %2872, %v256_v9  }
  0x4c   : > { %401 = vperm.xlu1 %2871, %v255_v4   ;;  %409 = vperm.xlu0 %2873, %v257_v8  }
  0x53   : > { %417 = vperm.xlu2 %2872, %v259_v12  }
  0x54   : > { %413 = vperm.xlu1 %2871, %v258_v7   ;;  %421 = vperm.xlu0 %2873, %v260_v11  }
  0x5b   : > { %429 = vperm.xlu2 %2872, %v262_v15  }
  0x5c   : > { %425 = vperm.xlu1 %2871, %v261_v10   ;;  %433 = vperm.xlu0 %2873, %v263_v14  }
  0x63   : > { %441 = vperm.xlu2 %2872, %v265_v16  }
  0x64   : > { %437 = vperm.xlu1 %2871, %v264_v13  }
  0x6b   : > { %2876 = vset.pattern.permute.xlu2 %v4874_v0 }
  0x6c   : > { %v3146_v18 = vpop.permute.xlu2 %305  ;;  %2874 = vset.pattern.permute.xlu1 %v4874_v0 }
  0x6d   : > { %v368_v8 = vmul.f32 %v3206_v41, %v3146_v18 }
  0x74   : > { %v3149_v19 = vpop.permute.xlu2 %310 }
  0x75   : > { %v369_v15 = vmul.f32 %v3206_v41, %v3149_v19 }
  0x7c   : > { %v3151_v20 = vpop.permute.xlu2 %325 }
  0x7d   : > { %4913 = vst [vmem:[#allocation2_spill] sm:$0xff] %v3151_v20 }
  0x84   : > { %v3158_v22 = vpop.permute.xlu2 %340  ;;  %v3160_v23 = vpop.permute.xlu1 %295 }
  0x85   : > { %4914 = vst [vmem:[#allocation3_spill] sm:$0xff] %v3158_v22  ;;  %v3162_v24 = vpop.permute.xlu0 %285  ;;  %v366_v61 = vmul.f32 %v3206_v41, %v3160_v23 }
  0x86   : > { %v364_v46 = vmul.f32 %v3206_v41, %v3162_v24 }
  0x8c   : > { %v3172_v27 = vpop.permute.xlu2 %355  ;;  %v3174_v28 = vpop.permute.xlu1 %300 }
  0x8d   : > { %4915 = vst [vmem:[#allocation4_spill] sm:$0xff] %v3172_v27  ;;  %v3178_v29 = vpop.permute.xlu0 %290  ;;  %v367_v3 = vmul.f32 %v3206_v41, %v3174_v28  ;;  %v378_v16 = vmul.f32 %v3206_v41, %v3172_v27 }
  0x8e   : > { %v365_v55 = vmul.f32 %v3206_v41, %v3178_v29 }
  0x94   : > { %v3185_v31 = vpop.permute.xlu1 %320 }
  0x95   : > { %4916 = vst [vmem:[#allocation5_spill] sm:$0xff] %v3185_v31  ;;  %v3187_v32 = vpop.permute.xlu0 %315  ;;  %v3189_v33 = vpop.permute.xlu2 %385 }
  0x96   : > { %v446_v49 = vmul.f32 %v3208_v42, %v3189_v33 }
  0x98   : > { %v462_v57 = vadd.f32 %v446_v49, %v365_v55  ;;  %v371_v55 = vmul.f32 %v3206_v41, %v3185_v31 }
  0x9c   : > { %v3191_v34 = vpop.permute.xlu1 %335 }
  0x9d   : > { %4917 = vst [vmem:[#allocation6_spill] sm:$0xff] %v3191_v34  ;;  %v3193_v35 = vpop.permute.xlu0 %330  ;;  %v3195_v36 = vpop.permute.xlu2 %397 }
  0x9e   : > { %4918 = vst [vmem:[#allocation7_spill] sm:$0xff] %v3193_v35  ;;  %v449_v5 = vmul.f32 %v3208_v42, %v3195_v36 }
  0xa0   : > { %v465_v11 = vadd.f32 %v449_v5, %v368_v8  ;;  %v374_v5 = vmul.f32 %v3206_v41, %v3191_v34 }
  0xa4   : > { %v3197_v37 = vpop.permute.xlu1 %350 }
  0xa5   : > { %4919 = vst [vmem:[#allocation8_spill] sm:$0xff] %v3197_v37  ;;  %v3199_v38 = vpop.permute.xlu0 %345  ;;  %v3201_v39 = vpop.permute.xlu2 %405  ;;  %v377_v9 = vmul.f32 %v3206_v41, %v3197_v37 }
  0xa6   : > { %4920 = vst [vmem:[#allocation9_spill] sm:$0xff] %v3199_v38  ;;  %v376_v51 = vmul.f32 %v3206_v41, %v3199_v38  ;;  %v451_v40 = vmul.f32 %v3208_v42, %v3201_v39 }
  0xad   : > { %v3210_v43 = vpop.permute.xlu0 %360  ;;  %v3212_v44 = vpop.permute.xlu2 %417 }
  0xae   : > { %4921 = vst [vmem:[#allocation10_spill] sm:$0xff] %v3210_v43  ;;  %v3214_v45 = vpop.permute.xlu1 %381 }
  0xaf   : > { %4922 = vst [vmem:[#allocation11_spill] sm:$0xff] %v3212_v44  ;;  %v445_v47 = vmul.f32 %v3208_v42, %v3214_v45 }
  0xb1   : > { %v461_v48 = vadd.f32 %v445_v47, %v364_v46  ;;  %v370_v47 = vmul.f32 %v3206_v41, %v3187_v32 }
  0xb3   : > { %2771 = vmatmul.msk.f32.vlgmr.msra.gmra.mxu0 %vm485_vm0, %v461_v48  ;;  %v379_v48 = vmul.f32 %v3206_v41, %v3210_v43  ;;  %v467_v49 = vadd.f32 %v451_v40, %v370_v47 }
  0xb5   : > { %v3223_v50 = vpop.permute.xlu2 %429 }
  0xb6   : > { %4923 = vst [vmem:[#allocation12_spill] sm:$0xff] %v3223_v50  ;;  %v457_v52 = vmul.f32 %v3208_v42, %v3223_v50  ;;  %v3229_v53 = vpop.permute.xlu1 %393  ;;  %v3231_v54 = vpop.permute.xlu0 %389 }
  0xb7   : > { %v447_v58 = vmul.f32 %v3208_v42, %v3231_v54  ;;  %v448_v63 = vmul.f32 %v3208_v42, %v3229_v53 }
  0xb8   : > { %v473_v56 = vadd.f32 %v457_v52, %v376_v51 }
  0xb9   : > { %v463_v62 = vadd.f32 %v447_v58, %v366_v61  ;;  %v464_v4 = vadd.f32 %v448_v63, %v367_v3  ;;  %v372_v58 = vmul.f32 %v3206_v41, %v3151_v20  ;;  %v373_v63 = vmul.f32 %v3206_v41, %v3193_v35 }
  0xba   : > { %2783 = vmatmul.msk.f32.vlgmr.msra.gmra.mxu3 %vm485_vm0, %v473_v56 }
  0xbb   : > { %2772 = vmatmul.msk.f32.gmra.mxu0 %vm485_vm0, %v462_v57 }
  0xbd   : > { %v3279_v30 = vpop.permute.xlu2 %441 }
  0xbe   : > { %v3239_v59 = vpop.permute.xlu1 %401  ;;  %v3241_v60 = vpop.permute.xlu0 %409  ;;  %4929 = vst [vmem:[#allocation18_spill] sm:$0xff] %v3279_v30  ;;  %v460_v46 = vmul.f32 %v3208_v42, %v3279_v30 }
  0xbf   : > { %v450_v13 = vmul.f32 %v3208_v42, %v3239_v59  ;;  %v452_v52 = vmul.f32 %v3208_v42, %v3241_v60 }
  0xc0   : > { %v476_v51 = vadd.f32 %v460_v46, %v379_v48 }
  0xc1   : > { %v466_v25 = vadd.f32 %v450_v13, %v369_v15  ;;  %v468_v56 = vadd.f32 %v452_v52, %v371_v55 }
  0xc3   : > { %2773 = vmatmul.msk.f32.gmra.mxu0 %vm485_vm0, %v463_v62  ;;  %v454_v62 = vmul.f32 %v3208_v42, %v3212_v44 }
  0xc5   : > { %v470_v3 = vadd.f32 %v454_v62, %v373_v63 }
  0xc6   : > { %v3248_v1 = vpop.permute.xlu1 %413  ;;  %v3250_v2 = vpop.permute.xlu0 %421 }
  0xc7   : > { %4924 = vst [vmem:[#allocation13_spill] sm:$0xff] %v3248_v1  ;;  %v453_v57 = vmul.f32 %v3208_v42, %v3248_v1 }
  0xc8   : > { %4925 = vst [vmem:[#allocation14_spill] sm:$0xff] %v3250_v2 }
  0xc9   : > { %v469_v61 = vadd.f32 %v453_v57, %v372_v58 }
  0xcb   : > { %2774 = vmatmul.msk.f32.gmra.mxu0 %vm485_vm0, %v464_v4  ;;  %v455_v4 = vmul.f32 %v3208_v42, %v3250_v2 }
  0xcd   : > { %v471_v8 = vadd.f32 %v455_v4, %v374_v5 }
  0xce   : > { %v3257_v6 = vpop.permute.xlu1 %425  ;;  %v3259_v7 = vpop.permute.xlu0 %433 }
  0xcf   : > { %4926 = vst [vmem:[#allocation15_spill] sm:$0xff] %v3257_v6  ;;  %v458_v10 = vmul.f32 %v3208_v42, %v3259_v7 }
  0xd0   : > { %4927 = vst [vmem:[#allocation16_spill] sm:$0xff] %v3259_v7 }
  0xd1   : > { %v474_v12 = vadd.f32 %v458_v10, %v377_v9  ;;  %v456_v9 = vmul.f32 %v3208_v42, %v3257_v6  ;;  %v375_v10 = vmul.f32 %v3206_v41, %v3158_v22 }
  0xd3   : > { %2775 = vmatmul.msk.f32.gmra.mxu0 %vm485_vm0, %v465_v11  ;;  %2784 = vmatmul.msk.f32.gmra.mxu3 %vm485_vm0, %v474_v12  ;;  %v472_v11 = vadd.f32 %v456_v9, %v375_v10  ;;  %v2929_v12 = vld [vmem:[%s4857_s2] ss:$0 sm:$0xff] }
  0xd6   : > { %v3271_v14 = vpop.permute.xlu1 %437 }
  0xd7   : > { %4928 = vst [vmem:[#allocation17_spill] sm:$0xff] %v3271_v14  ;;  %v459_v21 = vmul.f32 %v3208_v42, %v3271_v14 }
  0xd9   : > { %v475_v26 = vadd.f32 %v459_v21, %v378_v16 }
  0xdb   : > { %2776 = vmatmul.msk.f32.gmra.mxu0 %vm485_vm0, %v466_v25  ;;  %2785 = vmatmul.msk.f32.gmra.mxu3 %vm485_vm0, %v475_v26 }
  0xe3   : > { %2777 = vmatmul.msk.f32.gmra.mxu0 %vm485_vm0, %v467_v49  ;;  %2786 = vmatmul.msk.f32.gmra.mxu3 %vm485_vm0, %v476_v51 }
  0xeb   : > { %2778 = vmatmul.msk.f32.gmra.mxu0 %vm485_vm0, %v468_v56 }
  0xf3   : > { %2779 = vmatmul.msk.f32.gmra.mxu0 %vm485_vm0, %v469_v61 }
  0xfb   : > { %2780 = vmatmul.msk.f32.gmra.mxu0 %vm485_vm0, %v470_v3 }
 0x103   : > { %2781 = vmatmul.msk.f32.gmra.mxu0 %vm485_vm0, %v471_v8 }
 0x10b   : > { %2782 = vmatmul.msk.f32.gmra.mxu0 %vm485_vm0, %v472_v11 }
 0x130   : > { %v563_v13 = vpop.f32.mrf.mxu0 }
 0x131   : > { %v3321_v15 = vadd.f32 %v2929_v12, %v563_v13 }
 0x133   : > { %v611_v16 = vsel %vm485_vm0, %v3321_v15, 0.0 }
 0x134   : > { %612 = vadd.xlane.f32.xlu0 %v611_v16 }
 0x138   : > { %v566_v21 = vpop.f32.mrf.mxu0 }
 0x139   : > { %v3325_v25 = vadd.f32 %v2929_v12, %v566_v21 }
 0x13b   : > { %v614_v41 = vsel %vm485_vm0, %v3325_v25, 0.0 }
 0x13c   : > { %615 = vadd.xlane.f32.xlu1 %v614_v41 }
 0x13d   : > { %v599_v42 = vpop.f32.mrf.mxu3 }
 0x13e   : > { %v3329_v26 = vadd.f32 %v2929_v12, %v599_v42 }
 0x140   : > { %v569_v40 = vpop.f32.mrf.mxu0  ;;  %v647_v46 = vsel %vm485_vm0, %v3329_v26, 0.0 }
 0x141   : > { %648 = vadd.xlane.f32.xlu2 %v647_v46  ;;  %v3333_v47 = vadd.f32 %v2929_v12, %v569_v40 }
 0x143   : > { %v617_v49 = vsel %vm485_vm0, %v3333_v47, 0.0 }
 0x148   : > { %v572_v48 = vpop.f32.mrf.mxu0 }
 0x149   : > { %618 = vadd.xlane.f32.xlu2 %v617_v49  ;;  %v3337_v51 = vadd.f32 %v2929_v12, %v572_v48 }
 0x14b   : > { %v620_v55 = vsel %vm485_vm0, %v3337_v51, 0.0 }
 0x150   : > { %v575_v52 = vpop.f32.mrf.mxu0 }
 0x151   : > { %621 = vadd.xlane.f32.xlu2 %v620_v55  ;;  %v3345_v62 = vadd.f32 %v2929_v12, %v575_v52 }
 0x153   : > { %v623_v8 = vsel %vm485_vm0, %v3345_v62, 0.0 }
 0x156   : > { %v602_v56 = vpop.f32.mrf.mxu3 }
 0x157   : > { %v3341_v57 = vadd.f32 %v2929_v12, %v602_v56 }
 0x158   : > { %v578_v58 = vpop.f32.mrf.mxu0 }
 0x159   : > { %v650_v61 = vsel %vm485_vm0, %v3341_v57, 0.0  ;;  %v3353_v9 = vadd.f32 %v2929_v12, %v578_v58 }
 0x15a   : > { %651 = vadd.xlane.f32.xlu0 %v650_v61 }
 0x15b   : > { %v626_v41 = vsel %vm485_vm0, %v3353_v9, 0.0 }
 0x15e   : > { %v605_v63 = vpop.f32.mrf.mxu3 }
 0x15f   : > { %v3347_v3 = vadd.f32 %v2929_v12, %v605_v63 }
 0x160   : > { %v581_v4 = vpop.f32.mrf.mxu0 }
 0x161   : > { %v653_v5 = vsel %vm485_vm0, %v3347_v3, 0.0  ;;  %v3365_v40 = vadd.f32 %v2929_v12, %v581_v4 }
 0x162   : > { %654 = vadd.xlane.f32.xlu1 %v653_v5  ;;  %624 = vadd.xlane.f32.xlu0 %v623_v8 }
 0x163   : > { %v629_v49 = vsel %vm485_vm0, %v3365_v40, 0.0 }
 0x166   : > { %v608_v10 = vpop.f32.mrf.mxu3 }
 0x167   : > { %v3355_v11 = vadd.f32 %v2929_v12, %v608_v10 }
 0x168   : > { %v584_v13 = vpop.f32.mrf.mxu0 }
 0x169   : > { %v3357_v16 = vadd.f32 %v2929_v12, %v584_v13  ;;  %v656_v21 = vsel %vm485_vm0, %v3355_v11, 0.0  ;;  %v3072_v13 = vmov 32.0  }
 0x16a   : > { %657 = vadd.xlane.f32.xlu2 %v656_v21  ;;  %627 = vadd.xlane.f32.xlu1 %v626_v41  ;;  %2932 = vrcp.f32 %v3072_v13 }
 0x16b   : > { %v632_v42 = vsel %vm485_vm0, %v3357_v16, 0.0 }
 0x16c   : > { %633 = vadd.xlane.f32.xlu0 %v632_v42 }
 0x170   : > { %v587_v46 = vpop.f32.mrf.mxu0  ;;  %v2933_v21 = vpop.eup %2932 }
 0x171   : > { %v3367_v48 = vadd.f32 %v2929_v12, %v587_v46  ;;  %v660_v41 = vmul.f32 32.0, %v2933_v21  ;;  %vm664_vm1 = vweird.f32 %v2933_v21 }
 0x172   : > { %630 = vadd.xlane.f32.xlu2 %v629_v49 }
 0x173   : > { %v635_v52 = vsel %vm485_vm0, %v3367_v48, 0.0  ;;  %v661_v42 = vsub.f32 1.0, %v660_v41 }
 0x174   : > { %636 = vadd.xlane.f32.xlu1 %v635_v52 }
 0x175   : > { %v662_v46 = vmul.f32 %v2933_v21, %v661_v42 }
 0x177   : > { %v663_v49 = vadd.f32 %v2933_v21, %v662_v46 }
 0x178   : > { %v590_v55 = vpop.f32.mrf.mxu0 }
 0x179   : > { %v3373_v56 = vadd.f32 %v2929_v12, %v590_v55  ;;  %v3385_v52 = vsel %vm664_vm1, %v2933_v21, %v663_v49 }
 0x17b   : > { %v638_v58 = vsel %vm485_vm0, %v3373_v56, 0.0 }
 0x17c   : > { %639 = vadd.xlane.f32.xlu2 %v638_v58 }
 0x180   : > { %v593_v61 = vpop.f32.mrf.mxu0 }
 0x181   : > { %v3377_v63 = vadd.f32 %v2929_v12, %v593_v61 }
 0x183   : > { %v641_v4 = vsel %vm485_vm0, %v3377_v63, 0.0 }
 0x184   : > { %642 = vadd.xlane.f32.xlu0 %v641_v4 }
 0x188   : > { %v596_v5 = vpop.f32.mrf.mxu0 }
 0x189   : > { %v3381_v8 = vadd.f32 %v2929_v12, %v596_v5 }
 0x18b   : > { %v644_v10 = vsel %vm485_vm0, %v3381_v8, 0.0 }
 0x18c   : > { %645 = vadd.xlane.f32.xlu1 %v644_v10 }
 0x1a7   : > { %v613_v55 = vpop.xlane.xlu0 %612 }
 0x1a8   : > { %v666_v58 = vmul.f32 %v3385_v52, %v613_v55 }
 0x1aa   : > { %v3389_v12 = vsub.f32 %v3321_v15, %v666_v58 }
 0x1ac   : > { %v698_v61 = vmul.f32 %v3389_v12, %v3389_v12 }
 0x1ae   : > { %v714_v4 = vsel %vm485_vm0, %v698_v61, 0.0 }
 0x1af   : > { %v616_v5 = vpop.xlane.xlu1 %615  ;;  %715 = vadd.xlane.f32.xlu0 %v714_v4 }
 0x1b0   : > { %v667_v10 = vmul.f32 %v3385_v52, %v616_v5 }
 0x1b2   : > { %v3396_v13 = vsub.f32 %v3325_v25, %v667_v10 }
 0x1b4   : > { %v649_v21 = vpop.xlane.xlu2 %648  ;;  %v699_v41 = vmul.f32 %v3396_v13, %v3396_v13 }
 0x1b5   : > { %v678_v42 = vmul.f32 %v3385_v52, %v649_v21 }
 0x1b6   : > { %v717_v15 = vsel %vm485_vm0, %v699_v41, 0.0 }
 0x1b7   : > { %v3403_v46 = vsub.f32 %v3329_v26, %v678_v42  ;;  %718 = vadd.xlane.f32.xlu1 %v717_v15 }
 0x1b9   : > { %v710_v49 = vmul.f32 %v3403_v46, %v3403_v46 }
 0x1bb   : > { %v750_v55 = vsel %vm485_vm0, %v710_v49, 0.0 }
 0x1bc   : > { %v619_v58 = vpop.xlane.xlu2 %618  ;;  %751 = vadd.xlane.f32.xlu0 %v750_v55 }
 0x1bd   : > { %v668_v25 = vmul.f32 %v3385_v52, %v619_v58 }
 0x1bf   : > { %v3410_v61 = vsub.f32 %v3333_v47, %v668_v25 }
 0x1c1   : > { %v700_v4 = vmul.f32 %v3410_v61, %v3410_v61 }
 0x1c3   : > { %v720_v5 = vsel %vm485_vm0, %v700_v4, 0.0 }
 0x1c4   : > { %v622_v26 = vpop.xlane.xlu2 %621  ;;  %721 = vadd.xlane.f32.xlu2 %v720_v5 }
 0x1c5   : > { %v669_v10 = vmul.f32 %v3385_v52, %v622_v26 }
 0x1c7   : > { %v3417_v21 = vsub.f32 %v3337_v51, %v669_v10 }
 0x1c9   : > { %v701_v41 = vmul.f32 %v3417_v21, %v3417_v21 }
 0x1cb   : > { %v723_v42 = vsel %vm485_vm0, %v701_v41, 0.0 }
 0x1cc   : > { %724 = vadd.xlane.f32.xlu0 %v723_v42 }
 0x1cd   : > { %v652_v47 = vpop.xlane.xlu0 %651 }
 0x1ce   : > { %v679_v15 = vmul.f32 %v3385_v52, %v652_v47 }
 0x1d0   : > { %v3424_v49 = vsub.f32 %v3341_v57, %v679_v15 }
 0x1d2   : > { %4930 = vst [vmem:[#allocation19_spill] sm:$0xff] %v3424_v49  ;;  %v711_v55 = vmul.f32 %v3424_v49, %v3424_v49 }
 0x1d4   : > { %v753_v58 = vsel %vm485_vm0, %v711_v55, 0.0 }
 0x1d5   : > { %v655_v25 = vpop.xlane.xlu1 %654  ;;  %754 = vadd.xlane.f32.xlu1 %v753_v58  ;;  %v625_v51 = vpop.xlane.xlu0 %624 }
 0x1d6   : > { %v680_v4 = vmul.f32 %v3385_v52, %v655_v25  ;;  %v670_v5 = vmul.f32 %v3385_v52, %v625_v51 }
 0x1d8   : > { %v3432_v26 = vsub.f32 %v3347_v3, %v680_v4  ;;  %v3435_v10 = vsub.f32 %v3345_v62, %v670_v5 }
 0x1da   : > { %4931 = vst [vmem:[#allocation20_spill] sm:$0xff] %v3432_v26  ;;  %v712_v57 = vmul.f32 %v3432_v26, %v3432_v26  ;;  %v702_v41 = vmul.f32 %v3435_v10, %v3435_v10  ;;  %v278_v26 = vld [vmem:[%s3505_s14 + $0x60] sm:$0xff] }
 0x1dc   : > { %v756_v42 = vsel %vm485_vm0, %v712_v57, 0.0  ;;  %v726_v47 = vsel %vm485_vm0, %v702_v41, 0.0 }
 0x1dd   : > { %v658_v15 = vpop.xlane.xlu2 %657  ;;  %757 = vadd.xlane.f32.xlu2 %v756_v42  ;;  %v628_v55 = vpop.xlane.xlu1 %627  ;;  %727 = vadd.xlane.f32.xlu1 %v726_v47 }
 0x1de   : > { %v681_v3 = vmul.f32 %v3385_v52, %v658_v15  ;;  %v671_v58 = vmul.f32 %v3385_v52, %v628_v55 }
 0x1df   : > { %v634_v62 = vpop.xlane.xlu0 %633 }
 0x1e0   : > { %v3446_v25 = vsub.f32 %v3355_v11, %v681_v3  ;;  %v3449_v51 = vsub.f32 %v3353_v9, %v671_v58  ;;  %v673_v4 = vmul.f32 %v3385_v52, %v634_v62 }
 0x1e2   : > { %4932 = vst [vmem:[#allocation21_spill] sm:$0xff] %v3446_v25  ;;  %v3453_v5 = vsub.f32 %v3357_v16, %v673_v4  ;;  %v703_v57 = vmul.f32 %v3449_v51, %v3449_v51  ;;  %v713_v41 = vmul.f32 %v3446_v25, %v3446_v25 }
 0x1e4   : > { %v729_v42 = vsel %vm485_vm0, %v703_v57, 0.0  ;;  %v759_v47 = vsel %vm485_vm0, %v713_v41, 0.0  ;;  %v705_v11 = vmul.f32 %v3453_v5, %v3453_v5 }
 0x1e5   : > { %v631_v9 = vpop.xlane.xlu2 %630  ;;  %730 = vadd.xlane.f32.xlu2 %v729_v42  ;;  %760 = vadd.xlane.f32.xlu0 %v759_v47 }
 0x1e6   : > { %v672_v15 = vmul.f32 %v3385_v52, %v631_v9  ;;  %v735_v16 = vsel %vm485_vm0, %v705_v11, 0.0 }
 0x1e7   : > { %v637_v55 = vpop.xlane.xlu1 %636  ;;  %736 = vadd.xlane.f32.xlu1 %v735_v16 }
 0x1e8   : > { %v3466_v3 = vsub.f32 %v3365_v40, %v672_v15  ;;  %v674_v58 = vmul.f32 %v3385_v52, %v637_v55 }
 0x1ea   : > { %v3470_v62 = vsub.f32 %v3367_v48, %v674_v58  ;;  %v704_v4 = vmul.f32 %v3466_v3, %v3466_v3 }
 0x1ec   : > { %v732_v57 = vsel %vm485_vm0, %v704_v4, 0.0  ;;  %v706_v41 = vmul.f32 %v3470_v62, %v3470_v62 }
 0x1ed   : > { %733 = vadd.xlane.f32.xlu0 %v732_v57 }
 0x1ee   : > { %v738_v42 = vsel %vm485_vm0, %v706_v41, 0.0 }
 0x1ef   : > { %v640_v47 = vpop.xlane.xlu2 %639  ;;  %739 = vadd.xlane.f32.xlu2 %v738_v42 }
 0x1f0   : > { %v675_v40 = vmul.f32 %v3385_v52, %v640_v47 }
 0x1f2   : > { %v3480_v11 = vsub.f32 %v3373_v56, %v675_v40 }
 0x1f4   : > { %4933 = vst [vmem:[#allocation22_spill] sm:$0xff] %v3480_v11  ;;  %v707_v48 = vmul.f32 %v3480_v11, %v3480_v11 }
 0x1f6   : > { %v741_v9 = vsel %vm485_vm0, %v707_v48, 0.0  ;;  %v4863_v48 = vmov 3  }
 0x1f7   : > { %742 = vadd.xlane.f32.xlu0 %v741_v9  ;;  %v643_v15 = vpop.xlane.xlu0 %642 }
 0x1f8   : > { %v676_v16 = vmul.f32 %v3385_v52, %v643_v15  ;;  %2878 = vset.pattern.permute.xlu0 %v4863_v48 }
 0x1fa   : > { %v3487_v55 = vsub.f32 %v3377_v63, %v676_v16 }
 0x1fc   : > { %4934 = vst [vmem:[#allocation23_spill] sm:$0xff] %v3487_v55  ;;  %v708_v58 = vmul.f32 %v3487_v55, %v3487_v55 }
 0x1fe   : > { %v744_v4 = vsel %vm485_vm0, %v708_v58, 0.0 }
 0x1ff   : > { %v646_v56 = vpop.xlane.xlu1 %645  ;;  %745 = vadd.xlane.f32.xlu1 %v744_v4 }
 0x200   : > { %v677_v57 = vmul.f32 %v3385_v52, %v646_v56 }
 0x202   : > { %v3494_v41 = vsub.f32 %v3381_v8, %v677_v57  ;;  %v3508_v8 = vld [vmem:[%s3505_s14 + $0x10] sm:$0xff] }
 0x204   : > { %4935 = vst [vmem:[#allocation24_spill] sm:$0xff] %v3494_v41  ;;  %v709_v42 = vmul.f32 %v3494_v41, %v3494_v41 }
 0x206   : > { %v747_v47 = vsel %vm485_vm0, %v709_v42, 0.0 }
 0x207   : > { %748 = vadd.xlane.f32.xlu2 %v747_v47 }
 0x20b   : > { %1078 = vperm.xlu0 %2878, %v3508_v8  }
 0x213   : > { %2880 = vset.pattern.permute.xlu0 %v4874_v0 }
 0x222   : > { %v716_v63 = vpop.xlane.xlu0 %715 }
 0x223   : > { %v762_v40 = vmul.f32 %v716_v63, %v3385_v52 }
 0x225   : > { %v778_v9 = vadd.f32 1e-05, %v762_v40 }
 0x227   : > { %2934 = vrsqrt.f32 %v778_v9  ;;  %vm800_vm3 = vweird.f32 %v778_v9 }
 0x22a   : > { %v719_v15 = vpop.xlane.xlu1 %718 }
 0x22b   : > { %v763_v16 = vmul.f32 %v719_v15, %v3385_v52 }
 0x22d   : > { %v2935_v58 = vpop.eup %2934  ;;  %v779_v4 = vadd.f32 1e-05, %v763_v16 }
 0x22e   : > { %v795_v56 = vmul.f32 %v2935_v58, %v778_v9  ;;  %vm801_vm2 = vweird.f32 %v2935_v58  ;;  %v267_v9 = vld [vmem:[%s3505_s14 + $0x8] sm:$0xff] }
 0x22f   : > { %2936 = vrsqrt.f32 %v779_v4  ;;  %v752_v22 = vpop.xlane.xlu0 %751  ;;  %vm802_vm4 = vmor %vm800_vm3, %vm801_vm2  ;;  %vm810_vm6 = vweird.f32 %v779_v4 }
 0x230   : > { %v796_v57 = vmul.f32 %v2935_v58, %v795_v56 }
 0x232   : > { %v797_v42 = vmul.f32 0.5, %v796_v57 }
 0x234   : > { %v798_v47 = vsub.f32 1.5, %v797_v42 }
 0x235   : > { %v2937_v63 = vpop.eup %2936 }
 0x236   : > { %v805_v40 = vmul.f32 %v2937_v63, %v779_v4  ;;  %v799_v48 = vmul.f32 %v2935_v58, %v798_v47  ;;  %vm811_vm5 = vweird.f32 %v2937_v63 }
 0x237   : > { %v722_v6 = vpop.xlane.xlu2 %721  ;;  %vm812_vm7 = vmor %vm810_vm6, %vm811_vm5 }
 0x238   : > { %v806_v15 = vmul.f32 %v2937_v63, %v805_v40  ;;  %v764_v16 = vmul.f32 %v722_v6, %v3385_v52  ;;  %v803_v43 = vsel %vm802_vm4, %v2935_v58, %v799_v48  ;;  %v774_v40 = vmul.f32 %v752_v22, %v3385_v52 }
 0x239   : > { %v954_v25 = vmul.f32 %v803_v43, %v266_v17 }
 0x23a   : > { %v807_v56 = vmul.f32 0.5, %v806_v15  ;;  %v780_v30 = vadd.f32 1e-05, %v764_v16  ;;  %v3521_v58 = vadd.f32 1e-05, %v774_v40 }
 0x23b   : > { %972 = vperm.xlu1 %2874, %v954_v25   ;;  %v4936_v25 = vmov 3  }
 0x23c   : > { %v808_v57 = vsub.f32 1.5, %v807_v56  ;;  %2938 = vrsqrt.f32 %v780_v30  ;;  %vm820_vm9 = vweird.f32 %v780_v30  ;;  %vm920_vm4 = vweird.f32 %v3521_v58 }
 0x23e   : > { %v809_v42 = vmul.f32 %v2937_v63, %v808_v57 }
 0x23f   : > { %v725_v0 = vpop.xlane.xlu0 %724 }
 0x240   : > { %v765_v47 = vmul.f32 %v725_v0, %v3385_v52  ;;  %v813_v41 = vsel %vm812_vm7, %v2937_v63, %v809_v42 }
 0x241   : > { %v955_v34 = vmul.f32 %v813_v41, %v267_v9 }
 0x242   : > { %v2939_v6 = vpop.eup %2938  ;;  %v3518_v48 = vadd.f32 1e-05, %v765_v47 }
 0x243   : > { %v815_v43 = vmul.f32 %v2939_v6, %v780_v30  ;;  %977 = vperm.xlu2 %2876, %v955_v34   ;;  %2875 = vset.pattern.permute.xlu1 %v4936_v25  ;;  %vm821_vm8 = vweird.f32 %v2939_v6 }
 0x244   : > { %1068 = vperm.xlu1 %2875, %v266_v17   ;;  %2940 = vrsqrt.f32 %v3518_v48  ;;  %vm822_vm10 = vmor %vm820_vm9, %vm821_vm8  ;;  %v4937_v17 = vmov 0   ;;  %vm830_vm15 = vweird.f32 %v3518_v48 }
 0x245   : > { %v816_v4 = vmul.f32 %v2939_v6, %v815_v43  ;;  %2942 = vrsqrt.f32 %v3521_v58 }
 0x247   : > { %v817_v15 = vmul.f32 0.5, %v816_v4 }
 0x248   : > { %v755_v16 = vpop.xlane.xlu1 %754 }
 0x249   : > { %v818_v0 = vsub.f32 1.5, %v817_v15  ;;  %v775_v22 = vmul.f32 %v755_v16, %v3385_v52 }
 0x24a   : > { %v3527_v63 = vpop.eup %2940 }
 0x24b   : > { %v791_v41 = vadd.f32 1e-05, %v775_v22  ;;  %2877 = vset.pattern.permute.xlu2 %v4936_v25  ;;  %v819_v34 = vmul.f32 %v2939_v6, %v818_v0  ;;  %v3531_v42 = vpop.eup %2942  ;;  %v825_v47 = vmul.f32 %v3527_v63, %v3518_v48  ;;  %vm831_vm14 = vweird.f32 %v3527_v63 }
 0x24c   : > { %1073 = vperm.xlu2 %2877, %v267_v9   ;;  %2879 = vset.pattern.permute.xlu1 %v4937_v17  ;;  %v915_v4 = vmul.f32 %v3531_v42, %v3521_v58  ;;  %vm921_vm1 = vweird.f32 %v3531_v42  ;;  %vm3577_vm3 = vmor %vm830_vm15, %vm831_vm14 }
 0x24d   : > { %2944 = vrsqrt.f32 %v791_v41  ;;  %v823_v56 = vsel %vm822_vm10, %v2939_v6, %v819_v34  ;;  %v826_v6 = vmul.f32 %v3527_v63, %v825_v47  ;;  %vm930_vm12 = vweird.f32 %v791_v41  ;;  %vm3600_vm6 = vmor %vm920_vm4, %vm921_vm1 }
 0x24e   : > { %v956_v57 = vmul.f32 %v823_v56, %v3508_v8  ;;  %v916_v22 = vmul.f32 %v3531_v42, %v915_v4  ;;  %v3549_v56 = vld [vmem:[%s3505_s14 + $0x38] sm:$0xff] }
 0x250   : > { %v758_v30 = vpop.xlane.xlu2 %757  ;;  %v728_v40 = vpop.xlane.xlu1 %727  ;;  %982 = vperm.xlu0 %2880, %v956_v57   ;;  %v827_v57 = vmul.f32 0.5, %v826_v6  ;;  %v917_v2 = vmul.f32 0.5, %v916_v22 }
 0x251   : > { %v776_v43 = vmul.f32 %v758_v30, %v3385_v52  ;;  %v766_v9 = vmul.f32 %v728_v40, %v3385_v52 }
 0x252   : > { %v828_v55 = vsub.f32 1.5, %v827_v57  ;;  %v918_v57 = vsub.f32 1.5, %v917_v2 }
 0x253   : > { %v2945_v15 = vpop.eup %2944  ;;  %v3540_v8 = vadd.f32 1e-05, %v776_v43  ;;  %v3542_v16 = vadd.f32 1e-05, %v766_v9 }
 0x254   : > { %v925_v0 = vmul.f32 %v2945_v15, %v791_v41  ;;  %2881 = vset.pattern.permute.xlu2 %v4937_v17  ;;  %vm931_vm11 = vweird.f32 %v2945_v15  ;;  %v829_v35 = vmul.f32 %v3527_v63, %v828_v55 }
 0x255   : > { %2946 = vrsqrt.f32 %v3540_v8  ;;  %vm932_vm13 = vmor %vm930_vm12, %vm931_vm11  ;;  %vm940_vm5 = vweird.f32 %v3540_v8  ;;  %vm840_vm9 = vweird.f32 %v3542_v16 }
 0x256   : > { %v926_v34 = vmul.f32 %v2945_v15, %v925_v0  ;;  %2948 = vrsqrt.f32 %v3542_v16  ;;  %v833_v48 = vsel %vm3577_vm3, %v3527_v63, %v829_v35 }
 0x258   : > { %v927_v30 = vmul.f32 0.5, %v926_v34  ;;  %v731_v40 = vpop.xlane.xlu2 %730  ;;  %v761_v47 = vpop.xlane.xlu0 %760  ;;  %2888 = vset.pattern.permute.xlu0 %v4936_v25 }
 0x259   : > { %v767_v43 = vmul.f32 %v731_v40, %v3385_v52  ;;  %v777_v9 = vmul.f32 %v761_v47, %v3385_v52  ;;  %1103 = vperm.xlu0 %2888, %v3549_v56   ;;  %v3563_v40 = vld [vmem:[%s3505_s14 + $0x68] sm:$0xff] }
 0x25a   : > { %v928_v4 = vsub.f32 1.5, %v927_v30  ;;  %v737_v49 = vpop.xlane.xlu1 %736 }
 0x25b   : > { %v2947_v0 = vpop.eup %2946  ;;  %v3555_v27 = vadd.f32 1e-05, %v767_v43  ;;  %v3557_v6 = vadd.f32 1e-05, %v777_v9 }
 0x25c   : > { %v3559_v34 = vpop.eup %2948  ;;  %v935_v14 = vmul.f32 %v2947_v0, %v3540_v8  ;;  %v929_v47 = vmul.f32 %v2945_v15, %v928_v4  ;;  %vm941_vm2 = vweird.f32 %v2947_v0 }
 0x25d   : > { %v835_v22 = vmul.f32 %v3559_v34, %v3542_v16  ;;  %2950 = vrsqrt.f32 %v3555_v27  ;;  %vm942_vm7 = vmor %vm940_vm5, %vm941_vm2  ;;  %vm841_vm8 = vweird.f32 %v3559_v34  ;;  %vm950_vm12 = vweird.f32 %v3557_v6 }
 0x25e   : > { %v936_v30 = vmul.f32 %v2947_v0, %v935_v14  ;;  %2952 = vrsqrt.f32 %v3557_v6  ;;  %v933_v43 = vsel %vm932_vm13, %v2945_v15, %v929_v47  ;;  %v919_v15 = vmul.f32 %v3531_v42, %v918_v57  ;;  %v3595_v57 = vld [vmem:[%s3505_s14 + $0x70] sm:$0xff]  ;;  %vm842_vm11 = vmor %vm840_vm9, %vm841_vm8 }
 0x25f   : > { %v836_v9 = vmul.f32 %v3559_v34, %v835_v22  ;;  %v967_v41 = vmul.f32 %v933_v43, %v3563_v40  ;;  %vm850_vm15 = vweird.f32 %v3555_v27 }
 0x260   : > { %v937_v4 = vmul.f32 0.5, %v936_v30  ;;  %v734_v44 = vpop.xlane.xlu0 %733 }
 0x261   : > { %v837_v37 = vmul.f32 0.5, %v836_v9  ;;  %v768_v2 = vmul.f32 %v734_v44, %v3385_v52  ;;  %1037 = vperm.xlu1 %2879, %v967_v41   ;;  %1128 = vperm.xlu0 %2888, %v278_v26   ;;  %v769_v9 = vmul.f32 %v737_v49, %v3385_v52  ;;  %v923_v49 = vsel %vm3600_vm6, %v3531_v42, %v919_v15 }
 0x262   : > { %v938_v14 = vsub.f32 1.5, %v937_v4  ;;  %v269_v4 = vld [vmem:[%s3505_s14 + $0x18] sm:$0xff]  ;;  %v740_v20 = vpop.xlane.xlu2 %739 }
 0x263   : > { %v3582_v47 = vpop.eup %2950  ;;  %v3586_v44 = vadd.f32 1e-05, %v768_v2  ;;  %v838_v30 = vsub.f32 1.5, %v837_v37  ;;  %v3612_v55 = vadd.f32 1e-05, %v769_v9  ;;  %v770_v16 = vmul.f32 %v740_v20, %v3385_v52  ;;  %v270_v9 = vld [vmem:[%s3505_s14 + $0x20] sm:$0xff] }
 0x264   : > { %v2953_v22 = vpop.eup %2952  ;;  %v845_v43 = vmul.f32 %v3582_v47, %v3555_v27  ;;  %v939_v41 = vmul.f32 %v2947_v0, %v938_v14  ;;  %v957_v14 = vmul.f32 %v833_v48, %v269_v4  ;;  %vm851_vm14 = vweird.f32 %v3582_v47 }
 0x265   : > { %v945_v8 = vmul.f32 %v2953_v22, %v3557_v6  ;;  %2954 = vrsqrt.f32 %v3586_v44  ;;  %v839_v7 = vmul.f32 %v3559_v34, %v838_v30  ;;  %vm951_vm10 = vweird.f32 %v2953_v22  ;;  %vm852_vm1 = vmor %vm850_vm15, %vm851_vm14 }
 0x266   : > { %v846_v35 = vmul.f32 %v3582_v47, %v845_v43  ;;  %v943_v37 = vsel %vm942_vm7, %v2947_v0, %v939_v41  ;;  %v966_v0 = vmul.f32 %v923_v49, %v278_v26  ;;  %2956 = vrsqrt.f32 %v3612_v55  ;;  %vm952_vm13 = vmor %vm950_vm12, %vm951_vm10 }
 0x267   : > { %v946_v63 = vmul.f32 %v2953_v22, %v945_v8  ;;  %v968_v2 = vmul.f32 %v943_v37, %v3595_v57  ;;  %v843_v41 = vsel %vm842_vm11, %v3559_v34, %v839_v7  ;;  %v3632_v37 = vld [vmem:[%s3505_s14 + $0x78] sm:$0xff]  ;;  %vm860_vm3 = vweird.f32 %v3586_v44 }
 0x268   : > { %v847_v43 = vmul.f32 0.5, %v846_v35  ;;  %v958_v49 = vmul.f32 %v843_v41, %v270_v9  ;;  %vm870_vm9 = vweird.f32 %v3612_v55 }
 0x269   : > { %v947_v11 = vmul.f32 0.5, %v946_v63  ;;  %1042 = vperm.xlu2 %2881, %v968_v2   ;;  %987 = vperm.xlu1 %2879, %v957_v14   ;;  %v3634_v2 = vadd.f32 1e-05, %v770_v16 }
 0x26a   : > { %2893 = vset.pattern.permute.xlu0 %v4937_v17  ;;  %v743_v42 = vpop.xlane.xlu0 %742  ;;  %v848_v8 = vsub.f32 1.5, %v847_v43 }
 0x26b   : > { %v3618_v15 = vpop.eup %2954  ;;  %v948_v48 = vsub.f32 1.5, %v947_v11  ;;  %v771_v30 = vmul.f32 %v743_v42, %v3385_v52  ;;  %1032 = vperm.xlu0 %2893, %v966_v0   ;;  %v271_v42 = vld [vmem:[%s3505_s14 + $0x28] sm:$0xff]  ;;  %vm880_vm12 = vweird.f32 %v3634_v2 }
 0x26c   : > { %v855_v26 = vmul.f32 %v3618_v15, %v3586_v44  ;;  %v3638_v7 = vpop.eup %2956  ;;  %v849_v34 = vmul.f32 %v3582_v47, %v848_v8  ;;  %vm861_vm2 = vweird.f32 %v3618_v15 }
 0x26d   : > { %v787_v11 = vadd.f32 1e-05, %v771_v30  ;;  %v949_v58 = vmul.f32 %v2953_v22, %v948_v48  ;;  %v865_v14 = vmul.f32 %v3638_v7, %v3612_v55  ;;  %vm862_vm5 = vmor %vm860_vm3, %vm861_vm2  ;;  %vm871_vm8 = vweird.f32 %v3638_v7 }
 0x26e   : > { %v856_v35 = vmul.f32 %v3618_v15, %v855_v26  ;;  %v853_v48 = vsel %vm852_vm1, %v3582_v47, %v849_v34  ;;  %vm872_vm10 = vmor %vm870_vm9, %vm871_vm8 }
 0x26f   : > { %2958 = vrsqrt.f32 %v787_v11  ;;  %v953_v63 = vsel %vm952_vm13, %v2953_v22, %v949_v58  ;;  %v866_v30 = vmul.f32 %v3638_v7, %v865_v14  ;;  %v959_v26 = vmul.f32 %v853_v48, %v271_v42 }
 0x270   : > { %v969_v20 = vmul.f32 %v953_v63, %v3632_v37  ;;  %v857_v6 = vmul.f32 0.5, %v856_v35  ;;  %2960 = vrsqrt.f32 %v3634_v2  ;;  %vm890_vm6 = vweird.f32 %v787_v11  ;;  %v272_v63 = vld [vmem:[%s3505_s14 + $0x30] sm:$0xff] }
 0x271   : > { %992 = vperm.xlu2 %2881, %v958_v49   ;;  %2882 = vset.pattern.permute.xlu1 %v4936_v25  ;;  %v867_v8 = vmul.f32 0.5, %v866_v30 }
 0x272   : > { %1083 = vperm.xlu1 %2882, %v269_v4   ;;  %v858_v0 = vsub.f32 1.5, %v857_v6  ;;  %v746_v58 = vpop.xlane.xlu1 %745 }
 0x273   : > { %1047 = vperm.xlu0 %2893, %v969_v20   ;;  %v772_v49 = vmul.f32 %v746_v58, %v3385_v52  ;;  %v3662_v20 = vld [vmem:[%s3505_s14 + $0x48] sm:$0xff]  ;;  %v868_v14 = vsub.f32 1.5, %v867_v8 }
 0x274   : > { %v859_v41 = vmul.f32 %v3618_v15, %v858_v0 }
 0x275   : > { %v2959_v22 = vpop.eup %2958  ;;  %v3666_v48 = vadd.f32 1e-05, %v772_v49  ;;  %v2789_v49 = vld [vmem:[%s4856_s1 + $0x28] sm:$0xff] }
 0x276   : > { %v885_v43 = vmul.f32 %v2959_v22, %v787_v11  ;;  %v3650_v16 = vpop.eup %2960  ;;  %vm891_vm4 = vweird.f32 %v2959_v22 }
 0x277   : > { %v875_v35 = vmul.f32 %v3650_v16, %v3634_v2  ;;  %vm892_vm7 = vmor %vm890_vm6, %vm891_vm4  ;;  %2962 = vrsqrt.f32 %v3666_v48  ;;  %vm881_vm11 = vweird.f32 %v3650_v16  ;;  %vm900_vm15 = vweird.f32 %v3666_v48 }
 0x278   : > { %v886_v4 = vmul.f32 %v2959_v22, %v885_v43  ;;  %vm882_vm13 = vmor %vm880_vm12, %vm881_vm11 }
 0x279   : > { %2883 = vset.pattern.permute.xlu2 %v4936_v25  ;;  %v876_v44 = vmul.f32 %v3650_v16, %v875_v35 }
 0x27a   : > { %v887_v27 = vmul.f32 0.5, %v886_v4  ;;  %1088 = vperm.xlu2 %2883, %v270_v9   ;;  %2884 = vset.pattern.permute.xlu1 %v4937_v17  ;;  %v863_v9 = vsel %vm862_vm5, %v3618_v15, %v859_v41  ;;  %v749_v11 = vpop.xlane.xlu2 %748  ;;  %v869_v4 = vmul.f32 %v3638_v7, %v868_v14 }
 0x27b   : > { %997 = vperm.xlu1 %2884, %v959_v26   ;;  %v960_v0 = vmul.f32 %v863_v9, %v272_v63  ;;  %v877_v15 = vmul.f32 0.5, %v876_v44 }
 0x27c   : > { %v888_v47 = vsub.f32 1.5, %v887_v27  ;;  %v873_v26 = vsel %vm872_vm10, %v3638_v7, %v869_v4  ;;  %v2791_v7 = vld [vmem:[%s4856_s1 + $0x38] sm:$0xff] }
 0x27d   : > { %v878_v30 = vsub.f32 1.5, %v877_v15  ;;  %v2963_v41 = vpop.eup %2962  ;;  %2793 = vmatpush.xpose.msk.msra.mxu1 %vm485_vm0, %v2791_v7  ;;  %2845 = vmatpush.xpose.msk.msrb.mxu3 %vm485_vm0, %v2791_v7 }
 0x27e   : > { %v889_v6 = vmul.f32 %v2959_v22, %v888_v47  ;;  %v895_v58 = vmul.f32 %v2963_v41, %v3666_v48  ;;  %v2790_v47 = vld [vmem:[%s4856_s1 + $0x30] sm:$0xff]  ;;  %vm901_vm14 = vweird.f32 %v2963_v41  ;;  %v2787_v48 = vld [vmem:[%s4858_s3 + $0x2] sm:$0x3] }
 0x27f   : > { %v879_v55 = vmul.f32 %v3650_v16, %v878_v30  ;;  %vm902_vm1 = vmor %vm900_vm15, %vm901_vm14 }
 0x280   : > { %v893_v34 = vsel %vm892_vm7, %v2959_v22, %v889_v6  ;;  %v773_v22 = vmul.f32 %v749_v11, %v3385_v52  ;;  %v896_v8 = vmul.f32 %v2963_v41, %v895_v58  ;;  %v2788_v6 = vld [vmem:[%s4856_s1 + $0x20] sm:$0xff]  ;;  %v276_v11 = vld [vmem:[%s3505_s14 + $0x50] sm:$0xff] }
 0x281   : > { %v963_v43 = vmul.f32 %v893_v34, %v3662_v20  ;;  %2794 = vmatpush.xpose.msk.msra.mxu1 %vm485_vm0, %v2790_v47  ;;  %2846 = vmatpush.xpose.msk.msrb.mxu3 %vm485_vm0, %v2790_v47 }
 0x282   : > { %2886 = vset.pattern.permute.xlu2 %v4937_v17  ;;  %v789_v27 = vadd.f32 1e-05, %v773_v22 }
 0x283   : > { %2885 = vset.pattern.permute.xlu1 %v4936_v25  ;;  %1002 = vperm.xlu2 %2886, %v960_v0  }
 0x284   : > { %1017 = vperm.xlu0 %2893, %v963_v43   ;;  %1093 = vperm.xlu1 %2885, %v271_v42   ;;  %v961_v42 = vmul.f32 %v873_v26, %v3549_v56  ;;  %2964 = vrsqrt.f32 %v789_v27  ;;  %v3691_v56 = vld [vmem:[%s3505_s14 + $0x40] sm:$0xff]  ;;  %vm910_vm3 = vweird.f32 %v789_v27 }
 0x285   : > { %2795 = vmatpush.xpose.msk.msra.mxu1 %vm485_vm0, %v2789_v49  ;;  %2847 = vmatpush.xpose.msk.msrb.mxu3 %vm485_vm0, %v2789_v49 }
 0x289   : > { %2796 = vmatpush.xpose.msk.msra.mxu1 %vm485_vm0, %v2788_v6  ;;  %2848 = vmatpush.xpose.msk.msrb.mxu3 %vm485_vm0, %v2788_v6 }
 0x28a   : > { %v2965_v2 = vpop.eup %2964 }
 0x28b   : > { %2887 = vset.pattern.permute.xlu2 %v4936_v25  ;;  %v905_v9 = vmul.f32 %v2965_v2, %v789_v27  ;;  %vm911_vm2 = vweird.f32 %v2965_v2  ;;  %v3729_v27 = vperm.slane %v2787_v48, 0 }
 0x28c   : > { %2894 = vset.pattern.permute.xlu0 %v4936_v25  ;;  %2889 = vset.pattern.permute.xlu1 %v4937_v17  ;;  %vm912_vm4 = vmor %vm910_vm3, %vm911_vm2 }
 0x28d   : > { %1098 = vperm.xlu2 %2887, %v272_v63   ;;  %1138 = vperm.xlu0 %2894, %v3595_v57   ;;  %v883_v57 = vsel %vm882_vm13, %v3650_v16, %v879_v55  ;;  %v4942_v63 = vmov 1   ;;  %v897_v16 = vmul.f32 0.5, %v896_v8  ;;  %v906_v14 = vmul.f32 %v2965_v2, %v905_v9 }
 0x28e   : > { %1007 = vperm.xlu1 %2889, %v961_v42   ;;  %v962_v35 = vmul.f32 %v883_v57, %v3691_v56 }
 0x28f   : > { %v898_v34 = vsub.f32 1.5, %v897_v16  ;;  %v907_v44 = vmul.f32 0.5, %v906_v14 }
 0x291   : > { %v899_v0 = vmul.f32 %v2963_v41, %v898_v34  ;;  %v908_v43 = vsub.f32 1.5, %v907_v44 }
 0x293   : > { %v903_v15 = vsel %vm902_vm1, %v2963_v41, %v899_v0  ;;  %v909_v22 = vmul.f32 %v2965_v2, %v908_v43  ;;  %v3727_v41 = vperm.slane %v2787_v48, 1  ;;  %v1183_v0 = vmul.f32 %v3729_v27, %v3160_v23 }
 0x294   : > { %v964_v4 = vmul.f32 %v903_v15, %v276_v11 }
 0x295   : > { %2891 = vset.pattern.permute.xlu2 %v4937_v17  ;;  %2901 = vset.pattern.permute.xlu0 %v4942_v63  ;;  %v1198_v55 = vmul.f32 %v3727_v41, %v3214_v45  ;;  %v1199_v9 = vmul.f32 %v3727_v41, %v3189_v33 }
 0x296   : > { %2890 = vset.pattern.permute.xlu1 %v4936_v25  ;;  %1012 = vperm.xlu2 %2891, %v962_v35  }
 0x297   : > { %1108 = vperm.xlu1 %2890, %v3691_v56  }
 0x29d   : > { %v978_v26 = vpop.permute.xlu2 %977 }
 0x29e   : > { %2892 = vset.pattern.permute.xlu2 %v4936_v25  ;;  %v1051_v8 = vmul.f32 %v978_v26, %v3396_v13  ;;  %v1200_v13 = vmul.f32 %v3727_v41, %v3231_v54 }
 0x29f   : > { %1133 = vperm.xlu1 %2890, %v3563_v40   ;;  %1113 = vperm.xlu2 %2892, %v3662_v20   ;;  %v277_v40 = vld [vmem:[%s3505_s14 + $0x58] sm:$0xff]  ;;  %v913_v20 = vsel %vm912_vm4, %v2965_v2, %v909_v22 }
 0x2a0   : > { %v965_v42 = vmul.f32 %v913_v20, %v277_v40 }
 0x2a6   : > { %v1074_v47 = vpop.permute.xlu2 %1073 }
 0x2a7   : > { %2895 = vset.pattern.permute.xlu1 %v4937_v17  ;;  %1118 = vperm.xlu2 %2892, %v276_v11   ;;  %v1147_v49 = vadd.f32 %v1074_v47, %v1051_v8 }
 0x2a8   : > { %1022 = vperm.xlu1 %2895, %v964_v4   ;;  %v1216_v4 = vadd.f32 %v1200_v13, %v1183_v0  ;;  %v1202_v13 = vmul.f32 %v3727_v41, %v3195_v36 }
 0x2a9   : > { %v1163_v6 = vmax.f32 %v1147_v49, 0.0 }
 0x2ad   : > { %v973_v30 = vpop.permute.xlu1 %972 }
 0x2ae   : > { %v1050_v7 = vmul.f32 %v973_v30, %v3389_v12  ;;  %v1182_v12 = vmul.f32 %v3729_v27, %v3178_v29 }
 0x2af   : > { %2897 = vset.pattern.permute.xlu2 %v4937_v17  ;;  %v1181_v17 = vmul.f32 %v3729_v27, %v3162_v24 }
 0x2b0   : > { %2896 = vset.pattern.permute.xlu1 %v4936_v25  ;;  %1027 = vperm.xlu2 %2897, %v965_v42   ;;  %v1215_v34 = vadd.f32 %v1199_v9, %v1182_v12 }
 0x2b1   : > { %1143 = vperm.xlu1 %2896, %v3632_v37   ;;  %v1079_v37 = vpop.permute.xlu0 %1078  ;;  %v1214_v35 = vadd.f32 %v1198_v55, %v1181_v17  ;;  %v1210_v55 = vmul.f32 %v3727_v41, %v3223_v50 }
 0x2b2   : > { %v1231_v44 = vmul.f32 %v1215_v34, %v1163_v6 }
 0x2b6   : > { %v1069_v58 = vpop.permute.xlu1 %1068 }
 0x2b7   : > { %v1146_v57 = vadd.f32 %v1069_v58, %v1050_v7  ;;  %v1193_v58 = vmul.f32 %v3729_v27, %v3199_v38  ;;  %v4159_v38 = vld [vmem:[%s3505_s14 + $0x70] sm:$0xff] }
 0x2b8   : > { %2898 = vset.pattern.permute.xlu2 %v4936_v25 }
 0x2b9   : > { %v1162_v2 = vmax.f32 %v1146_v57, 0.0  ;;  %1123 = vperm.xlu2 %2898, %v277_v40   ;;  %v1226_v57 = vadd.f32 %v1210_v55, %v1193_v58 }
 0x2bb   : > { %v1230_v16 = vmul.f32 %v1214_v35, %v1162_v2 }
 0x2bd   : > { %2797 = vmatmul.msk.f32.vlgmr.msra.gmra.mxu1 %vm485_vm0, %v1230_v16  ;;  %v1184_v16 = vmul.f32 %v3729_v27, %v3174_v28 }
 0x2c1   : > { %2899 = vset.pattern.permute.xlu2 %v4942_v63 }
 0x2c2   : > { %v983_v25 = vpop.permute.xlu0 %982 }
 0x2c3   : > { %v1052_v14 = vmul.f32 %v983_v25, %v3410_v61  ;;  %v3750_v11 = vpop.permute.xlu2 %1042 }
 0x2c5   : > { %v1148_v43 = vadd.f32 %v1079_v37, %v1052_v14  ;;  %2798 = vmatmul.msk.f32.gmra.mxu1 %vm485_vm0, %v1231_v44  ;;  %v1201_v37 = vmul.f32 %v3727_v41, %v3229_v53 }
 0x2c7   : > { %v1164_v15 = vmax.f32 %v1148_v43, 0.0  ;;  %v1217_v6 = vadd.f32 %v1201_v37, %v1184_v16  ;;  %v1205_v16 = vmul.f32 %v3727_v41, %v3241_v60 }
 0x2c9   : > { %v1232_v22 = vmul.f32 %v1216_v4, %v1164_v15 }
 0x2cb   : > { %v1104_v40 = vpop.permute.xlu0 %1103  ;;  %v993_v20 = vpop.permute.xlu2 %992 }
 0x2cd   : > { %2799 = vmatmul.msk.f32.gmra.mxu1 %vm485_vm0, %v1232_v22 }
 0x2d3   : > { %v3753_v30 = vpop.permute.xlu1 %1037  ;;  %v1129_v26 = vpop.permute.xlu0 %1128 }
 0x2d4   : > { %v1089_v61 = vpop.permute.xlu2 %1088 }
 0x2db   : > { %v988_v42 = vpop.permute.xlu1 %987 }
 0x2dc   : > { %v1053_v8 = vmul.f32 %v988_v42, %v3417_v21  ;;  %v1185_v21 = vmul.f32 %v3729_v27, %v3146_v18 }
 0x2dd   : > { %v1033_v48 = vpop.permute.xlu0 %1032  ;;  %v1003_v2 = vpop.permute.xlu2 %1002 }
 0x2de   : > { %v1062_v7 = vmul.f32 %v1033_v48, %v3403_v46  ;;  %v1054_v46 = vmul.f32 %v993_v20, %v3435_v10  ;;  %v1218_v43 = vadd.f32 %v1202_v13, %v1185_v21  ;;  %v1203_v10 = vmul.f32 %v3727_v41, %v3239_v59 }
 0x2df   : > { %v1186_v20 = vmul.f32 %v3729_v27, %v3149_v19  ;;  %v1056_v42 = vmul.f32 %v1003_v2, %v3466_v3 }
 0x2e0   : > { %v1158_v17 = vadd.f32 %v1129_v26, %v1062_v7  ;;  %v1150_v34 = vadd.f32 %v1089_v61, %v1054_v46 }
 0x2e1   : > { %v1219_v55 = vadd.f32 %v1203_v10, %v1186_v20  ;;  %v4945_v10 = vld [vmem:[#allocation16_spill] sm:$0xff] }
 0x2e2   : > { %v1174_v47 = vmax.f32 %v1158_v17, 0.0  ;;  %v1166_v14 = vmax.f32 %v1150_v34, 0.0  ;;  %v1204_v17 = vmul.f32 %v3727_v41, %v3201_v39 }
 0x2e4   : > { %v1242_v35 = vmul.f32 %v1226_v57, %v1174_v47  ;;  %v1084_v49 = vpop.permute.xlu1 %1083  ;;  %v1234_v15 = vmul.f32 %v1218_v43, %v1166_v14  ;;  %v4943_v14 = vld [vmem:[#allocation2_spill] sm:$0xff] }
 0x2e5   : > { %v1149_v9 = vadd.f32 %v1084_v49, %v1053_v8  ;;  %v1048_v37 = vpop.permute.xlu0 %1047 }
 0x2e6   : > { %2809 = vmatmul.msk.f32.vlgmr.msrb.gmra.mxu3 %vm485_vm0, %v1242_v35 }
 0x2e7   : > { %v1165_v12 = vmax.f32 %v1149_v9, 0.0  ;;  %v1099_v0 = vpop.permute.xlu2 %1098  ;;  %v1188_v9 = vmul.f32 %v3729_v27, %v3185_v31  ;;  %v4177_v31 = vld [vmem:[%s3505_s14 + $0x28] sm:$0xff] }
 0x2e8   : > { %v1152_v7 = vadd.f32 %v1099_v0, %v1056_v42  ;;  %v4944_v0 = vld [vmem:[#allocation22_spill] sm:$0xff] }
 0x2e9   : > { %v1233_v25 = vmul.f32 %v1217_v6, %v1165_v12 }
 0x2ea   : > { %v1168_v57 = vmax.f32 %v1152_v7, 0.0 }
 0x2eb   : > { %2800 = vmatmul.msk.f32.gmra.mxu1 %vm485_vm0, %v1233_v25  ;;  %v1221_v25 = vadd.f32 %v1205_v16, %v1188_v9  ;;  %v4950_v16 = vld [vmem:[#allocation7_spill] sm:$0xff] }
 0x2ec   : > { %v1190_v9 = vmul.f32 %v3729_v27, %v4950_v16 }
 0x2ed   : > { %v998_v44 = vpop.permute.xlu1 %997 }
 0x2ee   : > { %v1055_v4 = vmul.f32 %v998_v44, %v3449_v51  ;;  %v1187_v51 = vmul.f32 %v3729_v27, %v3187_v32  ;;  %v1189_v44 = vmul.f32 %v3729_v27, %v4943_v14 }
 0x2f0   : > { %v1013_v61 = vpop.permute.xlu2 %1012  ;;  %v1220_v35 = vadd.f32 %v1204_v17, %v1187_v51  ;;  %v4948_v17 = vld [vmem:[#allocation20_spill] sm:$0xff] }
 0x2f1   : > { %v1058_v12 = vmul.f32 %v1013_v61, %v3470_v62  ;;  %v1211_v62 = vmul.f32 %v3727_v41, %v4945_v10  ;;  %v4947_v61 = vld [vmem:[#allocation8_spill] sm:$0xff]  ;;  %v1064_v51 = vmul.f32 %v3750_v11, %v4948_v17  ;;  %v4107_v10 = vld [vmem:[%s3505_s14 + $0x68] sm:$0xff] }
 0x2f2   : > { %v1236_v2 = vmul.f32 %v1220_v35, %v1168_v57  ;;  %v1194_v42 = vmul.f32 %v3729_v27, %v4947_v61 }
 0x2f3   : > { %2801 = vmatmul.msk.f32.gmra.mxu1 %vm485_vm0, %v1234_v15 }
 0x2f4   : > { %v1227_v57 = vadd.f32 %v1211_v62, %v1194_v42 }
 0x2f6   : > { %v1094_v22 = vpop.permute.xlu1 %1093  ;;  %v1018_v6 = vpop.permute.xlu0 %1017 }
 0x2f7   : > { %v1151_v26 = vadd.f32 %v1094_v22, %v1055_v4  ;;  %v1059_v43 = vmul.f32 %v1018_v6, %v4944_v0  ;;  %v4946_v4 = vld [vmem:[#allocation19_spill] sm:$0xff]  ;;  %v4952_v6 = vld [vmem:[#allocation4_spill] sm:$0xff] }
 0x2f8   : > { %v1063_v22 = vmul.f32 %v3753_v30, %v4946_v4 }
 0x2f9   : > { %v1167_v48 = vmax.f32 %v1151_v26, 0.0  ;;  %v1114_v49 = vpop.permute.xlu2 %1113 }
 0x2fb   : > { %v1235_v58 = vmul.f32 %v1219_v55, %v1167_v48  ;;  %v1155_v55 = vadd.f32 %v1114_v49, %v1059_v43  ;;  %v4951_v49 = vld [vmem:[#allocation17_spill] sm:$0xff]  ;;  %v4954_v43 = vld [vmem:[#allocation14_spill] sm:$0xff] }
 0x2fd   : > { %2802 = vmatmul.msk.f32.gmra.mxu1 %vm485_vm0, %v1235_v58 }
 0x2ff   : > { %v1139_v7 = vpop.permute.xlu0 %1138 }
 0x300   : > { %v1008_v47 = vpop.permute.xlu1 %1007  ;;  %v1160_v30 = vadd.f32 %v1139_v7, %v1064_v51  ;;  %v4958_v51 = vld [vmem:[#allocation21_spill] sm:$0xff] }
 0x301   : > { %v1057_v8 = vmul.f32 %v1008_v47, %v3453_v5  ;;  %v1119_v21 = vpop.permute.xlu2 %1118 }
 0x303   : > { %v1153_v3 = vadd.f32 %v1104_v40, %v1057_v8  ;;  %v1206_v40 = vmul.f32 %v3727_v41, %v3248_v1  ;;  %v4949_v8 = vld [vmem:[#allocation11_spill] sm:$0xff] }
 0x304   : > { %v1207_v35 = vmul.f32 %v3727_v41, %v4949_v8 }
 0x305   : > { %2803 = vmatmul.msk.f32.gmra.mxu1 %vm485_vm0, %v1236_v2  ;;  %v1169_v46 = vmax.f32 %v1153_v3, 0.0  ;;  %v1222_v20 = vadd.f32 %v1206_v40, %v1189_v44  ;;  %v4953_v40 = vld [vmem:[#allocation23_spill] sm:$0xff] }
 0x306   : > { %v1223_v11 = vadd.f32 %v1207_v35, %v1190_v9 }
 0x307   : > { %v1237_v5 = vmul.f32 %v1221_v25, %v1169_v46  ;;  %v1171_v46 = vmax.f32 %v1155_v55, 0.0  ;;  %v1176_v25 = vmax.f32 %v1160_v30, 0.0  ;;  %v4959_v30 = vld [vmem:[#allocation10_spill] sm:$0xff] }
 0x309   : > { %v1109_v34 = vpop.permute.xlu1 %1108 }
 0x30a   : > { %v1154_v13 = vadd.f32 %v1109_v34, %v1058_v12  ;;  %v1028_v3 = vpop.permute.xlu2 %1027  ;;  %v1212_v12 = vmul.f32 %v3727_v41, %v4951_v49  ;;  %v1195_v34 = vmul.f32 %v3729_v27, %v4952_v6 }
 0x30c   : > { %v1170_v15 = vmax.f32 %v1154_v13, 0.0  ;;  %v1228_v0 = vadd.f32 %v1212_v12, %v1195_v34  ;;  %v4961_v34 = vld [vmem:[#allocation3_spill] sm:$0xff] }
 0x30d   : > { %2804 = vmatmul.msk.f32.gmra.mxu1 %vm485_vm0, %v1237_v5  ;;  %v1239_v5 = vmul.f32 %v1223_v11, %v1171_v46  ;;  %v4960_v46 = vld [vmem:[#allocation15_spill] sm:$0xff] }
 0x30e   : > { %v1238_v58 = vmul.f32 %v1222_v20, %v1170_v15  ;;  %v1208_v15 = vmul.f32 %v3727_v41, %v4954_v43  ;;  %v1244_v4 = vmul.f32 %v1228_v0, %v1176_v25  ;;  %v1209_v12 = vmul.f32 %v3727_v41, %v4960_v46 }
 0x30f   : > { %v1192_v25 = vmul.f32 %v3729_v27, %v4961_v34 }
 0x311   : > { %v1134_v26 = vpop.permute.xlu1 %1133 }
 0x312   : > { %v1159_v48 = vadd.f32 %v1134_v26, %v1063_v22  ;;  %v4955_v22 = vld [vmem:[#allocation6_spill] sm:$0xff] }
 0x313   : > { %v1191_v20 = vmul.f32 %v3729_v27, %v4955_v22  ;;  %v1124_v42 = vpop.permute.xlu2 %1123 }
 0x314   : > { %v1175_v47 = vmax.f32 %v1159_v48, 0.0  ;;  %v4956_v48 = vld [vmem:[#allocation24_spill] sm:$0xff] }
 0x315   : > { %2805 = vmatmul.msk.f32.gmra.mxu1 %vm485_vm0, %v1238_v58  ;;  %v1061_v55 = vmul.f32 %v1028_v3, %v4956_v48  ;;  %v1224_v7 = vadd.f32 %v1208_v15, %v1191_v20  ;;  %v4957_v58 = vld [vmem:[#allocation18_spill] sm:$0xff] }
 0x316   : > { %v1243_v2 = vmul.f32 %v1227_v57, %v1175_v47  ;;  %v1213_v17 = vmul.f32 %v3727_v41, %v4957_v58  ;;  %v1065_v57 = vmul.f32 %v1048_v37, %v4958_v51  ;;  %v1225_v37 = vadd.f32 %v1209_v12, %v1192_v25 }
 0x317   : > { %v1157_v47 = vadd.f32 %v1124_v42, %v1061_v55 }
 0x318   : > { %2810 = vmatmul.msk.f32.gmra.mxu3 %vm485_vm0, %v1243_v2  ;;  %v1196_v2 = vmul.f32 %v3729_v27, %v4959_v30 }
 0x31a   : > { %v1023_v13 = vpop.permute.xlu1 %1022  ;;  %v1229_v11 = vadd.f32 %v1213_v17, %v1196_v2 }
 0x31b   : > { %v1060_v44 = vmul.f32 %v1023_v13, %v4953_v40  ;;  %v1173_v13 = vmax.f32 %v1157_v47, 0.0 }
 0x31d   : > { %v1156_v62 = vadd.f32 %v1119_v21, %v1060_v44  ;;  %2806 = vmatmul.msk.f32.gmra.mxu1 %vm485_vm0, %v1239_v5  ;;  %v1241_v40 = vmul.f32 %v1225_v37, %v1173_v13  ;;  %v3838_v44 = vld [vmem:[%s4857_s2 + $0x1] ss:$0 sm:$0xff] }
 0x31f   : > { %v1172_v26 = vmax.f32 %v1156_v62, 0.0 }
 0x320   : > { %2811 = vmatmul.msk.f32.gmra.mxu3 %vm485_vm0, %v1244_v4 }
 0x321   : > { %v1240_v35 = vmul.f32 %v1224_v7, %v1172_v26 }
 0x323   : > { %v1144_v21 = vpop.permute.xlu1 %1143 }
 0x324   : > { %v1161_v9 = vadd.f32 %v1144_v21, %v1065_v57 }
 0x325   : > { %2807 = vmatmul.msk.f32.gmra.mxu1 %vm485_vm0, %v1240_v35 }
 0x326   : > { %v1177_v3 = vmax.f32 %v1161_v9, 0.0 }
 0x328   : > { %v1245_v5 = vmul.f32 %v1229_v11, %v1177_v3 }
 0x32a   : > { %2812 = vmatmul.msk.f32.gmra.mxu3 %vm485_vm0, %v1245_v5 }
 0x32d   : > { %2808 = vmatmul.msk.f32.gmra.mxu1 %vm485_vm0, %v1241_v40 }
 0x33a   : > { %v1333_v41 = vpop.f32.mrf.mxu1 }
 0x33b   : > { %v1334_v0 = vadd.f32 %v3838_v44, %v1333_v41 }
 0x33d   : > { %v1381_v15 = vsel %vm485_vm0, %v1334_v0, 0.0 }
 0x33e   : > { %1382 = vadd.xlane.f32.xlu0 %v1381_v15 }
 0x342   : > { %v1336_v27 = vpop.f32.mrf.mxu1 }
 0x343   : > { %v1337_v62 = vadd.f32 %v3838_v44, %v1336_v27 }
 0x345   : > { %v1384_v4 = vsel %vm485_vm0, %v1337_v62, 0.0 }
 0x346   : > { %1385 = vadd.xlane.f32.xlu1 %v1384_v4 }
 0x34a   : > { %v1339_v20 = vpop.f32.mrf.mxu1 }
 0x34b   : > { %v3845_v26 = vadd.f32 %v3838_v44, %v1339_v20 }
 0x34d   : > { %v1387_v42 = vsel %vm485_vm0, %v3845_v26, 0.0 }
 0x34e   : > { %1388 = vadd.xlane.f32.xlu2 %v1387_v42 }
 0x368   : > { %v1342_v48 = vpop.f32.mrf.mxu1 }
 0x369   : > { %v1369_v55 = vpop.f32.mrf.mxu3  ;;  %v3855_v51 = vadd.f32 %v3838_v44, %v1342_v48 }
 0x36a   : > { %v3850_v7 = vadd.f32 %v3838_v44, %v1369_v55 }
 0x36b   : > { %v1390_v47 = vsel %vm485_vm0, %v3855_v51, 0.0 }
 0x36c   : > { %v1417_v17 = vsel %vm485_vm0, %v3850_v7, 0.0 }
 0x36d   : > { %1418 = vadd.xlane.f32.xlu0 %v1417_v17 }
 0x370   : > { %v1345_v57 = vpop.f32.mrf.mxu1 }
 0x371   : > { %v3865_v25 = vadd.f32 %v3838_v44, %v1345_v57 }
 0x373   : > { %v1393_v40 = vsel %vm485_vm0, %v3865_v25, 0.0 }
 0x375   : > { %1391 = vadd.xlane.f32.xlu0 %v1390_v47 }
 0x37a   : > { %v1348_v21 = vpop.f32.mrf.mxu1 }
 0x37b   : > { %v3875_v15 = vadd.f32 %v3838_v44, %v1348_v21 }
 0x37d   : > { %v1396_v55 = vsel %vm485_vm0, %v3875_v15, 0.0 }
 0x382   : > { %v1351_v35 = vpop.f32.mrf.mxu1 }
 0x38a   : > { %v1354_v2 = vpop.f32.mrf.mxu1 }
 0x38b   : > { %v3878_v27 = vadd.f32 %v3838_v44, %v1354_v2 }
 0x38d   : > { %v1402_v48 = vsel %vm485_vm0, %v3878_v27, 0.0 }
 0x392   : > { %v1357_v9 = vpop.f32.mrf.mxu1 }
 0x393   : > { %v3890_v47 = vadd.f32 %v3838_v44, %v1357_v9 }
 0x39a   : > { %v1360_v13 = vpop.f32.mrf.mxu1 }
 0x39b   : > { %v1372_v12 = vpop.f32.mrf.mxu3 }
 0x39c   : > { %v3860_v11 = vadd.f32 %v3838_v44, %v1372_v12  ;;  %v3897_v12 = vadd.f32 %v3838_v44, %v1351_v35 }
 0x39e   : > { %v1420_v3 = vsel %vm485_vm0, %v3860_v11, 0.0  ;;  %v1399_v9 = vsel %vm485_vm0, %v3897_v12, 0.0 }
 0x39f   : > { %1421 = vadd.xlane.f32.xlu1 %v1420_v3 }
 0x3a2   : > { %v1363_v4 = vpop.f32.mrf.mxu1 }
 0x3a3   : > { %v1375_v5 = vpop.f32.mrf.mxu3  ;;  %v3893_v21 = vadd.f32 %v3838_v44, %v1363_v4 }
 0x3a4   : > { %v3868_v37 = vadd.f32 %v3838_v44, %v1375_v5 }
 0x3a5   : > { %v1411_v5 = vsel %vm485_vm0, %v3893_v21, 0.0 }
 0x3a6   : > { %v1423_v41 = vsel %vm485_vm0, %v3868_v37, 0.0 }
 0x3a7   : > { %1394 = vadd.xlane.f32.xlu1 %v1393_v40  ;;  %1424 = vadd.xlane.f32.xlu2 %v1423_v41  ;;  %v1405_v40 = vsel %vm485_vm0, %v3890_v47, 0.0 }
 0x3aa   : > { %v1366_v41 = vpop.f32.mrf.mxu1 }
 0x3ad   : > { %v1378_v20 = vpop.f32.mrf.mxu3 }
 0x3ae   : > { %v3881_v42 = vadd.f32 %v3838_v44, %v1378_v20  ;;  %v3908_v20 = vadd.f32 %v3838_v44, %v1366_v41 }
 0x3af   : > { %1403 = vadd.xlane.f32.xlu1 %v1402_v48  ;;  %1397 = vadd.xlane.f32.xlu2 %v1396_v55  ;;  %v3914_v48 = vadd.f32 %v3838_v44, %v1360_v13 }
 0x3b0   : > { %v1426_v17 = vsel %vm485_vm0, %v3881_v42, 0.0 }
 0x3b1   : > { %1427 = vadd.xlane.f32.xlu0 %v1426_v17  ;;  %v1383_v57 = vpop.xlane.xlu0 %1382  ;;  %v1414_v17 = vsel %vm485_vm0, %v3908_v20, 0.0 }
 0x3b2   : > { %v1429_v2 = vmul.f32 %v1383_v57, %v3385_v52 }
 0x3b4   : > { %v3899_v3 = vsub.f32 %v1334_v0, %v1429_v2  ;;  %v1408_v2 = vsel %vm485_vm0, %v3914_v48, 0.0 }
 0x3b6   : > { %v1461_v35 = vmul.f32 %v3899_v3, %v3899_v3 }
 0x3b7   : > { %1412 = vadd.xlane.f32.xlu1 %v1411_v5  ;;  %1406 = vadd.xlane.f32.xlu2 %v1405_v40 }
 0x3b8   : > { %v1477_v57 = vsel %vm485_vm0, %v1461_v35, 0.0 }
 0x3b9   : > { %1400 = vadd.xlane.f32.xlu0 %v1399_v9  ;;  %v1386_v4 = vpop.xlane.xlu1 %1385 }
 0x3ba   : > { %v1430_v0 = vmul.f32 %v1386_v4, %v3385_v52 }
 0x3bc   : > { %v3916_v55 = vsub.f32 %v1337_v62, %v1430_v0 }
 0x3be   : > { %v1462_v44 = vmul.f32 %v3916_v55, %v3916_v55 }
 0x3bf   : > { %1415 = vadd.xlane.f32.xlu2 %v1414_v17  ;;  %1478 = vadd.xlane.f32.xlu1 %v1477_v57 }
 0x3c0   : > { %v1480_v13 = vsel %vm485_vm0, %v1462_v44, 0.0 }
 0x3c1   : > { %1409 = vadd.xlane.f32.xlu0 %v1408_v2  ;;  %v1389_v5 = vpop.xlane.xlu2 %1388 }
 0x3c2   : > { %v1431_v40 = vmul.f32 %v1389_v5, %v3385_v52 }
 0x3c4   : > { %v3927_v62 = vsub.f32 %v3845_v26, %v1431_v40 }
 0x3c6   : > { %v1463_v41 = vmul.f32 %v3927_v62, %v3927_v62 }
 0x3c7   : > { %1481 = vadd.xlane.f32.xlu2 %v1480_v13 }
 0x3c8   : > { %v1483_v9 = vsel %vm485_vm0, %v1463_v41, 0.0 }
 0x3c9   : > { %1484 = vadd.xlane.f32.xlu0 %v1483_v9 }
 0x3e0   : > { %v1419_v4 = vpop.xlane.xlu0 %1418 }
 0x3e1   : > { %v1441_v0 = vmul.f32 %v1419_v4, %v3385_v52 }
 0x3e3   : > { %v3935_v35 = vsub.f32 %v3850_v7, %v1441_v0 }
 0x3e5   : > { %4962 = vst [vmem:[#allocation22_spill] sm:$0xff] %v3935_v35  ;;  %v1473_v17 = vmul.f32 %v3935_v35, %v3935_v35 }
 0x3e7   : > { %v1513_v26 = vsel %vm485_vm0, %v1473_v17, 0.0 }
 0x3e8   : > { %1514 = vadd.xlane.f32.xlu1 %v1513_v26  ;;  %v1392_v57 = vpop.xlane.xlu0 %1391 }
 0x3e9   : > { %v1432_v2 = vmul.f32 %v1392_v57, %v3385_v52 }
 0x3eb   : > { %v3942_v5 = vsub.f32 %v3855_v51, %v1432_v2 }
 0x3ed   : > { %v1464_v40 = vmul.f32 %v3942_v5, %v3942_v5 }
 0x3ef   : > { %v1486_v44 = vsel %vm485_vm0, %v1464_v40, 0.0 }
 0x3f0   : > { %1487 = vadd.xlane.f32.xlu1 %v1486_v44 }
 0x412   : > { %v1422_v7 = vpop.xlane.xlu1 %1421 }
 0x413   : > { %v1442_v13 = vmul.f32 %v1422_v7, %v3385_v52 }
 0x415   : > { %v3949_v41 = vsub.f32 %v3860_v11, %v1442_v13 }
 0x417   : > { %4963 = vst [vmem:[#allocation19_spill] sm:$0xff] %v3949_v41  ;;  %v1474_v9 = vmul.f32 %v3949_v41, %v3949_v41 }
 0x419   : > { %v1516_v4 = vsel %vm485_vm0, %v1474_v9, 0.0 }
 0x41a   : > { %v1395_v0 = vpop.xlane.xlu1 %1394  ;;  %1517 = vadd.xlane.f32.xlu2 %v1516_v4  ;;  %v1425_v51 = vpop.xlane.xlu2 %1424 }
 0x41b   : > { %v1433_v17 = vmul.f32 %v1395_v0, %v3385_v52  ;;  %v1443_v26 = vmul.f32 %v1425_v51, %v3385_v52 }
 0x41d   : > { %v3957_v57 = vsub.f32 %v3865_v25, %v1433_v17  ;;  %v3960_v2 = vsub.f32 %v3868_v37, %v1443_v26 }
 0x41f   : > { %4964 = vst [vmem:[#allocation20_spill] sm:$0xff] %v3960_v2  ;;  %v1465_v11 = vmul.f32 %v3957_v57, %v3957_v57  ;;  %v1475_v40 = vmul.f32 %v3960_v2, %v3960_v2 }
 0x421   : > { %v1489_v44 = vsel %vm485_vm0, %v1465_v11, 0.0  ;;  %v1519_v7 = vsel %vm485_vm0, %v1475_v40, 0.0 }
 0x422   : > { %v1404_v13 = vpop.xlane.xlu1 %1403  ;;  %1490 = vadd.xlane.f32.xlu2 %v1489_v44  ;;  %1520 = vadd.xlane.f32.xlu0 %v1519_v7  ;;  %v1398_v9 = vpop.xlane.xlu2 %1397 }
 0x423   : > { %v1436_v25 = vmul.f32 %v1404_v13, %v3385_v52  ;;  %v1434_v4 = vmul.f32 %v1398_v9, %v3385_v52 }
 0x424   : > { %v1428_v37 = vpop.xlane.xlu0 %1427 }
 0x425   : > { %v3971_v0 = vsub.f32 %v3878_v27, %v1436_v25  ;;  %v3974_v51 = vsub.f32 %v3875_v15, %v1434_v4  ;;  %v1444_v17 = vmul.f32 %v1428_v37, %v3385_v52 }
 0x427   : > { %v3978_v26 = vsub.f32 %v3881_v42, %v1444_v17  ;;  %v1468_v11 = vmul.f32 %v3971_v0, %v3971_v0  ;;  %v1466_v40 = vmul.f32 %v3974_v51, %v3974_v51 }
 0x429   : > { %4965 = vst [vmem:[#allocation23_spill] sm:$0xff] %v3978_v26  ;;  %v1498_v44 = vsel %vm485_vm0, %v1468_v11, 0.0  ;;  %v1492_v7 = vsel %vm485_vm0, %v1466_v40, 0.0  ;;  %v1476_v27 = vmul.f32 %v3978_v26, %v3978_v26  ;;  %v4028_v26 = vld [vmem:[%s3505_s14] sm:$0xff] }
 0x42a   : > { %v1413_v15 = vpop.xlane.xlu1 %1412  ;;  %1499 = vadd.xlane.f32.xlu2 %v1498_v44  ;;  %1493 = vadd.xlane.f32.xlu0 %v1492_v7  ;;  %v1407_v13 = vpop.xlane.xlu2 %1406 }
 0x42b   : > { %v1439_v42 = vmul.f32 %v1413_v15, %v3385_v52  ;;  %v1437_v9 = vmul.f32 %v1407_v13, %v3385_v52  ;;  %v1522_v25 = vsel %vm485_vm0, %v1476_v27, 0.0 }
 0x42c   : > { %1523 = vadd.xlane.f32.xlu1 %v1522_v25  ;;  %v1401_v4 = vpop.xlane.xlu0 %1400 }
 0x42d   : > { %v3992_v37 = vsub.f32 %v3893_v21, %v1439_v42  ;;  %v3995_v17 = vsub.f32 %v3890_v47, %v1437_v9  ;;  %v1435_v11 = vmul.f32 %v1401_v4, %v3385_v52 }
 0x42f   : > { %4966 = vst [vmem:[#allocation24_spill] sm:$0xff] %v3992_v37  ;;  %v3999_v40 = vsub.f32 %v3897_v12, %v1435_v11  ;;  %v1471_v44 = vmul.f32 %v3992_v37, %v3992_v37  ;;  %v1469_v7 = vmul.f32 %v3995_v17, %v3995_v17 }
 0x430   : > { %4967 = vst [vmem:[#allocation21_spill] sm:$0xff] %v3995_v17 }
 0x431   : > { %v1507_v27 = vsel %vm485_vm0, %v1471_v44, 0.0  ;;  %v1501_v15 = vsel %vm485_vm0, %v1469_v7, 0.0  ;;  %v1467_v21 = vmul.f32 %v3999_v40, %v3999_v40  ;;  %v4899_v7 = vmov 4  }
 0x432   : > { %1508 = vadd.xlane.f32.xlu2 %v1507_v27  ;;  %1502 = vadd.xlane.f32.xlu0 %v1501_v15  ;;  %v1416_v47 = vpop.xlane.xlu2 %1415  ;;  %v1479_v13 = vpop.xlane.xlu1 %1478 }
 0x433   : > { %v1440_v12 = vmul.f32 %v1416_v47, %v3385_v52  ;;  %v1525_v42 = vmul.f32 %v1479_v13, %v3385_v52  ;;  %v1495_v9 = vsel %vm485_vm0, %v1467_v21, 0.0  ;;  %2903 = vset.pattern.permute.xlu1 %v4899_v7 }
 0x434   : > { %1496 = vadd.xlane.f32.xlu1 %v1495_v9  ;;  %v1410_v25 = vpop.xlane.xlu0 %1409 }
 0x435   : > { %v4013_v4 = vsub.f32 %v3908_v20, %v1440_v12  ;;  %v1541_v11 = vadd.f32 1e-05, %v1525_v42  ;;  %v1438_v44 = vmul.f32 %v1410_v25, %v3385_v52 }
 0x437   : > { %4968 = vst [vmem:[#allocation25_spill] sm:$0xff] %v4013_v4  ;;  %2966 = vrsqrt.f32 %v1541_v11  ;;  %v4018_v27 = vsub.f32 %v3914_v48, %v1438_v44  ;;  %v1472_v15 = vmul.f32 %v4013_v4, %v4013_v4  ;;  %vm1563_vm6 = vweird.f32 %v1541_v11 }
 0x439   : > { %4969 = vst [vmem:[#allocation26_spill] sm:$0xff] %v4018_v27  ;;  %v1510_v21 = vsel %vm485_vm0, %v1472_v15, 0.0  ;;  %v1470_v47 = vmul.f32 %v4018_v27, %v4018_v27 }
 0x43a   : > { %1511 = vadd.xlane.f32.xlu0 %v1510_v21  ;;  %v1482_v20 = vpop.xlane.xlu2 %1481 }
 0x43b   : > { %v1526_v13 = vmul.f32 %v1482_v20, %v3385_v52  ;;  %v1504_v12 = vsel %vm485_vm0, %v1470_v47, 0.0 }
 0x43c   : > { %1505 = vadd.xlane.f32.xlu1 %v1504_v12 }
 0x43d   : > { %v2967_v42 = vpop.eup %2966  ;;  %v1542_v9 = vadd.f32 1e-05, %v1526_v13 }
 0x43e   : > { %v1558_v48 = vmul.f32 %v2967_v42, %v1541_v11  ;;  %vm1564_vm5 = vweird.f32 %v2967_v42 }
 0x43f   : > { %2968 = vrsqrt.f32 %v1542_v9  ;;  %vm1565_vm7 = vmor %vm1563_vm6, %vm1564_vm5  ;;  %vm1573_vm9 = vweird.f32 %v1542_v9 }
 0x440   : > { %v1559_v25 = vmul.f32 %v2967_v42, %v1558_v48 }
 0x442   : > { %v1560_v44 = vmul.f32 0.5, %v1559_v25  ;;  %v1485_v25 = vpop.xlane.xlu0 %1484 }
 0x444   : > { %v1561_v7 = vsub.f32 1.5, %v1560_v44  ;;  %v4032_v44 = vld [vmem:[%s3505_s14 + $0x8] sm:$0xff] }
 0x445   : > { %v2969_v15 = vpop.eup %2968 }
 0x446   : > { %v1568_v30 = vmul.f32 %v2969_v15, %v1542_v9  ;;  %v1562_v21 = vmul.f32 %v2967_v42, %v1561_v7  ;;  %vm1574_vm8 = vweird.f32 %v2969_v15  ;;  %v1527_v7 = vmul.f32 %v1485_v25, %v3385_v52 }
 0x447   : > { %vm1575_vm10 = vmor %vm1573_vm9, %vm1574_vm8 }
 0x448   : > { %v1569_v58 = vmul.f32 %v2969_v15, %v1568_v30  ;;  %v1566_v20 = vsel %vm1565_vm7, %v2967_v42, %v1562_v21  ;;  %v4970_v42 = vmov 4   ;;  %v1543_v9 = vadd.f32 1e-05, %v1527_v7 }
 0x449   : > { %v1717_v47 = vmul.f32 %v4028_v26, %v1566_v20  ;;  %v4046_v20 = vld [vmem:[%s3505_s14 + $0x10] sm:$0xff] }
 0x44a   : > { %v1570_v13 = vmul.f32 0.5, %v1569_v58  ;;  %v4039_v58 = vld [vmem:[%s3505_s14 + $0x18] sm:$0xff]  ;;  %2970 = vrsqrt.f32 %v1543_v9  ;;  %vm1583_vm15 = vweird.f32 %v1543_v9 }
 0x44b   : > { %1735 = vperm.xlu2 %2899, %v1717_v47  }
 0x44c   : > { %v1571_v12 = vsub.f32 1.5, %v1570_v13 }
 0x44e   : > { %v1572_v48 = vmul.f32 %v2969_v15, %v1571_v12 }
 0x450   : > { %v1576_v11 = vsel %vm1575_vm10, %v2969_v15, %v1572_v48  ;;  %v2971_v13 = vpop.eup %2970 }
 0x451   : > { %v1718_v30 = vmul.f32 %v4032_v44, %v1576_v11  ;;  %v1578_v12 = vmul.f32 %v2971_v13, %v1543_v9  ;;  %vm1584_vm14 = vweird.f32 %v2971_v13 }
 0x452   : > { %vm1585_vm2 = vmor %vm1583_vm15, %vm1584_vm14 }
 0x453   : > { %1740 = vperm.xlu0 %2901, %v1718_v30   ;;  %2900 = vset.pattern.permute.xlu2 %v4970_v42  ;;  %v1579_v7 = vmul.f32 %v2971_v13, %v1578_v12 }
 0x454   : > { %1830 = vperm.xlu2 %2900, %v4028_v26  }
 0x455   : > { %1842 = vperm.xlu1 %2903, %v4039_v58   ;;  %v1580_v34 = vmul.f32 0.5, %v1579_v7 }
 0x457   : > { %v1581_v46 = vsub.f32 1.5, %v1580_v34 }
 0x459   : > { %v1582_v7 = vmul.f32 %v2971_v13, %v1581_v46 }
 0x45b   : > { %2902 = vset.pattern.permute.xlu0 %v4970_v42  ;;  %v1515_v15 = vpop.xlane.xlu1 %1514 }
 0x45c   : > { %1834 = vperm.xlu0 %2902, %v4032_v44   ;;  %v1537_v21 = vmul.f32 %v1515_v15, %v3385_v52  ;;  %1838 = vperm.xlu2 %2900, %v4046_v20  }
 0x45d   : > { %2904 = vset.pattern.permute.xlu1 %v4942_v63 }
 0x45e   : > { %v1553_v47 = vadd.f32 1e-05, %v1537_v21 }
 0x460   : > { %2972 = vrsqrt.f32 %v1553_v47  ;;  %vm1683_vm12 = vweird.f32 %v1553_v47 }
 0x463   : > { %v1488_v48 = vpop.xlane.xlu1 %1487 }
 0x464   : > { %v1528_v25 = vmul.f32 %v1488_v48, %v3385_v52  ;;  %2905 = vset.pattern.permute.xlu2 %v4942_v63  ;;  %1862 = vperm.xlu0 %2902, %v3691_v56  }
 0x466   : > { %v2973_v11 = vpop.eup %2972  ;;  %v1544_v30 = vadd.f32 1e-05, %v1528_v25  ;;  %v4055_v25 = vld [vmem:[%s3505_s14 + $0x60] sm:$0xff] }
 0x467   : > { %v1678_v15 = vmul.f32 %v2973_v11, %v1553_v47  ;;  %vm1684_vm11 = vweird.f32 %v2973_v11 }
 0x468   : > { %2974 = vrsqrt.f32 %v1544_v30  ;;  %vm1685_vm13 = vmor %vm1683_vm12, %vm1684_vm11  ;;  %vm1593_vm3 = vweird.f32 %v1544_v30 }
 0x469   : > { %v1679_v6 = vmul.f32 %v2973_v11, %v1678_v15 }
 0x46b   : > { %v1680_v4 = vmul.f32 0.5, %v1679_v6 }
 0x46c   : > { %2913 = vset.pattern.permute.xlu0 %v4942_v63 }
 0x46d   : > { %v1681_v21 = vsub.f32 1.5, %v1680_v4  ;;  %v1586_v4 = vsel %vm1585_vm2, %v2971_v13, %v1582_v7 }
 0x46e   : > { %v2975_v49 = vpop.eup %2974 }
 0x46f   : > { %v1588_v48 = vmul.f32 %v2975_v49, %v1544_v30  ;;  %v1682_v2 = vmul.f32 %v2973_v11, %v1681_v21  ;;  %vm1594_vm1 = vweird.f32 %v2975_v49 }
 0x470   : > { %vm1595_vm4 = vmor %vm1593_vm3, %vm1594_vm1 }
 0x471   : > { %v1589_v56 = vmul.f32 %v2975_v49, %v1588_v48  ;;  %v1686_v22 = vsel %vm1685_vm13, %v2973_v11, %v1682_v2  ;;  %v1719_v11 = vmul.f32 %v4046_v20, %v1586_v4 }
 0x472   : > { %v1729_v12 = vmul.f32 %v4055_v25, %v1686_v22  ;;  %v4062_v22 = vld [vmem:[%s3505_s14 + $0x20] sm:$0xff] }
 0x473   : > { %v1590_v15 = vmul.f32 0.5, %v1589_v56 }
 0x474   : > { %1795 = vperm.xlu1 %2904, %v1729_v12   ;;  %v2816_v12 = vld [vmem:[%s4856_s1 + $0x50] sm:$0xff] }
 0x475   : > { %v1591_v6 = vsub.f32 1.5, %v1590_v15 }
 0x477   : > { %v1592_v34 = vmul.f32 %v2975_v49, %v1591_v6 }
 0x479   : > { %v1596_v47 = vsel %vm1595_vm4, %v2975_v49, %v1592_v34  ;;  %v2817_v49 = vld [vmem:[%s4856_s1 + $0x58] sm:$0xff] }
 0x47a   : > { %v1720_v2 = vmul.f32 %v4039_v58, %v1596_v47  ;;  %2819 = vmatpush.xpose.msk.msra.mxu2 %vm485_vm0, %v2817_v49  ;;  %2849 = vmatpush.xpose.msk.msra.mxu3 %vm485_vm0, %v2817_v49  ;;  %v2815_v47 = vld [vmem:[%s4856_s1 + $0x48] sm:$0xff] }
 0x47c   : > { %1750 = vperm.xlu2 %2905, %v1720_v2   ;;  %1745 = vperm.xlu1 %2904, %v1719_v11  }
 0x47e   : > { %2820 = vmatpush.xpose.msk.msra.mxu2 %vm485_vm0, %v2816_v12  ;;  %2850 = vmatpush.xpose.msk.msra.mxu3 %vm485_vm0, %v2816_v12 }
 0x482   : > { %2821 = vmatpush.xpose.msk.msra.mxu2 %vm485_vm0, %v2815_v47  ;;  %2851 = vmatpush.xpose.msk.msra.mxu3 %vm485_vm0, %v2815_v47 }
 0x484   : > { %2906 = vset.pattern.permute.xlu2 %v4970_v42 }
 0x485   : > { %1846 = vperm.xlu2 %2906, %v4062_v22  }
 0x48d   : > { %v1518_v46 = vpop.xlane.xlu2 %1517  ;;  %2908 = vset.pattern.permute.xlu2 %v4942_v63 }
 0x48e   : > { %v1538_v9 = vmul.f32 %v1518_v46, %v3385_v52 }
 0x490   : > { %v1554_v13 = vadd.f32 1e-05, %v1538_v9 }
 0x492   : > { %2976 = vrsqrt.f32 %v1554_v13  ;;  %vm1693_vm6 = vweird.f32 %v1554_v13 }
 0x495   : > { %v1491_v30 = vpop.xlane.xlu2 %1490  ;;  %v1521_v21 = vpop.xlane.xlu0 %1520 }
 0x496   : > { %v1529_v48 = vmul.f32 %v1491_v30, %v3385_v52  ;;  %v1539_v56 = vmul.f32 %v1521_v21, %v3385_v52  ;;  %v2814_v21 = vld [vmem:[%s4856_s1 + $0x40] sm:$0xff] }
 0x497   : > { %2822 = vmatpush.xpose.msk.msra.mxu2 %vm485_vm0, %v2814_v21  ;;  %2852 = vmatpush.xpose.msk.msra.mxu3 %vm485_vm0, %v2814_v21 }
 0x498   : > { %v2977_v15 = vpop.eup %2976  ;;  %v1545_v7 = vadd.f32 1e-05, %v1529_v48  ;;  %v4077_v6 = vadd.f32 1e-05, %v1539_v56 }
 0x499   : > { %v1688_v34 = vmul.f32 %v2977_v15, %v1554_v13  ;;  %vm1694_vm5 = vweird.f32 %v2977_v15 }
 0x49a   : > { %2978 = vrsqrt.f32 %v1545_v7  ;;  %vm1695_vm7 = vmor %vm1693_vm6, %vm1694_vm5  ;;  %vm1603_vm9 = vweird.f32 %v1545_v7  ;;  %vm1703_vm12 = vweird.f32 %v4077_v6 }
 0x49b   : > { %v1689_v4 = vmul.f32 %v2977_v15, %v1688_v34  ;;  %2980 = vrsqrt.f32 %v4077_v6 }
 0x49d   : > { %v1690_v2 = vmul.f32 0.5, %v1689_v4  ;;  %v1500_v11 = vpop.xlane.xlu2 %1499  ;;  %v1494_v46 = vpop.xlane.xlu0 %1493 }
 0x49e   : > { %v1530_v9 = vmul.f32 %v1494_v46, %v3385_v52  ;;  %v1532_v56 = vmul.f32 %v1500_v11, %v3385_v52 }
 0x49f   : > { %v1691_v49 = vsub.f32 1.5, %v1690_v2  ;;  %v1524_v30 = vpop.xlane.xlu1 %1523 }
 0x4a0   : > { %v2979_v48 = vpop.eup %2978  ;;  %v4092_v12 = vadd.f32 1e-05, %v1530_v9  ;;  %v4102_v9 = vadd.f32 1e-05, %v1532_v56 }
 0x4a1   : > { %v4096_v34 = vpop.eup %2980  ;;  %v1598_v4 = vmul.f32 %v2979_v48, %v1545_v7  ;;  %v1692_v47 = vmul.f32 %v2977_v15, %v1691_v49  ;;  %vm1604_vm8 = vweird.f32 %v2979_v48 }
 0x4a2   : > { %v1698_v2 = vmul.f32 %v4096_v34, %v4077_v6  ;;  %2982 = vrsqrt.f32 %v4092_v12  ;;  %vm1605_vm10 = vmor %vm1603_vm9, %vm1604_vm8  ;;  %vm1704_vm11 = vweird.f32 %v4096_v34  ;;  %vm1613_vm15 = vweird.f32 %v4092_v12 }
 0x4a3   : > { %v1599_v46 = vmul.f32 %v2979_v48, %v1598_v4  ;;  %v1696_v61 = vsel %vm1695_vm7, %v2977_v15, %v1692_v47  ;;  %v1540_v4 = vmul.f32 %v1524_v30, %v3385_v52  ;;  %2984 = vrsqrt.f32 %v4102_v9  ;;  %vm4133_vm13 = vmor %vm1703_vm12, %vm1704_vm11 }
 0x4a4   : > { %v1699_v11 = vmul.f32 %v4096_v34, %v1698_v2  ;;  %v1730_v13 = vmul.f32 %v4107_v10, %v1696_v61  ;;  %vm1633_vm11 = vweird.f32 %v4102_v9 }
 0x4a5   : > { %v1600_v43 = vmul.f32 0.5, %v1599_v46  ;;  %v4104_v41 = vpop.xlane.xlu2 %1508  ;;  %v1503_v21 = vpop.xlane.xlu0 %1502 }
 0x4a6   : > { %v1533_v49 = vmul.f32 %v1503_v21, %v3385_v52  ;;  %v1700_v16 = vmul.f32 0.5, %v1699_v11  ;;  %1800 = vperm.xlu1 %2904, %v1730_v13   ;;  %v4120_v11 = vadd.f32 1e-05, %v1540_v4 }
 0x4a7   : > { %v1601_v37 = vsub.f32 1.5, %v1600_v43  ;;  %v1497_v27 = vpop.xlane.xlu1 %1496 }
 0x4a8   : > { %v4113_v15 = vadd.f32 1e-05, %v1533_v49  ;;  %v1531_v56 = vmul.f32 %v1497_v27, %v3385_v52  ;;  %v2983_v47 = vpop.eup %2982  ;;  %v1701_v46 = vsub.f32 1.5, %v1700_v16 }
 0x4a9   : > { %v1602_v2 = vmul.f32 %v2979_v48, %v1601_v37  ;;  %v1608_v61 = vmul.f32 %v2983_v47, %v4092_v12  ;;  %v4125_v7 = vpop.eup %2984  ;;  %vm1614_vm14 = vweird.f32 %v2983_v47 }
 0x4aa   : > { %2986 = vrsqrt.f32 %v4113_v15  ;;  %v4118_v43 = vadd.f32 1e-05, %v1531_v56  ;;  %v1702_v4 = vmul.f32 %v4096_v34, %v1701_v46  ;;  %v1628_v6 = vmul.f32 %v4125_v7, %v4102_v9  ;;  %vm1615_vm1 = vmor %vm1613_vm15, %vm1614_vm14  ;;  %v4228_v9 = vld [vmem:[%s3505_s14 + $0x38] sm:$0xff] }
 0x4ab   : > { %v1609_v30 = vmul.f32 %v2983_v47, %v1608_v61  ;;  %v1606_v21 = vsel %vm1605_vm10, %v2979_v48, %v1602_v2  ;;  %v2813_v48 = vld [vmem:[%s4858_s3 + $0x4] sm:$0x3]  ;;  %vm1643_vm3 = vweird.f32 %v4113_v15  ;;  %vm1634_vm9 = vweird.f32 %v4125_v7 }
 0x4ac   : > { %2988 = vrsqrt.f32 %v4118_v43  ;;  %v1721_v37 = vmul.f32 %v4062_v22, %v1606_v21  ;;  %v1706_v46 = vsel %vm4133_vm13, %v4096_v34, %v1702_v4  ;;  %v4154_v14 = vperm.slane %v2813_v48, 0  ;;  %vm1635_vm13 = vmor %vm1633_vm11, %vm1634_vm9 }
 0x4ad   : > { %v1736_v27 = vpop.permute.xlu2 %1735  ;;  %v1512_v13 = vpop.xlane.xlu0 %1511  ;;  %v1610_v49 = vmul.f32 0.5, %v1609_v30  ;;  %2990 = vrsqrt.f32 %v4120_v11  ;;  %v1731_v34 = vmul.f32 %v4159_v38, %v1706_v46  ;;  %vm1623_vm6 = vweird.f32 %v4118_v43 }
 0x4ae   : > { %v1536_v16 = vmul.f32 %v1512_v13, %v3385_v52  ;;  %1755 = vperm.xlu1 %2904, %v1721_v37   ;;  %v4148_v37 = vperm.slane %v2813_v48, 1  ;;  %v1813_v48 = vmul.f32 %v1736_v27, %v3899_v3  ;;  %v1928_v12 = vmul.f32 %v4154_v14, %v3162_v24 }
 0x4af   : > { %v1506_v56 = vpop.xlane.xlu1 %1505  ;;  %v1611_v61 = vsub.f32 1.5, %v1610_v49  ;;  %1805 = vperm.xlu0 %2913, %v1731_v34   ;;  %vm1713_vm15 = vweird.f32 %v4120_v11 }
 0x4b0   : > { %v4138_v30 = vadd.f32 1e-05, %v1536_v16  ;;  %v4140_v21 = vpop.eup %2986  ;;  %v1534_v13 = vmul.f32 %v1506_v56, %v3385_v52  ;;  %v1945_v4 = vmul.f32 %v4148_v37, %v3214_v45 }
 0x4b1   : > { %v1612_v8 = vmul.f32 %v2983_v47, %v1611_v61  ;;  %v1638_v49 = vmul.f32 %v4140_v21, %v4113_v15  ;;  %v1629_v61 = vmul.f32 %v4125_v7, %v1628_v6  ;;  %vm1644_vm2 = vweird.f32 %v4140_v21 }
 0x4b2   : > { %v4152_v16 = vpop.eup %2988  ;;  %2992 = vrsqrt.f32 %v4138_v30  ;;  %v4171_v1 = vadd.f32 1e-05, %v1534_v13  ;;  %v1961_v6 = vadd.f32 %v1945_v4, %v1928_v12  ;;  %vm1645_vm5 = vmor %vm1643_vm3, %vm1644_vm2  ;;  %vm1673_vm10 = vweird.f32 %v4138_v30 }
 0x4b3   : > { %v1639_v56 = vmul.f32 %v4140_v21, %v1638_v49  ;;  %v1618_v2 = vmul.f32 %v4152_v16, %v4118_v43  ;;  %v1616_v35 = vsel %vm1615_vm1, %v2983_v47, %v1612_v8  ;;  %v4173_v50 = vpop.eup %2990  ;;  %v1630_v47 = vmul.f32 0.5, %v1629_v61  ;;  %v4208_v43 = vld [vmem:[%s3505_s14 + $0x30] sm:$0xff] }
 0x4b4   : > { %v1722_v3 = vmul.f32 %v4177_v31, %v1616_v35  ;;  %v1708_v13 = vmul.f32 %v4173_v50, %v4120_v11  ;;  %2994 = vrsqrt.f32 %v4171_v1  ;;  %vm1624_vm4 = vweird.f32 %v4152_v16 }
 0x4b5   : > { %v1831_v46 = vpop.permute.xlu2 %1830  ;;  %v1640_v45 = vmul.f32 0.5, %v1639_v56  ;;  %v1619_v49 = vmul.f32 %v4152_v16, %v1618_v2  ;;  %v1535_v56 = vmul.f32 %v4104_v41, %v3385_v52  ;;  %v1631_v41 = vsub.f32 1.5, %v1630_v47  ;;  %vm1625_vm7 = vmor %vm1623_vm6, %vm1624_vm4 }
 0x4b6   : > { %v1893_v17 = vadd.f32 %v1831_v46, %v1813_v48  ;;  %2907 = vset.pattern.permute.xlu1 %v4970_v42  ;;  %1760 = vperm.xlu2 %2908, %v1722_v3   ;;  %v1709_v61 = vmul.f32 %v4173_v50, %v1708_v13  ;;  %vm1714_vm14 = vweird.f32 %v4173_v50  ;;  %vm1653_vm3 = vweird.f32 %v4171_v1 }
 0x4b7   : > { %v1641_v24 = vsub.f32 1.5, %v1640_v45  ;;  %v1620_v27 = vmul.f32 0.5, %v1619_v49  ;;  %1850 = vperm.xlu1 %2907, %v4177_v31   ;;  %v4197_v45 = vadd.f32 1e-05, %v1535_v56  ;;  %v4200_v49 = vld [vmem:[%s3505_s14 + $0x40] sm:$0xff]  ;;  %vm1715_vm1 = vmor %vm1713_vm15, %vm1714_vm14 }
 0x4b8   : > { %v1909_v34 = vmax.f32 %v1893_v17, 0.0  ;;  %v2993_v8 = vpop.eup %2992  ;;  %v1710_v47 = vmul.f32 0.5, %v1709_v61 }
 0x4b9   : > { %v1621_v35 = vsub.f32 1.5, %v1620_v27  ;;  %v1668_v2 = vmul.f32 %v2993_v8, %v4138_v30  ;;  %v1642_v4 = vmul.f32 %v4140_v21, %v1641_v24  ;;  %vm1674_vm8 = vweird.f32 %v2993_v8 }
 0x4ba   : > { %v1977_v17 = vmul.f32 %v1961_v6, %v1909_v34  ;;  %v4204_v27 = vpop.eup %2994  ;;  %v1632_v34 = vmul.f32 %v4125_v7, %v1631_v41  ;;  %2996 = vrsqrt.f32 %v4197_v45  ;;  %vm1675_vm12 = vmor %vm1673_vm10, %vm1674_vm8  ;;  %vm1663_vm6 = vweird.f32 %v4197_v45 }
 0x4bb   : > { %v1622_v48 = vmul.f32 %v4152_v16, %v1621_v35  ;;  %v1669_v12 = vmul.f32 %v2993_v8, %v1668_v2  ;;  %v1646_v46 = vsel %vm1645_vm5, %v4140_v21, %v1642_v4  ;;  %v1648_v13 = vmul.f32 %v4204_v27, %v4171_v1 }
 0x4bc   : > { %2823 = vmatmul.msk.f32.vlgmr.msra.gmra.mxu2 %vm485_vm0, %v1977_v17  ;;  %v1725_v3 = vmul.f32 %v4200_v49, %v1646_v46  ;;  %v1711_v35 = vsub.f32 1.5, %v1710_v47  ;;  %v4222_v17 = vld [vmem:[%s3505_s14 + $0x58] sm:$0xff]  ;;  %v1636_v30 = vsel %vm1635_vm13, %v4125_v7, %v1632_v34  ;;  %v1946_v46 = vmul.f32 %v4148_v37, %v3189_v33 }
 0x4bd   : > { %v1670_v15 = vmul.f32 0.5, %v1669_v12  ;;  %v1626_v24 = vsel %vm1625_vm7, %v4152_v16, %v1622_v48  ;;  %v1649_v48 = vmul.f32 %v4204_v27, %v1648_v13  ;;  %v1724_v41 = vmul.f32 %v4228_v9, %v1636_v30  ;;  %v3043_v47 = vld [vmem:[%s3505_s14 + $0x78] sm:$0xff] }
 0x4be   : > { %2909 = vset.pattern.permute.xlu2 %v4970_v42  ;;  %1775 = vperm.xlu0 %2913, %v1725_v3   ;;  %v1723_v21 = vmul.f32 %v4208_v43, %v1626_v24  ;;  %v1712_v61 = vmul.f32 %v4173_v50, %v1711_v35  ;;  %vm1654_vm2 = vweird.f32 %v4204_v27 }
 0x4bf   : > { %v1671_v6 = vsub.f32 1.5, %v1670_v15  ;;  %2910 = vset.pattern.permute.xlu1 %v4942_v63  ;;  %1854 = vperm.xlu2 %2909, %v4208_v43   ;;  %vm1655_vm4 = vmor %vm1653_vm3, %vm1654_vm2 }
 0x4c0   : > { %1765 = vperm.xlu1 %2910, %v1723_v21   ;;  %v2997_v12 = vpop.eup %2996  ;;  %v1716_v3 = vsel %vm1715_vm1, %v4173_v50, %v1712_v61  ;;  %v1839_v61 = vpop.permute.xlu2 %1838 }
 0x4c1   : > { %v1672_v16 = vmul.f32 %v2993_v8, %v1671_v6  ;;  %v1658_v7 = vmul.f32 %v2997_v12, %v4197_v45  ;;  %v1929_v6 = vmul.f32 %v4154_v14, %v3178_v29  ;;  %vm1664_vm5 = vweird.f32 %v2997_v12 }
 0x4c2   : > { %vm1665_vm7 = vmor %vm1663_vm6, %vm1664_vm5 }
 0x4c3   : > { %v1676_v56 = vsel %vm1675_vm12, %v2993_v8, %v1672_v16  ;;  %v1650_v8 = vmul.f32 0.5, %v1649_v48  ;;  %v1659_v21 = vmul.f32 %v2997_v12, %v1658_v7  ;;  %v1732_v16 = vmul.f32 %v3043_v47, %v1716_v3  ;;  %v3045_v48 = vld [vmem:[%s3505_s14 + $0x50] sm:$0xff] }
 0x4c4   : > { %v1728_v4 = vmul.f32 %v4222_v17, %v1676_v56  ;;  %v1962_v13 = vadd.f32 %v1946_v46, %v1929_v6  ;;  %v1930_v7 = vmul.f32 %v4154_v14, %v3160_v23  ;;  %v1931_v23 = vmul.f32 %v4154_v14, %v3174_v28 }
 0x4c5   : > { %v1741_v2 = vpop.permute.xlu0 %1740  ;;  %v1651_v34 = vsub.f32 1.5, %v1650_v8  ;;  %v1660_v33 = vmul.f32 0.5, %v1659_v21 }
 0x4c6   : > { %1790 = vperm.xlu0 %2913, %v1728_v4   ;;  %v1814_v15 = vmul.f32 %v1741_v2, %v3916_v55  ;;  %v3075_v2 = vmov 5  }
 0x4c7   : > { %2912 = vset.pattern.permute.xlu2 %v4942_v63  ;;  %v1652_v50 = vmul.f32 %v4204_v27, %v1651_v34  ;;  %v1661_v29 = vsub.f32 1.5, %v1660_v33  ;;  %v1843_v1 = vpop.permute.xlu1 %1842 }
 0x4c8   : > { %2911 = vset.pattern.permute.xlu1 %v4970_v42  ;;  %1770 = vperm.xlu2 %2912, %v1724_v41  }
 0x4c9   : > { %1858 = vperm.xlu1 %2911, %v4228_v9   ;;  %v1656_v35 = vsel %vm1655_vm4, %v4204_v27, %v1652_v50  ;;  %v1662_v30 = vmul.f32 %v2997_v12, %v1661_v29 }
 0x4cb   : > { %v1666_v27 = vsel %vm1665_vm7, %v2997_v12, %v1662_v30  ;;  %v1952_v30 = vmul.f32 %v4148_v37, %v3241_v60 }
 0x4cc   : > { %v1727_v41 = vmul.f32 %v3045_v48, %v1666_v27 }
 0x4ce   : > { %v1835_v24 = vpop.permute.xlu0 %1834  ;;  %2919 = vset.pattern.permute.xlu0 %v4970_v42 }
 0x4cf   : > { %v1894_v11 = vadd.f32 %v1835_v24, %v1814_v15  ;;  %1886 = vperm.xlu0 %2919, %v4159_v38   ;;  %v3044_v38 = vld [vmem:[%s3505_s14 + $0x48] sm:$0xff] }
 0x4d0   : > { %1810 = vperm.xlu2 %2912, %v1732_v16   ;;  %v1726_v4 = vmul.f32 %v3044_v38, %v1656_v35 }
 0x4d1   : > { %v1910_v56 = vmax.f32 %v1894_v11, 0.0  ;;  %1878 = vperm.xlu1 %2911, %v4055_v25  }
 0x4d3   : > { %v1978_v55 = vmul.f32 %v1962_v13, %v1910_v56 }
 0x4d5   : > { %2824 = vmatmul.msk.f32.gmra.mxu2 %vm485_vm0, %v1978_v55 }
 0x4d6   : > { %v1751_v45 = vpop.permute.xlu2 %1750 }
 0x4d7   : > { %2921 = vset.pattern.permute.xlu0 %v3075_v2 }
 0x4d8   : > { %2914 = vset.pattern.permute.xlu2 %v4970_v42  ;;  %2581 = vperm.xlu0 %2921, %v4032_v44  }
 0x4d9   : > { %2915 = vset.pattern.permute.xlu1 %v4942_v63  ;;  %1866 = vperm.xlu2 %2914, %v3044_v38  }
 0x4da   : > { %1780 = vperm.xlu1 %2915, %v1726_v4  }
 0x4e0   : > { %2601 = vperm.xlu0 %2921, %v4208_v43   ;;  %v1947_v43 = vmul.f32 %v4148_v37, %v3231_v54  ;;  %v1948_v54 = vmul.f32 %v4148_v37, %v3229_v53  ;;  %v1847_v53 = vpop.permute.xlu2 %1846 }
 0x4e1   : > { %2917 = vset.pattern.permute.xlu2 %v4942_v63 }
 0x4e2   : > { %2916 = vset.pattern.permute.xlu1 %v4970_v42  ;;  %1785 = vperm.xlu2 %2917, %v1727_v41  }
 0x4e3   : > { %1882 = vperm.xlu1 %2916, %v4107_v10   ;;  %v1816_v10 = vmul.f32 %v1751_v45, %v3942_v5  ;;  %v1964_v5 = vadd.f32 %v1948_v54, %v1931_v23  ;;  %v4974_v45 = vld [vmem:[#allocation21_spill] sm:$0xff] }
 0x4e4   : > { %v4977_v54 = vld [vmem:[#allocation13_spill] sm:$0xff] }
 0x4e5   : > { %v1896_v15 = vadd.f32 %v1843_v1, %v1816_v10  ;;  %v1953_v23 = vmul.f32 %v4148_v37, %v4977_v54  ;;  %v4990_v54 = vld [vmem:[#allocation15_spill] sm:$0xff] }
 0x4e6   : > { %v4264_v44 = vpop.permute.xlu1 %1795 }
 0x4e8   : > { %2613 = vperm.xlu0 %2921, %v3044_v38  }
 0x4ea   : > { %2918 = vset.pattern.permute.xlu2 %v4970_v42  ;;  %v1963_v42 = vadd.f32 %v1947_v43, %v1930_v7 }
 0x4eb   : > { %1874 = vperm.xlu1 %2916, %v4222_v17   ;;  %1870 = vperm.xlu2 %2918, %v3045_v48  }
 0x4ee   : > { %v1746_v12 = vpop.permute.xlu1 %1745 }
 0x4ef   : > { %v1815_v63 = vmul.f32 %v1746_v12, %v3927_v62  ;;  %v1912_v62 = vmax.f32 %v1896_v15, 0.0  ;;  %v4976_v15 = vld [vmem:[#allocation22_spill] sm:$0xff] }
 0x4f0   : > { %2625 = vperm.xlu0 %2921, %v4055_v25  }
 0x4f1   : > { %v1895_v8 = vadd.f32 %v1839_v61, %v1815_v63  ;;  %v1980_v25 = vmul.f32 %v1964_v5, %v1912_v62  ;;  %v4978_v5 = vld [vmem:[#allocation9_spill] sm:$0xff] }
 0x4f3   : > { %v1911_v46 = vmax.f32 %v1895_v8, 0.0  ;;  %1890 = vperm.xlu2 %2918, %v3043_v47   ;;  %2922 = vset.pattern.permute.xlu1 %v3075_v2 }
 0x4f4   : > { %2585 = vperm.xlu1 %2922, %v4046_v20  }
 0x4f5   : > { %v1979_v3 = vmul.f32 %v1963_v42, %v1911_v46  ;;  %v4975_v46 = vld [vmem:[#allocation12_spill] sm:$0xff] }
 0x4f6   : > { %v1957_v42 = vmul.f32 %v4148_v37, %v4975_v46 }
 0x4f7   : > { %2825 = vmatmul.msk.f32.gmra.mxu2 %vm485_vm0, %v1979_v3  ;;  %v1825_v3 = vmul.f32 %v4264_v44, %v4976_v15 }
 0x4fb   : > { %2920 = vset.pattern.permute.xlu2 %v3075_v2 }
 0x4fc   : > { %2593 = vperm.xlu1 %2922, %v4062_v22   ;;  %2577 = vperm.xlu2 %2920, %v4028_v26   ;;  %v1949_v26 = vmul.f32 %v4148_v37, %v3195_v36  ;;  %v1933_v36 = vmul.f32 %v4154_v14, %v3149_v19  ;;  %v1934_v19 = vmul.f32 %v4154_v14, %v3187_v32 }
 0x4ff   : > { %2826 = vmatmul.msk.f32.gmra.mxu2 %vm485_vm0, %v1980_v25  ;;  %v1940_v25 = vmul.f32 %v4154_v14, %v4978_v5 }
 0x504   : > { %2605 = vperm.xlu1 %2922, %v4228_v9   ;;  %2589 = vperm.xlu2 %2920, %v4039_v58   ;;  %v1932_v58 = vmul.f32 %v4154_v14, %v3146_v18 }
 0x506   : > { %v1965_v21 = vadd.f32 %v1949_v26, %v1932_v58 }
 0x50c   : > { %2617 = vperm.xlu1 %2922, %v3045_v48   ;;  %2597 = vperm.xlu2 %2920, %v4177_v31   ;;  %v4973_v48 = vld [vmem:[#allocation5_spill] sm:$0xff] }
 0x50d   : > { %v1935_v32 = vmul.f32 %v4154_v14, %v4973_v48 }
 0x50f   : > { %v1968_v60 = vadd.f32 %v1952_v30, %v1935_v32  ;;  %v4986_v30 = vld [vmem:[#allocation14_spill] sm:$0xff] }
 0x510   : > { %v1761_v20 = vpop.permute.xlu2 %1760 }
 0x511   : > { %v1818_v11 = vmul.f32 %v1761_v20, %v3974_v51  ;;  %v4979_v20 = vld [vmem:[#allocation2_spill] sm:$0xff] }
 0x514   : > { %2609 = vperm.xlu2 %2920, %v4200_v49   ;;  %v1950_v49 = vmul.f32 %v4148_v37, %v3239_v59  ;;  %v1951_v59 = vmul.f32 %v4148_v37, %v3201_v39  ;;  %v4320_v39 = vld [vmem:[%s4857_s2 + $0x2] ss:$0 sm:$0xff] }
 0x516   : > { %v1966_v13 = vadd.f32 %v1950_v49, %v1933_v36  ;;  %v1967_v38 = vadd.f32 %v1951_v59, %v1934_v19  ;;  %v4982_v36 = vld [vmem:[#allocation7_spill] sm:$0xff] }
 0x518   : > { %v4290_v28 = vpop.permute.xlu1 %1800 }
 0x519   : > { %v1855_v24 = vpop.permute.xlu2 %1854 }
 0x51c   : > { %2621 = vperm.xlu2 %2920, %v4222_v17   ;;  %v1863_v17 = vpop.permute.xlu0 %1862 }
 0x520   : > { %v1756_v22 = vpop.permute.xlu1 %1755 }
 0x521   : > { %v1817_v9 = vmul.f32 %v1756_v22, %v3957_v57  ;;  %v1936_v22 = vmul.f32 %v4154_v14, %v4979_v20  ;;  %v4993_v20 = vld [vmem:[#allocation3_spill] sm:$0xff] }
 0x522   : > { %v1771_v16 = vpop.permute.xlu2 %1770 }
 0x523   : > { %v1897_v6 = vadd.f32 %v1847_v53, %v1817_v9  ;;  %v1820_v1 = vmul.f32 %v1771_v16, %v3971_v0  ;;  %v1973_v9 = vadd.f32 %v1957_v42, %v1940_v25  ;;  %v4992_v25 = vld [vmem:[#allocation25_spill] sm:$0xff] }
 0x524   : > { %v4305_v33 = vpop.permute.xlu0 %1805 }
 0x525   : > { %v1913_v31 = vmax.f32 %v1897_v6, 0.0  ;;  %v1969_v6 = vadd.f32 %v1953_v23, %v1936_v22  ;;  %v1956_v23 = vmul.f32 %v4148_v37, %v4990_v54  ;;  %v1939_v22 = vmul.f32 %v4154_v14, %v4993_v20 }
 0x527   : > { %v1981_v34 = vmul.f32 %v1965_v21, %v1913_v31 }
 0x529   : > { %v1851_v47 = vpop.permute.xlu1 %1850  ;;  %2827 = vmatmul.msk.f32.gmra.mxu2 %vm485_vm0, %v1981_v34  ;;  %v4980_v34 = vld [vmem:[#allocation11_spill] sm:$0xff] }
 0x52a   : > { %v1898_v57 = vadd.f32 %v1851_v47, %v1818_v11  ;;  %v4310_v55 = vpop.permute.xlu2 %1810  ;;  %v1954_v49 = vmul.f32 %v4148_v37, %v4980_v34  ;;  %v1972_v34 = vadd.f32 %v1956_v23, %v1939_v22 }
 0x52c   : > { %v1914_v18 = vmax.f32 %v1898_v57, 0.0  ;;  %v1937_v57 = vmul.f32 %v4154_v14, %v4982_v36  ;;  %v4996_v36 = vld [vmem:[#allocation18_spill] sm:$0xff] }
 0x52e   : > { %v1982_v56 = vmul.f32 %v1966_v13, %v1914_v18  ;;  %v4983_v18 = vld [vmem:[#allocation24_spill] sm:$0xff]  ;;  %v1970_v59 = vadd.f32 %v1954_v49, %v1937_v57  ;;  %v1960_v57 = vmul.f32 %v4148_v37, %v4996_v36 }
 0x530   : > { %v1776_v27 = vpop.permute.xlu0 %1775 }
 0x531   : > { %2828 = vmatmul.msk.f32.gmra.mxu2 %vm485_vm0, %v1982_v56  ;;  %v1821_v12 = vmul.f32 %v1776_v27, %v4974_v45 }
 0x532   : > { %v1766_v50 = vpop.permute.xlu1 %1765 }
 0x533   : > { %v1819_v51 = vmul.f32 %v1766_v50, %v3999_v40  ;;  %v1867_v41 = vpop.permute.xlu2 %1866  ;;  %v1901_v8 = vadd.f32 %v1863_v17, %v1821_v12  ;;  %v4981_v17 = vld [vmem:[#allocation26_spill] sm:$0xff] }
 0x535   : > { %v1899_v29 = vadd.f32 %v1855_v24, %v1819_v51  ;;  %v1917_v26 = vmax.f32 %v1901_v8, 0.0 }
 0x537   : > { %v1915_v35 = vmax.f32 %v1899_v29, 0.0  ;;  %v1985_v44 = vmul.f32 %v1969_v6, %v1917_v26  ;;  %v4984_v29 = vld [vmem:[#allocation16_spill] sm:$0xff] }
 0x538   : > { %v1791_v11 = vpop.permute.xlu0 %1790  ;;  %v4994_v26 = vld [vmem:[#allocation4_spill] sm:$0xff] }
 0x539   : > { %v1983_v4 = vmul.f32 %v1967_v38, %v1915_v35  ;;  %v1958_v35 = vmul.f32 %v4148_v37, %v4984_v29  ;;  %v4985_v38 = vld [vmem:[#allocation19_spill] sm:$0xff] }
 0x53b   : > { %v1859_v40 = vpop.permute.xlu1 %1858  ;;  %2829 = vmatmul.msk.f32.gmra.mxu2 %vm485_vm0, %v1983_v4  ;;  %v1826_v4 = vmul.f32 %v4290_v28, %v4985_v38  ;;  %v4989_v28 = vld [vmem:[#allocation20_spill] sm:$0xff] }
 0x53c   : > { %v1900_v61 = vadd.f32 %v1859_v40, %v1820_v1  ;;  %v1786_v24 = vpop.permute.xlu2 %1785  ;;  %v1955_v1 = vmul.f32 %v4148_v37, %v4986_v30  ;;  %v4987_v40 = vld [vmem:[#allocation8_spill] sm:$0xff] }
 0x53d   : > { %v1823_v56 = vmul.f32 %v1786_v24, %v4983_v18  ;;  %v1941_v48 = vmul.f32 %v4154_v14, %v4987_v40  ;;  %v1942_v24 = vmul.f32 %v4154_v14, %v4994_v26 }
 0x53e   : > { %v1916_v63 = vmax.f32 %v1900_v61, 0.0  ;;  %v4988_v61 = vld [vmem:[#allocation6_spill] sm:$0xff] }
 0x53f   : > { %v2080_v43 = vpop.f32.mrf.mxu2  ;;  %v1938_v45 = vmul.f32 %v4154_v14, %v4988_v61 }
 0x540   : > { %v4327_v0 = vadd.f32 %v4320_v39, %v2080_v43  ;;  %v1984_v7 = vmul.f32 %v1968_v60, %v1916_v63  ;;  %v1827_v63 = vmul.f32 %v4305_v33, %v4989_v28 }
 0x541   : > { %v1887_v12 = vpop.permute.xlu0 %1886  ;;  %v1971_v8 = vadd.f32 %v1955_v1, %v1938_v45 }
 0x542   : > { %v2128_v10 = vsel %vm485_vm0, %v4327_v0, 0.0  ;;  %v1907_v42 = vadd.f32 %v1887_v12, %v1827_v63 }
 0x543   : > { %2129 = vadd.xlane.f32.xlu0 %v2128_v10  ;;  %v1879_v62 = vpop.permute.xlu1 %1878  ;;  %2830 = vmatmul.msk.f32.gmra.mxu2 %vm485_vm0, %v1984_v7  ;;  %v1974_v7 = vadd.f32 %v1958_v35, %v1941_v48 }
 0x544   : > { %v1905_v53 = vadd.f32 %v1879_v62, %v1825_v3  ;;  %v4991_v62 = vld [vmem:[#allocation17_spill] sm:$0xff] }
 0x545   : > { %v1871_v13 = vpop.permute.xlu2 %1870  ;;  %v1959_v5 = vmul.f32 %v4148_v37, %v4991_v62 }
 0x546   : > { %v1921_v58 = vmax.f32 %v1905_v53, 0.0  ;;  %v1903_v51 = vadd.f32 %v1871_v13, %v1823_v56  ;;  %v1824_v53 = vmul.f32 %v1791_v11, %v4992_v25 }
 0x548   : > { %v1989_v31 = vmul.f32 %v1973_v9, %v1921_v58  ;;  %v1919_v43 = vmax.f32 %v1903_v51, 0.0  ;;  %v1923_v9 = vmax.f32 %v1907_v42, 0.0 }
 0x54a   : > { %2835 = vmatmul.msk.f32.vlgmr.msra.gmra.mxu3 %vm485_vm0, %v1989_v31  ;;  %v1987_v3 = vmul.f32 %v1971_v8, %v1919_v43  ;;  %v4995_v31 = vld [vmem:[#allocation23_spill] sm:$0xff]  ;;  %v4395_v38 = vpop.permute.xlu0 %2581 }
 0x54b   : > { %2831 = vmatmul.msk.f32.gmra.mxu2 %vm485_vm0, %v1985_v44  ;;  %v1828_v44 = vmul.f32 %v4310_v55, %v4995_v31 }
 0x54c   : > { %v1781_v21 = vpop.permute.xlu1 %1780 }
 0x54d   : > { %v1822_v47 = vmul.f32 %v1781_v21, %v4981_v17  ;;  %v1891_v6 = vpop.permute.xlu2 %1890  ;;  %v1975_v21 = vadd.f32 %v1959_v5, %v1942_v24 }
 0x54e   : > { %v1908_v17 = vadd.f32 %v1891_v6, %v1828_v44 }
 0x54f   : > { %v1902_v16 = vadd.f32 %v1867_v41, %v1822_v47  ;;  %v1991_v11 = vmul.f32 %v1975_v21, %v1923_v9 }
 0x550   : > { %v1924_v18 = vmax.f32 %v1908_v17, 0.0 }
 0x551   : > { %v1918_v50 = vmax.f32 %v1902_v16, 0.0  ;;  %v4997_v16 = vld [vmem:[#allocation10_spill] sm:$0xff] }
 0x552   : > { %v1943_v13 = vmul.f32 %v4154_v14, %v4997_v16 }
 0x553   : > { %v1986_v19 = vmul.f32 %v1970_v59, %v1918_v50 }
 0x554   : > { %v1976_v56 = vadd.f32 %v1960_v57, %v1943_v13 }
 0x555   : > { %v1883_v27 = vpop.permute.xlu1 %1882  ;;  %2832 = vmatmul.msk.f32.gmra.mxu2 %vm485_vm0, %v1986_v19 }
 0x556   : > { %v1906_v32 = vadd.f32 %v1883_v27, %v1826_v4  ;;  %v1992_v50 = vmul.f32 %v1976_v56, %v1924_v18  ;;  %v4393_v35 = vpop.permute.xlu2 %2577 }
 0x558   : > { %v2083_v41 = vpop.f32.mrf.mxu2  ;;  %v1922_v10 = vmax.f32 %v1906_v32, 0.0  ;;  %v4409_v32 = vpop.permute.xlu0 %2601 }
 0x559   : > { %v4362_v60 = vadd.f32 %v4320_v39, %v2083_v41 }
 0x55a   : > { %v1990_v15 = vmul.f32 %v1974_v7, %v1922_v10 }
 0x55b   : > { %v2131_v46 = vsel %vm485_vm0, %v4362_v60, 0.0 }
 0x55c   : > { %2132 = vadd.xlane.f32.xlu1 %v2131_v46  ;;  %2836 = vmatmul.msk.f32.gmra.mxu3 %vm485_vm0, %v1990_v15 }
 0x55d   : > { %v1875_v33 = vpop.permute.xlu1 %1874  ;;  %2833 = vmatmul.msk.f32.gmra.mxu2 %vm485_vm0, %v1987_v3 }
 0x55e   : > { %v1904_v58 = vadd.f32 %v1875_v33, %v1824_v53  ;;  %v4402_v27 = vpop.permute.xlu2 %2589 }
 0x560   : > { %v1920_v49 = vmax.f32 %v1904_v58, 0.0  ;;  %v4417_v43 = vpop.permute.xlu0 %2613 }
 0x562   : > { %v1988_v47 = vmul.f32 %v1972_v34, %v1920_v49 }
 0x564   : > { %2837 = vmatmul.msk.f32.gmra.mxu3 %vm485_vm0, %v1991_v11 }
 0x565   : > { %2834 = vmatmul.msk.f32.gmra.mxu2 %vm485_vm0, %v1988_v47 }
 0x566   : > { %v4407_v48 = vpop.permute.xlu1 %2585  ;;  %v4413_v45 = vpop.permute.xlu2 %2597 }
 0x568   : > { %v4434_v23 = vpop.permute.xlu0 %2625 }
 0x56c   : > { %2838 = vmatmul.msk.f32.gmra.mxu3 %vm485_vm0, %v1992_v50 }
 0x56e   : > { %v4415_v12 = vpop.permute.xlu1 %2593  ;;  %v4427_v46 = vpop.permute.xlu2 %2609 }
 0x576   : > { %v4429_v15 = vpop.permute.xlu1 %2605  ;;  %v4449_v22 = vpop.permute.xlu2 %2621 }
 0x57a   : > { %v2086_v55 = vpop.f32.mrf.mxu2 }
 0x57b   : > { %v4389_v59 = vadd.f32 %v4320_v39, %v2086_v55 }
 0x57d   : > { %v2134_v51 = vsel %vm485_vm0, %v4389_v59, 0.0 }
 0x57e   : > { %2135 = vadd.xlane.f32.xlu2 %v2134_v51  ;;  %v4451_v26 = vpop.permute.xlu1 %2617 }
 0x582   : > { %v2089_v37 = vpop.f32.mrf.mxu2 }
 0x583   : > { %v4405_v40 = vadd.f32 %v4320_v39, %v2089_v37 }
 0x585   : > { %v2137_v61 = vsel %vm485_vm0, %v4405_v40, 0.0 }
 0x5ac   : > { %v2092_v19 = vpop.f32.mrf.mxu2 }
 0x5ad   : > { %v4425_v8 = vadd.f32 %v4320_v39, %v2092_v19 }
 0x5af   : > { %v2140_v62 = vsel %vm485_vm0, %v4425_v8, 0.0 }
 0x5b4   : > { %v2095_v29 = vpop.f32.mrf.mxu2 }
 0x5b5   : > { %v4444_v53 = vadd.f32 %v4320_v39, %v2095_v29 }
 0x5b6   : > { %v2130_v6 = vpop.xlane.xlu0 %2129 }
 0x5b7   : > { %v2143_v31 = vsel %vm485_vm0, %v4444_v53, 0.0  ;;  %v2176_v44 = vmul.f32 %v2130_v6, %v3385_v52 }
 0x5b9   : > { %v4470_v11 = vsub.f32 %v4327_v0, %v2176_v44 }
 0x5bb   : > { %v2208_v56 = vmul.f32 %v4470_v11, %v4470_v11 }
 0x5bd   : > { %v2224_v19 = vsel %vm485_vm0, %v2208_v56, 0.0 }
 0x5be   : > { %v2098_v14 = vpop.f32.mrf.mxu2 }
 0x5bf   : > { %v4461_v21 = vadd.f32 %v4320_v39, %v2098_v14 }
 0x5c1   : > { %v2146_v47 = vsel %vm485_vm0, %v4461_v21, 0.0 }
 0x5c6   : > { %v2101_v41 = vpop.f32.mrf.mxu2 }
 0x5c7   : > { %v4441_v25 = vadd.f32 %v4320_v39, %v2101_v41 }
 0x5c9   : > { %v2149_v9 = vsel %vm485_vm0, %v4441_v25, 0.0 }
 0x5cd   : > { %v2116_v4 = vpop.f32.mrf.mxu3 }
 0x5ce   : > { %v4398_v30 = vadd.f32 %v4320_v39, %v2116_v4  ;;  %v2104_v63 = vpop.f32.mrf.mxu2 }
 0x5cf   : > { %v4467_v49 = vadd.f32 %v4320_v39, %v2104_v63  ;;  %v2133_v16 = vpop.xlane.xlu1 %2132 }
 0x5d0   : > { %v2164_v1 = vsel %vm485_vm0, %v4398_v30, 0.0  ;;  %v2177_v50 = vmul.f32 %v2133_v16, %v3385_v52 }
 0x5d1   : > { %2165 = vadd.xlane.f32.xlu0 %v2164_v1  ;;  %v2152_v57 = vsel %vm485_vm0, %v4467_v49, 0.0 }
 0x5d2   : > { %v4495_v29 = vsub.f32 %v4362_v60, %v2177_v50 }
 0x5d8   : > { %v2107_v3 = vpop.f32.mrf.mxu2 }
 0x5d9   : > { %2138 = vadd.xlane.f32.xlu0 %v2137_v61  ;;  %v4479_v18 = vadd.f32 %v4320_v39, %v2107_v3 }
 0x5db   : > { %v2155_v37 = vsel %vm485_vm0, %v4479_v18, 0.0 }
 0x5df   : > { %v2119_v28 = vpop.f32.mrf.mxu3 }
 0x5e0   : > { %v4420_v7 = vadd.f32 %v4320_v39, %v2119_v28  ;;  %v2110_v24 = vpop.f32.mrf.mxu2 }
 0x5e1   : > { %v4464_v34 = vadd.f32 %v4320_v39, %v2110_v24 }
 0x5e2   : > { %v2167_v10 = vsel %vm485_vm0, %v4420_v7, 0.0 }
 0x5e3   : > { %2168 = vadd.xlane.f32.xlu1 %v2167_v10  ;;  %v2158_v17 = vsel %vm485_vm0, %v4464_v34, 0.0 }
 0x5e7   : > { %v2122_v42 = vpop.f32.mrf.mxu3 }
 0x5e8   : > { %v4432_v54 = vadd.f32 %v4320_v39, %v2122_v42  ;;  %v2113_v13 = vpop.f32.mrf.mxu2 }
 0x5e9   : > { %v4486_v55 = vadd.f32 %v4320_v39, %v2113_v13 }
 0x5ea   : > { %v2170_v5 = vsel %vm485_vm0, %v4432_v54, 0.0 }
 0x5eb   : > { %2141 = vadd.xlane.f32.xlu1 %v2140_v62  ;;  %2171 = vadd.xlane.f32.xlu2 %v2170_v5  ;;  %v2161_v14 = vsel %vm485_vm0, %v4486_v55, 0.0 }
 0x5ef   : > { %v2125_v33 = vpop.f32.mrf.mxu3 }
 0x5f0   : > { %v4447_v20 = vadd.f32 %v4320_v39, %v2125_v33 }
 0x5f1   : > { %v2136_v36 = vpop.xlane.xlu2 %2135 }
 0x5f2   : > { %v2173_v58 = vsel %vm485_vm0, %v4447_v20, 0.0  ;;  %v2178_v0 = vmul.f32 %v2136_v36, %v3385_v52 }
 0x5f3   : > { %2150 = vadd.xlane.f32.xlu1 %v2149_v9  ;;  %2174 = vadd.xlane.f32.xlu0 %v2173_v58 }
 0x5f4   : > { %2144 = vadd.xlane.f32.xlu2 %v2143_v31  ;;  %v4489_v51 = vsub.f32 %v4389_v59, %v2178_v0  ;;  %v2209_v59 = vmul.f32 %v4495_v29, %v4495_v29 }
 0x5f6   : > { %v2210_v39 = vmul.f32 %v4489_v51, %v4489_v51  ;;  %v2227_v1 = vsel %vm485_vm0, %v2209_v59, 0.0 }
 0x5f8   : > { %v2230_v4 = vsel %vm485_vm0, %v2210_v39, 0.0 }
 0x5fb   : > { %2159 = vadd.xlane.f32.xlu1 %v2158_v17  ;;  %2147 = vadd.xlane.f32.xlu0 %v2146_v47 }
 0x5fc   : > { %2153 = vadd.xlane.f32.xlu2 %v2152_v57 }
 0x603   : > { %2156 = vadd.xlane.f32.xlu0 %v2155_v37  ;;  %2225 = vadd.xlane.f32.xlu1 %v2224_v19 }
 0x604   : > { %2162 = vadd.xlane.f32.xlu2 %v2161_v14 }
 0x60b   : > { %2231 = vadd.xlane.f32.xlu0 %v2230_v4 }
 0x60c   : > { %2228 = vadd.xlane.f32.xlu2 %v2227_v1 }
 0x644   : > { %v2166_v60 = vpop.xlane.xlu0 %2165 }
 0x645   : > { %v2188_v41 = vmul.f32 %v2166_v60, %v3385_v52 }
 0x647   : > { %v4507_v61 = vsub.f32 %v4398_v30, %v2188_v41 }
 0x649   : > { %v2220_v28 = vmul.f32 %v4507_v61, %v4507_v61 }
 0x64b   : > { %v2260_v63 = vsel %vm485_vm0, %v2220_v28, 0.0 }
 0x64c   : > { %2261 = vadd.xlane.f32.xlu1 %v2260_v63  ;;  %v2139_v10 = vpop.xlane.xlu0 %2138 }
 0x64d   : > { %v2179_v42 = vmul.f32 %v2139_v10, %v3385_v52 }
 0x64f   : > { %v4514_v3 = vsub.f32 %v4405_v40, %v2179_v42 }
 0x651   : > { %v2211_v62 = vmul.f32 %v4514_v3, %v4514_v3 }
 0x653   : > { %v2233_v5 = vsel %vm485_vm0, %v2211_v62, 0.0 }
 0x654   : > { %2234 = vadd.xlane.f32.xlu1 %v2233_v5 }
 0x656   : > { %v2169_v30 = vpop.xlane.xlu1 %2168 }
 0x657   : > { %v2189_v33 = vmul.f32 %v2169_v30, %v3385_v52 }
 0x659   : > { %v4521_v24 = vsub.f32 %v4420_v7, %v2189_v33 }
 0x65b   : > { %v2221_v9 = vmul.f32 %v4521_v24, %v4521_v24 }
 0x65d   : > { %v2263_v58 = vsel %vm485_vm0, %v2221_v9, 0.0  ;;  %v3076_v9 = vmov 2  }
 0x65e   : > { %v2142_v6 = vpop.xlane.xlu1 %2141  ;;  %2264 = vadd.xlane.f32.xlu2 %v2263_v58  ;;  %v2172_v40 = vpop.xlane.xlu2 %2171  ;;  %2924 = vset.pattern.permute.xlu0 %v3076_v9 }
 0x65f   : > { %v2180_v31 = vmul.f32 %v2142_v6, %v3385_v52  ;;  %v2190_v44 = vmul.f32 %v2172_v40, %v3385_v52  ;;  %2923 = vset.pattern.permute.xlu2 %v3076_v9  ;;  %2925 = vset.pattern.permute.xlu1 %v3076_v9 }
 0x661   : > { %v4529_v17 = vsub.f32 %v4425_v8, %v2180_v31  ;;  %v4532_v47 = vsub.f32 %v4432_v54, %v2190_v44 }
 0x663   : > { %v2212_v7 = vmul.f32 %v4529_v17, %v4529_v17  ;;  %v2222_v36 = vmul.f32 %v4532_v47, %v4532_v47 }
 0x665   : > { %v2236_v57 = vsel %vm485_vm0, %v2212_v7, 0.0  ;;  %v2266_v16 = vsel %vm485_vm0, %v2222_v36, 0.0 }
 0x666   : > { %v2151_v13 = vpop.xlane.xlu1 %2150  ;;  %2237 = vadd.xlane.f32.xlu2 %v2236_v57  ;;  %2267 = vadd.xlane.f32.xlu0 %v2266_v16  ;;  %v2175_v0 = vpop.xlane.xlu0 %2174 }
 0x667   : > { %v2183_v8 = vmul.f32 %v2151_v13, %v3385_v52  ;;  %v2145_v56 = vpop.xlane.xlu2 %2144  ;;  %v2191_v54 = vmul.f32 %v2175_v0, %v3385_v52 }
 0x668   : > { %v2181_v50 = vmul.f32 %v2145_v56, %v3385_v52 }
 0x669   : > { %v4544_v37 = vsub.f32 %v4441_v25, %v2183_v8  ;;  %v4547_v19 = vsub.f32 %v4447_v20, %v2191_v54 }
 0x66a   : > { %v4550_v14 = vsub.f32 %v4444_v53, %v2181_v50 }
 0x66b   : > { %v2215_v39 = vmul.f32 %v4544_v37, %v4544_v37  ;;  %v2223_v59 = vmul.f32 %v4547_v19, %v4547_v19 }
 0x66c   : > { %v2213_v4 = vmul.f32 %v4550_v14, %v4550_v14 }
 0x66d   : > { %v2245_v1 = vsel %vm485_vm0, %v2215_v39, 0.0  ;;  %v2269_v25 = vsel %vm485_vm0, %v2223_v59, 0.0 }
 0x66e   : > { %v2160_v60 = vpop.xlane.xlu1 %2159  ;;  %2246 = vadd.xlane.f32.xlu2 %v2245_v1  ;;  %v2239_v20 = vsel %vm485_vm0, %v2213_v4, 0.0  ;;  %2270 = vadd.xlane.f32.xlu1 %v2269_v25  ;;  %v2148_v53 = vpop.xlane.xlu0 %2147 }
 0x66f   : > { %v2186_v41 = vmul.f32 %v2160_v60, %v3385_v52  ;;  %2240 = vadd.xlane.f32.xlu0 %v2239_v20  ;;  %v2154_v28 = vpop.xlane.xlu2 %2153  ;;  %v2182_v63 = vmul.f32 %v2148_v53, %v3385_v52 }
 0x670   : > { %v2184_v10 = vmul.f32 %v2154_v28, %v3385_v52 }
 0x671   : > { %v4565_v42 = vsub.f32 %v4464_v34, %v2186_v41  ;;  %v4568_v62 = vsub.f32 %v4461_v21, %v2182_v63  ;;  %v3046_v63 = vld [vmem:[%s3505_s14] sm:$0xff] }
 0x672   : > { %v4571_v5 = vsub.f32 %v4467_v49, %v2184_v10 }
 0x673   : > { %v2218_v30 = vmul.f32 %v4565_v42, %v4565_v42  ;;  %v2214_v33 = vmul.f32 %v4568_v62, %v4568_v62 }
 0x674   : > { %v2216_v58 = vmul.f32 %v4571_v5, %v4571_v5 }
 0x675   : > { %v2254_v34 = vsel %vm485_vm0, %v2218_v30, 0.0  ;;  %v2242_v21 = vsel %vm485_vm0, %v2214_v33, 0.0 }
 0x676   : > { %2255 = vadd.xlane.f32.xlu2 %v2254_v34  ;;  %v2248_v49 = vsel %vm485_vm0, %v2216_v58, 0.0  ;;  %v2226_v6 = vpop.xlane.xlu1 %2225  ;;  %2243 = vadd.xlane.f32.xlu1 %v2242_v21  ;;  %v2157_v40 = vpop.xlane.xlu0 %2156  ;;  %v3047_v34 = vld [vmem:[%s3505_s14 + $0x8] sm:$0xff] }
 0x677   : > { %2249 = vadd.xlane.f32.xlu0 %v2248_v49  ;;  %v2163_v31 = vpop.xlane.xlu2 %2162  ;;  %v2272_v44 = vmul.f32 %v2226_v6, %v3385_v52  ;;  %v2185_v7 = vmul.f32 %v2157_v40, %v3385_v52 }
 0x678   : > { %v2187_v36 = vmul.f32 %v2163_v31, %v3385_v52 }
 0x679   : > { %v2288_v57 = vadd.f32 1e-05, %v2272_v44  ;;  %v4586_v16 = vsub.f32 %v4479_v18, %v2185_v7 }
 0x67a   : > { %v4589_v13 = vsub.f32 %v4486_v55, %v2187_v36 }
 0x67b   : > { %2998 = vrsqrt.f32 %v2288_v57  ;;  %v2217_v0 = vmul.f32 %v4586_v16, %v4586_v16  ;;  %vm2310_vm9 = vweird.f32 %v2288_v57 }
 0x67c   : > { %v2219_v8 = vmul.f32 %v4589_v13, %v4589_v13 }
 0x67d   : > { %v2251_v56 = vsel %vm485_vm0, %v2217_v0, 0.0 }
 0x67e   : > { %v2257_v54 = vsel %vm485_vm0, %v2219_v8, 0.0  ;;  %2252 = vadd.xlane.f32.xlu1 %v2251_v56  ;;  %v2232_v49 = vpop.xlane.xlu0 %2231 }
 0x67f   : > { %2258 = vadd.xlane.f32.xlu0 %v2257_v54  ;;  %v2229_v50 = vpop.xlane.xlu2 %2228  ;;  %v2274_v6 = vmul.f32 %v2232_v49, %v3385_v52 }
 0x680   : > { %v2273_v18 = vmul.f32 %v2229_v50, %v3385_v52 }
 0x681   : > { %v2999_v39 = vpop.eup %2998  ;;  %v2290_v40 = vadd.f32 1e-05, %v2274_v6 }
 0x682   : > { %v2305_v55 = vmul.f32 %v2999_v39, %v2288_v57  ;;  %v2289_v59 = vadd.f32 1e-05, %v2273_v18  ;;  %vm2311_vm8 = vweird.f32 %v2999_v39 }
 0x683   : > { %vm2312_vm10 = vmor %vm2310_vm9, %vm2311_vm8  ;;  %vm2330_vm3 = vweird.f32 %v2290_v40 }
 0x684   : > { %v2306_v4 = vmul.f32 %v2999_v39, %v2305_v55  ;;  %3000 = vrsqrt.f32 %v2289_v59  ;;  %vm2320_vm12 = vweird.f32 %v2289_v59 }
 0x685   : > { %3002 = vrsqrt.f32 %v2290_v40 }
 0x686   : > { %v2307_v1 = vmul.f32 0.5, %v2306_v4 }
 0x688   : > { %v2308_v25 = vsub.f32 1.5, %v2307_v1 }
 0x68a   : > { %v3001_v60 = vpop.eup %3000  ;;  %v2309_v20 = vmul.f32 %v2999_v39, %v2308_v25 }
 0x68b   : > { %v2315_v53 = vmul.f32 %v3001_v60, %v2289_v59  ;;  %vm2321_vm11 = vweird.f32 %v3001_v60  ;;  %v3003_v36 = vpop.eup %3002 }
 0x68c   : > { %v2313_v41 = vsel %vm2312_vm10, %v2999_v39, %v2309_v20  ;;  %vm2322_vm13 = vmor %vm2320_vm12, %vm2321_vm11  ;;  %v2325_v57 = vmul.f32 %v3003_v36, %v2290_v40  ;;  %vm2331_vm2 = vweird.f32 %v3003_v36 }
 0x68d   : > { %v2316_v28 = vmul.f32 %v3001_v60, %v2315_v53  ;;  %v2464_v10 = vmul.f32 %v3046_v63, %v2313_v41  ;;  %v3048_v63 = vld [vmem:[%s3505_s14 + $0x60] sm:$0xff]  ;;  %vm2332_vm4 = vmor %vm2330_vm3, %vm2331_vm2 }
 0x68e   : > { %v2326_v54 = vmul.f32 %v3003_v36, %v2325_v57 }
 0x68f   : > { %v2317_v30 = vmul.f32 0.5, %v2316_v28  ;;  %2482 = vperm.xlu2 %2923, %v2464_v10  }
 0x690   : > { %v2327_v55 = vmul.f32 0.5, %v2326_v54 }
 0x691   : > { %v2318_v33 = vsub.f32 1.5, %v2317_v30 }
 0x693   : > { %v2319_v9 = vmul.f32 %v3001_v60, %v2318_v33 }
 0x695   : > { %v2323_v58 = vsel %vm2322_vm13, %v3001_v60, %v2319_v9  ;;  %v2328_v60 = vsub.f32 1.5, %v2327_v55 }
 0x696   : > { %v2465_v21 = vmul.f32 %v3047_v34, %v2323_v58 }
 0x697   : > { %v2329_v30 = vmul.f32 %v3003_v36, %v2328_v60 }
 0x698   : > { %2487 = vperm.xlu0 %2924, %v2465_v21  }
 0x699   : > { %v2333_v49 = vsel %vm2332_vm4, %v3003_v36, %v2329_v30 }
 0x6bf   : > { %v2262_v31 = vpop.xlane.xlu1 %2261 }
 0x6c0   : > { %v2284_v44 = vmul.f32 %v2262_v31, %v3385_v52 }
 0x6c2   : > { %v2300_v7 = vadd.f32 1e-05, %v2284_v44 }
 0x6c4   : > { %3004 = vrsqrt.f32 %v2300_v7  ;;  %vm2430_vm15 = vweird.f32 %v2300_v7 }
 0x6c7   : > { %v2235_v0 = vpop.xlane.xlu1 %2234 }
 0x6c8   : > { %v2275_v8 = vmul.f32 %v2235_v0, %v3385_v52  ;;  %v3049_v0 = vld [vmem:[%s3505_s14 + $0x10] sm:$0xff] }
 0x6c9   : > { %v2466_v40 = vmul.f32 %v3049_v0, %v2333_v49  ;;  %v4647_v0 = vld [vmem:[%s3505_s14 + $0x68] sm:$0xff] }
 0x6ca   : > { %v3005_v56 = vpop.eup %3004  ;;  %v4603_v18 = vadd.f32 1e-05, %v2275_v8 }
 0x6cb   : > { %v2425_v50 = vmul.f32 %v3005_v56, %v2300_v7  ;;  %vm2431_vm14 = vweird.f32 %v3005_v56 }
 0x6cc   : > { %3006 = vrsqrt.f32 %v4603_v18  ;;  %vm2432_vm1 = vmor %vm2430_vm15, %vm2431_vm14  ;;  %vm2340_vm9 = vweird.f32 %v4603_v18 }
 0x6cd   : > { %v2426_v39 = vmul.f32 %v3005_v56, %v2425_v50 }
 0x6cf   : > { %v2427_v59 = vmul.f32 0.5, %v2426_v39 }
 0x6d1   : > { %v2428_v4 = vsub.f32 1.5, %v2427_v59  ;;  %v2265_v1 = vpop.xlane.xlu2 %2264 }
 0x6d2   : > { %v2285_v25 = vmul.f32 %v2265_v1, %v3385_v52  ;;  %v4607_v41 = vpop.eup %3006 }
 0x6d3   : > { %v2429_v20 = vmul.f32 %v3005_v56, %v2428_v4  ;;  %v2335_v33 = vmul.f32 %v4607_v41, %v4603_v18  ;;  %vm2341_vm7 = vweird.f32 %v4607_v41 }
 0x6d4   : > { %v2301_v53 = vadd.f32 1e-05, %v2285_v25  ;;  %vm4655_vm10 = vmor %vm2340_vm9, %vm2341_vm7 }
 0x6d5   : > { %v2433_v28 = vsel %vm2432_vm1, %v3005_v56, %v2429_v20  ;;  %v2336_v31 = vmul.f32 %v4607_v41, %v2335_v33 }
 0x6d6   : > { %3008 = vrsqrt.f32 %v2301_v53  ;;  %v2476_v10 = vmul.f32 %v3048_v63, %v2433_v28  ;;  %vm2440_vm6 = vweird.f32 %v2301_v53 }
 0x6d7   : > { %v2337_v56 = vmul.f32 0.5, %v2336_v31 }
 0x6d8   : > { %2542 = vperm.xlu1 %2925, %v2476_v10  }
 0x6d9   : > { %v2238_v9 = vpop.xlane.xlu2 %2237  ;;  %v2268_v58 = vpop.xlane.xlu0 %2267  ;;  %v2338_v60 = vsub.f32 1.5, %v2337_v56 }
 0x6da   : > { %v2276_v34 = vmul.f32 %v2238_v9, %v3385_v52  ;;  %v2286_v21 = vmul.f32 %v2268_v58, %v3385_v52 }
 0x6dc   : > { %v3009_v6 = vpop.eup %3008  ;;  %v4615_v44 = vadd.f32 1e-05, %v2276_v34  ;;  %v4617_v7 = vadd.f32 1e-05, %v2286_v21  ;;  %v2339_v34 = vmul.f32 %v4607_v41, %v2338_v60 }
 0x6dd   : > { %v2435_v57 = vmul.f32 %v3009_v6, %v2301_v53  ;;  %vm2441_vm5 = vweird.f32 %v3009_v6 }
 0x6de   : > { %3010 = vrsqrt.f32 %v4615_v44  ;;  %vm2442_vm8 = vmor %vm2440_vm6, %vm2441_vm5  ;;  %vm2350_vm12 = vweird.f32 %v4615_v44  ;;  %vm2450_vm15 = vweird.f32 %v4617_v7 }
 0x6df   : > { %v2436_v8 = vmul.f32 %v3009_v6, %v2435_v57  ;;  %3012 = vrsqrt.f32 %v4617_v7 }
 0x6e0   : > { %2492 = vperm.xlu1 %2925, %v2466_v40  }
 0x6e1   : > { %v2437_v54 = vmul.f32 0.5, %v2436_v8  ;;  %v2247_v50 = vpop.xlane.xlu2 %2246  ;;  %v2271_v36 = vpop.xlane.xlu1 %2270 }
 0x6e2   : > { %v2279_v39 = vmul.f32 %v2247_v50, %v3385_v52  ;;  %v2287_v55 = vmul.f32 %v2271_v36, %v3385_v52  ;;  %v2241_v59 = vpop.xlane.xlu0 %2240 }
 0x6e3   : > { %v2438_v4 = vsub.f32 1.5, %v2437_v54  ;;  %v2277_v1 = vmul.f32 %v2241_v59, %v3385_v52 }
 0x6e4   : > { %v4625_v25 = vpop.eup %3010  ;;  %v4627_v20 = vadd.f32 1e-05, %v2279_v39  ;;  %v4629_v28 = vadd.f32 1e-05, %v2287_v55 }
 0x6e5   : > { %v4631_v63 = vpop.eup %3012  ;;  %v2439_v10 = vmul.f32 %v3009_v6, %v2438_v4  ;;  %v2345_v30 = vmul.f32 %v4625_v25, %v4615_v44  ;;  %v4635_v33 = vadd.f32 1e-05, %v2277_v1  ;;  %v2343_v1 = vsel %vm4655_vm10, %v4607_v41, %v2339_v34 }
 0x6e6   : > { %v2445_v9 = vmul.f32 %v4631_v63, %v4617_v7  ;;  %3014 = vrsqrt.f32 %v4627_v20  ;;  %vm2351_vm11 = vweird.f32 %v4625_v25  ;;  %vm2451_vm13 = vweird.f32 %v4631_v63 }
 0x6e7   : > { %v2346_v58 = vmul.f32 %v4625_v25, %v2345_v30  ;;  %3016 = vrsqrt.f32 %v4629_v28  ;;  %v2443_v49 = vsel %vm2442_vm8, %v3009_v6, %v2439_v10  ;;  %vm4688_vm14 = vmor %vm2350_vm12, %vm2351_vm11  ;;  %vm2460_vm3 = vweird.f32 %v4629_v28 }
 0x6e8   : > { %v2446_v21 = vmul.f32 %v4631_v63, %v2445_v9  ;;  %3018 = vrsqrt.f32 %v4635_v33  ;;  %v2477_v40 = vmul.f32 %v4647_v0, %v2443_v49  ;;  %vm4704_vm2 = vmor %vm2450_vm15, %vm2451_vm13  ;;  %vm2360_vm5 = vweird.f32 %v4635_v33 }
 0x6e9   : > { %v2347_v53 = vmul.f32 0.5, %v2346_v58  ;;  %v2256_v31 = vpop.xlane.xlu2 %2255  ;;  %v2244_v57 = vpop.xlane.xlu1 %2243  ;;  %vm2380_vm9 = vweird.f32 %v4627_v20 }
 0x6ea   : > { %v2447_v8 = vmul.f32 0.5, %v2446_v21  ;;  %v2282_v56 = vmul.f32 %v2256_v31, %v3385_v52  ;;  %v2278_v54 = vmul.f32 %v2244_v57, %v3385_v52  ;;  %v2250_v50 = vpop.xlane.xlu0 %2249  ;;  %2547 = vperm.xlu2 %2923, %v2477_v40   ;;  %v3051_v31 = vld [vmem:[%s3505_s14 + $0x18] sm:$0xff] }
 0x6eb   : > { %v2348_v6 = vsub.f32 1.5, %v2347_v53  ;;  %v2280_v39 = vmul.f32 %v2250_v50, %v3385_v52  ;;  %v2467_v57 = vmul.f32 %v3051_v31, %v2343_v1  ;;  %v4721_v31 = vld [vmem:[%s3505_s14 + $0x70] sm:$0xff] }
 0x6ec   : > { %v4660_v55 = vpop.eup %3014  ;;  %v2448_v59 = vsub.f32 1.5, %v2447_v8  ;;  %v4662_v18 = vadd.f32 1e-05, %v2282_v56  ;;  %v4664_v4 = vadd.f32 1e-05, %v2278_v54 }
 0x6ed   : > { %v4669_v60 = vpop.eup %3016  ;;  %v2349_v10 = vmul.f32 %v4625_v25, %v2348_v6  ;;  %v2375_v30 = vmul.f32 %v4660_v55, %v4627_v20  ;;  %v4675_v9 = vadd.f32 1e-05, %v2280_v39  ;;  %vm2381_vm8 = vweird.f32 %v4660_v55 }
 0x6ee   : > { %v4677_v58 = vpop.eup %3018  ;;  %v2455_v21 = vmul.f32 %v4669_v60, %v4629_v28  ;;  %3020 = vrsqrt.f32 %v4662_v18  ;;  %v2449_v41 = vmul.f32 %v4631_v63, %v2448_v59  ;;  %vm2461_vm1 = vweird.f32 %v4669_v60  ;;  %v3052_v59 = vld [vmem:[%s3505_s14 + $0x20] sm:$0xff]  ;;  %vm4759_vm11 = vmor %vm2380_vm9, %vm2381_vm8 }
 0x6ef   : > { %v2376_v34 = vmul.f32 %v4660_v55, %v2375_v30  ;;  %v2355_v49 = vmul.f32 %v4677_v58, %v4635_v33  ;;  %3022 = vrsqrt.f32 %v4664_v4  ;;  %v2353_v54 = vsel %vm4688_vm14, %v4625_v25, %v2349_v10  ;;  %vm2462_vm6 = vmor %vm2460_vm3, %vm2461_vm1 }
 0x6f0   : > { %v2456_v44 = vmul.f32 %v4669_v60, %v2455_v21  ;;  %3024 = vrsqrt.f32 %v4675_v9  ;;  %v2468_v1 = vmul.f32 %v3052_v59, %v2353_v54  ;;  %v2453_v10 = vsel %vm4704_vm2, %v4631_v63, %v2449_v41 }
 0x6f1   : > { %v2356_v40 = vmul.f32 %v4677_v58, %v2355_v49  ;;  %v2483_v8 = vpop.permute.xlu2 %2482  ;;  %v2253_v56 = vpop.xlane.xlu1 %2252  ;;  %v2377_v30 = vmul.f32 0.5, %v2376_v34  ;;  %v2478_v34 = vmul.f32 %v4721_v31, %v2453_v10  ;;  %vm2361_vm4 = vweird.f32 %v4677_v58 }
 0x6f2   : > { %v2457_v50 = vmul.f32 0.5, %v2456_v44  ;;  %v2560_v36 = vmul.f32 %v2483_v8, %v4470_v11  ;;  %v2281_v6 = vmul.f32 %v2253_v56, %v3385_v52  ;;  %v2259_v39 = vpop.xlane.xlu0 %2258  ;;  %2497 = vperm.xlu2 %2923, %v2467_v57   ;;  %2502 = vperm.xlu1 %2925, %v2468_v1   ;;  %vm2362_vm7 = vmor %vm2360_vm5, %vm2361_vm4  ;;  %vm2370_vm13 = vweird.f32 %v4664_v4 }
 0x6f3   : > { %v2357_v21 = vmul.f32 0.5, %v2356_v40  ;;  %v2283_v25 = vmul.f32 %v2259_v39, %v3385_v52  ;;  %2552 = vperm.xlu0 %2924, %v2478_v34   ;;  %v2378_v8 = vsub.f32 1.5, %v2377_v30  ;;  %vm2390_vm15 = vweird.f32 %v4675_v9 }
 0x6f4   : > { %v4715_v49 = vpop.eup %3020  ;;  %v2458_v53 = vsub.f32 1.5, %v2457_v50  ;;  %v2640_v11 = vadd.f32 %v4393_v35, %v2560_v36  ;;  %v4718_v44 = vadd.f32 1e-05, %v2281_v6  ;;  %v4749_v6 = vld [vmem:[%s3505_s14 + $0x78] sm:$0xff]  ;;  %vm2410_vm4 = vweird.f32 %v4662_v18 }
 0x6f5   : > { %v2358_v52 = vsub.f32 1.5, %v2357_v21  ;;  %v2405_v35 = vmul.f32 %v4715_v49, %v4662_v18  ;;  %v3023_v63 = vpop.eup %3022  ;;  %v4745_v7 = vadd.f32 1e-05, %v2283_v25  ;;  %v3055_v21 = vld [vmem:[%s3505_s14 + $0x28] sm:$0xff]  ;;  %vm2411_vm1 = vweird.f32 %v4715_v49 }
 0x6f6   : > { %v2459_v41 = vmul.f32 %v4669_v60, %v2458_v53  ;;  %v2656_v57 = vmax.f32 %v2640_v11, 0.0  ;;  %3026 = vrsqrt.f32 %v4718_v44  ;;  %v3025_v40 = vpop.eup %3024  ;;  %v2365_v54 = vmul.f32 %v3023_v63, %v4664_v4  ;;  %vm4777_vm5 = vmor %vm2410_vm4, %vm2411_vm1 }
 0x6f7   : > { %v2359_v28 = vmul.f32 %v4677_v58, %v2358_v52  ;;  %v2406_v56 = vmul.f32 %v4715_v49, %v2405_v35  ;;  %v2385_v33 = vmul.f32 %v3025_v40, %v4675_v9  ;;  %3028 = vrsqrt.f32 %v4745_v7 }
 0x6f8   : > { %2672 = vst.msk [vmem:[%s4728_s20] sm:$0xff] %vm485_vm0, %v2656_v57  ;;  %v2463_v50 = vsel %vm2462_vm6, %v4669_v60, %v2459_v41  ;;  %v2366_v36 = vmul.f32 %v3023_v63, %v2365_v54  ;;  %v2379_v53 = vmul.f32 %v4660_v55, %v2378_v8  ;;  %vm2371_vm10 = vweird.f32 %v3023_v63 }
 0x6f9   : > { %v2479_v39 = vmul.f32 %v4749_v6, %v2463_v50  ;;  %v2363_v59 = vsel %vm2362_vm7, %v4677_v58, %v2359_v28  ;;  %v2407_v1 = vmul.f32 0.5, %v2406_v56  ;;  %v2386_v30 = vmul.f32 %v3025_v40, %v2385_v33  ;;  %vm2372_vm14 = vmor %vm2370_vm13, %vm2371_vm10 }
 0x6fa   : > { %v2469_v10 = vmul.f32 %v3055_v21, %v2363_v59  ;;  %v2367_v25 = vmul.f32 0.5, %v2366_v36  ;;  %vm2391_vm12 = vweird.f32 %v3025_v40  ;;  %v2383_v20 = vsel %vm4759_vm11, %v4660_v55, %v2379_v53  ;;  %v3056_v36 = vld [vmem:[%s3505_s14 + $0x30] sm:$0xff]  ;;  %v3057_v59 = vld [vmem:[%s3505_s14 + $0x38] sm:$0xff] }
 0x6fb   : > { %v2387_v60 = vmul.f32 0.5, %v2386_v30  ;;  %2557 = vperm.xlu1 %2925, %v2479_v39   ;;  %v2408_v35 = vsub.f32 1.5, %v2407_v1  ;;  %vm2392_vm2 = vmor %vm2390_vm15, %vm2391_vm12  ;;  %v2471_v1 = vmul.f32 %v3057_v59, %v2383_v20  ;;  %vm2400_vm6 = vweird.f32 %v4718_v44 }
 0x6fc   : > { %v3027_v11 = vpop.eup %3026  ;;  %2507 = vperm.xlu2 %2923, %v2469_v10   ;;  %v2368_v34 = vsub.f32 1.5, %v2367_v25  ;;  %v3058_v10 = vld [vmem:[%s3505_s14 + $0x40] sm:$0xff]  ;;  %vm2420_vm9 = vweird.f32 %v4745_v7 }
 0x6fd   : > { %v2395_v58 = vmul.f32 %v3027_v11, %v4718_v44  ;;  %v2388_v41 = vsub.f32 1.5, %v2387_v60  ;;  %v3029_v28 = vpop.eup %3028  ;;  %v2409_v4 = vmul.f32 %v4715_v49, %v2408_v35  ;;  %vm2401_vm3 = vweird.f32 %v3027_v11  ;;  %v3060_v44 = vld [vmem:[%s3505_s14 + $0x50] sm:$0xff] }
 0x6fe   : > { %v2369_v57 = vmul.f32 %v3023_v63, %v2368_v34  ;;  %v2415_v33 = vmul.f32 %v3029_v28, %v4745_v7  ;;  %vm2402_vm7 = vmor %vm2400_vm6, %vm2401_vm3  ;;  %vm2421_vm8 = vweird.f32 %v3029_v28  ;;  %v3059_v34 = vld [vmem:[%s3505_s14 + $0x48] sm:$0xff] }
 0x6ff   : > { %v2396_v8 = vmul.f32 %v3027_v11, %v2395_v58  ;;  %v2389_v56 = vmul.f32 %v3025_v40, %v2388_v41  ;;  %v2413_v18 = vsel %vm4777_vm5, %v4715_v49, %v2409_v4  ;;  %vm2422_vm10 = vmor %vm2420_vm9, %vm2421_vm8 }
 0x700   : > { %v2373_v50 = vsel %vm2372_vm14, %v3023_v63, %v2369_v57  ;;  %v2416_v21 = vmul.f32 %v3029_v28, %v2415_v33  ;;  %v2474_v41 = vmul.f32 %v3060_v44, %v2413_v18 }
 0x701   : > { %v2397_v54 = vmul.f32 0.5, %v2396_v8  ;;  %v2470_v39 = vmul.f32 %v3056_v36, %v2373_v50  ;;  %v2393_v55 = vsel %vm2392_vm2, %v3025_v40, %v2389_v56 }
 0x702   : > { %v2472_v9 = vmul.f32 %v3058_v10, %v2393_v55  ;;  %v2417_v40 = vmul.f32 0.5, %v2416_v21 }
 0x703   : > { %v2398_v30 = vsub.f32 1.5, %v2397_v54  ;;  %2512 = vperm.xlu1 %2925, %v2470_v39  }
 0x704   : > { %2517 = vperm.xlu2 %2923, %v2471_v1   ;;  %2522 = vperm.xlu0 %2924, %v2472_v9   ;;  %v2418_v25 = vsub.f32 1.5, %v2417_v40 }
 0x705   : > { %v2399_v53 = vmul.f32 %v3027_v11, %v2398_v30 }
 0x706   : > { %v2419_v52 = vmul.f32 %v3029_v28, %v2418_v25 }
 0x707   : > { %v2403_v60 = vsel %vm2402_vm7, %v3027_v11, %v2399_v53  ;;  %v3061_v11 = vld [vmem:[%s3505_s14 + $0x58] sm:$0xff] }
 0x708   : > { %v2473_v58 = vmul.f32 %v3059_v34, %v2403_v60  ;;  %v2423_v8 = vsel %vm2422_vm10, %v3029_v28, %v2419_v52 }
 0x709   : > { %v2475_v20 = vmul.f32 %v3061_v11, %v2423_v8 }
 0x70a   : > { %v2488_v35 = vpop.permute.xlu0 %2487 }
 0x70b   : > { %v2561_v57 = vmul.f32 %v2488_v35, %v4495_v29  ;;  %2527 = vperm.xlu1 %2925, %v2473_v58  }
 0x70c   : > { %2532 = vperm.xlu2 %2923, %v2474_v41   ;;  %2537 = vperm.xlu0 %2924, %v2475_v20  }
 0x70d   : > { %v2641_v56 = vadd.f32 %v4395_v38, %v2561_v57 }
 0x70f   : > { %v2657_v49 = vmax.f32 %v2641_v56, 0.0 }
 0x711   : > { %2673 = vst.msk [vmem:[%s4728_s20 + $0x8] sm:$0xff] %vm485_vm0, %v2657_v49 }
 0x713   : > { %2926 = vset.pattern.permute.xlu1 %v3075_v2 }
 0x714   : > { %2927 = vset.pattern.permute.xlu2 %v3075_v2  ;;  %2629 = vperm.xlu1 %2926, %v4647_v0  }
 0x715   : > { %2633 = vperm.xlu2 %2927, %v4721_v31   ;;  %2928 = vset.pattern.permute.xlu0 %v3075_v2 }
 0x716   : > { %2637 = vperm.xlu0 %2928, %v4749_v6  }
 0x744   : > { %v2548_v29 = vpop.permute.xlu2 %2547 }
 0x745   : > { %v2573_v41 = vmul.f32 %v2548_v29, %v4521_v24 }
 0x74a   : > { %v2543_v38 = vpop.permute.xlu1 %2542 }
 0x74b   : > { %v2572_v7 = vmul.f32 %v2543_v38, %v4507_v61 }
 0x74c   : > { %v2498_v54 = vpop.permute.xlu2 %2497 }
 0x74d   : > { %v2652_v28 = vadd.f32 %v4434_v23, %v2572_v7  ;;  %v2563_v33 = vmul.f32 %v2498_v54, %v4514_v3 }
 0x74f   : > { %v2668_v50 = vmax.f32 %v2652_v28, 0.0  ;;  %v2643_v0 = vadd.f32 %v4402_v27, %v2563_v33 }
 0x751   : > { %2684 = vst.msk [vmem:[%s4728_s20 + $0x60] sm:$0xff] %vm485_vm0, %v2668_v50  ;;  %v2659_v31 = vmax.f32 %v2643_v0, 0.0 }
 0x752   : > { %v2493_v2 = vpop.permute.xlu1 %2492 }
 0x753   : > { %v2562_v6 = vmul.f32 %v2493_v2, %v4489_v51  ;;  %2675 = vst.msk [vmem:[%s4728_s20 + $0x18] sm:$0xff] %vm485_vm0, %v2659_v31 }
 0x755   : > { %v2642_v61 = vadd.f32 %v4407_v48, %v2562_v6 }
 0x756   : > { %v2508_v4 = vpop.permute.xlu2 %2507 }
 0x757   : > { %v2658_v23 = vmax.f32 %v2642_v61, 0.0  ;;  %v2565_v36 = vmul.f32 %v2508_v4, %v4550_v14 }
 0x759   : > { %2674 = vst.msk [vmem:[%s4728_s20 + $0x10] sm:$0xff] %vm485_vm0, %v2658_v23  ;;  %v2645_v3 = vadd.f32 %v4413_v45, %v2565_v36 }
 0x75b   : > { %v2661_v27 = vmax.f32 %v2645_v3, 0.0 }
 0x75d   : > { %2677 = vst.msk [vmem:[%s4728_s20 + $0x28] sm:$0xff] %vm485_vm0, %v2661_v27 }
 0x75e   : > { %v2518_v39 = vpop.permute.xlu2 %2517 }
 0x75f   : > { %v2567_v51 = vmul.f32 %v2518_v39, %v4544_v37 }
 0x761   : > { %v2647_v59 = vadd.f32 %v4429_v15, %v2567_v51 }
 0x763   : > { %v2663_v1 = vmax.f32 %v2647_v59, 0.0 }
 0x764   : > { %v2503_v48 = vpop.permute.xlu1 %2502 }
 0x765   : > { %2679 = vst.msk [vmem:[%s4728_s20 + $0x38] sm:$0xff] %vm485_vm0, %v2663_v1  ;;  %v2564_v55 = vmul.f32 %v2503_v48, %v4529_v17  ;;  %v2553_v63 = vpop.permute.xlu0 %2552 }
 0x766   : > { %v2533_v14 = vpop.permute.xlu2 %2532  ;;  %v2574_v15 = vmul.f32 %v2553_v63, %v4532_v47 }
 0x767   : > { %v2570_v45 = vmul.f32 %v2533_v14, %v4565_v42  ;;  %v2644_v30 = vadd.f32 %v4415_v12, %v2564_v55 }
 0x769   : > { %v2650_v21 = vadd.f32 %v4451_v26, %v2570_v45  ;;  %v2660_v10 = vmax.f32 %v2644_v30, 0.0 }
 0x76b   : > { %v2666_v9 = vmax.f32 %v2650_v21, 0.0  ;;  %2676 = vst.msk [vmem:[%s4728_s20 + $0x20] sm:$0xff] %vm485_vm0, %v2660_v10 }
 0x76d   : > { %2682 = vst.msk [vmem:[%s4728_s20 + $0x50] sm:$0xff] %vm485_vm0, %v2666_v9  ;;  %v2558_v37 = vpop.permute.xlu1 %2557 }
 0x76f   : > { %v2634_v53 = vpop.permute.xlu2 %2633 }
 0x770   : > { %v2654_v17 = vadd.f32 %v2634_v53, %v2574_v15 }
 0x772   : > { %v2670_v40 = vmax.f32 %v2654_v17, 0.0 }
 0x774   : > { %2686 = vst.msk [vmem:[%s4728_s20 + $0x70] sm:$0xff] %vm485_vm0, %v2670_v40 }
 0x775   : > { %v2513_v12 = vpop.permute.xlu1 %2512 }
 0x776   : > { %v2566_v26 = vmul.f32 %v2513_v12, %v4568_v62  ;;  %v2523_v42 = vpop.permute.xlu0 %2522 }
 0x777   : > { %v2568_v25 = vmul.f32 %v2523_v42, %v4571_v5 }
 0x778   : > { %v2646_v60 = vadd.f32 %v4409_v32, %v2566_v26 }
 0x779   : > { %v2648_v18 = vadd.f32 %v4427_v46, %v2568_v25 }
 0x77a   : > { %v2662_v34 = vmax.f32 %v2646_v60, 0.0 }
 0x77b   : > { %v2664_v47 = vmax.f32 %v2648_v18, 0.0 }
 0x77c   : > { %2678 = vst.msk [vmem:[%s4728_s20 + $0x30] sm:$0xff] %vm485_vm0, %v2662_v34 }
 0x77d   : > { %2680 = vst.msk [vmem:[%s4728_s20 + $0x40] sm:$0xff] %vm485_vm0, %v2664_v47  ;;  %v2528_v58 = vpop.permute.xlu1 %2527 }
 0x77e   : > { %v2569_v52 = vmul.f32 %v2528_v58, %v4586_v16  ;;  %v2538_v62 = vpop.permute.xlu0 %2537  ;;  %v2575_v16 = vmul.f32 %v2558_v37, %v4547_v19 }
 0x77f   : > { %v2571_v5 = vmul.f32 %v2538_v62, %v4589_v13 }
 0x780   : > { %v2649_v35 = vadd.f32 %v4417_v43, %v2569_v52 }
 0x781   : > { %v2651_v44 = vadd.f32 %v4449_v22, %v2571_v5 }
 0x782   : > { %v2665_v32 = vmax.f32 %v2649_v35, 0.0 }
 0x783   : > { %v2667_v46 = vmax.f32 %v2651_v44, 0.0 }
 0x784   : > { %2681 = vst.msk [vmem:[%s4728_s20 + $0x48] sm:$0xff] %vm485_vm0, %v2665_v32 }
 0x785   : > { %2683 = vst.msk [vmem:[%s4728_s20 + $0x58] sm:$0xff] %vm485_vm0, %v2667_v46 }
 0x786   : > { %v2630_v57 = vpop.permute.xlu1 %2629 }
 0x787   : > { %v2653_v8 = vadd.f32 %v2630_v57, %v2573_v41 }
 0x788   : > { %v2638_v11 = vpop.permute.xlu0 %2637 }
 0x789   : > { %v2669_v20 = vmax.f32 %v2653_v8, 0.0  ;;  %v2655_v43 = vadd.f32 %v2638_v11, %v2575_v16 }
 0x78b   : > { %2685 = vst.msk [vmem:[%s4728_s20 + $0x68] sm:$0xff] %vm485_vm0, %v2669_v20  ;;  %v2671_v13 = vmax.f32 %v2655_v43, 0.0 }
 0x78d   : > { %2687 = vst.msk [vmem:[%s4728_s20 + $0x78] sm:$0xff] %vm485_vm0, %v2671_v13 }
 0x78e PF: > { %s15_s18 = sadd.s32 1, %s3068_s18  }
 0x78f   : > { %p12_p4 = scmp.ge.s32.totalorder %s15_s18, 4  }
 0x791   :  { %14 = sbr.rel (!%p12_p4) target bundleno = 1 (0x1), region = 79 }

</bundles_post_ra>
